<compile_context>
chip_gen: v5e
topology: v5e:2x2
jax: 0.10.0
libtpu: 0.0.40
codegen_flags: <defaults>
</compile_context>

<pallas_src>
import functools

import jax
import jax.numpy as jnp
from jax.experimental import pallas as pl
from jax.experimental.pallas import tpu as pltpu

LN_EPS = 1e-5
NEG_INF = -1e30


def _layernorm(v, g, b):
    mu = jnp.mean(v, axis=-1, keepdims=True)
    var = jnp.mean((v - mu) ** 2, axis=-1, keepdims=True)
    return (v - mu) * jax.lax.rsqrt(var + LN_EPS) * g + b


def block_kernel(x_ref, ln1g_ref, ln1b_ref, wqkv_ref, wproj_ref, bproj_ref,
                 ln2g_ref, ln2b_ref, w1_ref, b1_ref, w2_ref, b2_ref, out_ref,
                 *, num_heads, compute_dtype):
    x = x_ref[0].astype(jnp.float32)              # (T, C)
    T, C = x.shape
    H = num_heads
    hs = C // H
    scale = hs ** -0.5
    cd = compute_dtype

    # Hoisted: causal (tril) mask, built once per kernel invocation.
    row = jax.lax.broadcasted_iota(jnp.int32, (T, T), 0)
    col = jax.lax.broadcasted_iota(jnp.int32, (T, T), 1)
    causal = row >= col

    # ---- sublayer 1: x = x + MHA(LN1(x)) -----------------------------------
    xn = _layernorm(x, ln1g_ref[0], ln1b_ref[0])

    # Fused QKV projection: single bf16 (T,C)x(C,3C) matmul, f32 accumulation.
    qkv = jnp.dot(xn.astype(cd), wqkv_ref[...],
                  preferred_element_type=jnp.float32)            # (T, 3C) f32

    # Per-head attention from lane-slices of the fused QKV.  Each head's output
    # goes straight through its slice of the output projection into an f32
    # accumulator: no concatenate, only one head's score matrix live at a time.
    sa = jnp.zeros((T, C), jnp.float32)
    for h in range(H):                             # head count: small & static
        lo = h * hs
        q_h = qkv[:, lo:lo + hs].astype(cd)                      # (T, hs)
        k_h = qkv[:, C + lo:C + lo + hs].astype(cd)              # (T, hs)
        v_h = qkv[:, 2 * C + lo:2 * C + lo + hs].astype(cd)      # (T, hs)

        s = jnp.einsum('qd,kd->qk', q_h, k_h,
                       preferred_element_type=jnp.float32) * scale
        s = jnp.where(causal, s, NEG_INF)          # finite fill: no inf-inf
        s = s - jnp.max(s, axis=-1, keepdims=True)
        p = jnp.exp(s)
        p = p * pl.reciprocal(jnp.sum(p, axis=-1, keepdims=True), approx=True)

        o_h = jnp.dot(p.astype(cd), v_h,
                      preferred_element_type=jnp.float32)        # (T, hs)
        sa = sa + jnp.dot(o_h.astype(cd), wproj_ref[lo:lo + hs, :],
                          preferred_element_type=jnp.float32)    # (T, C)

    sa = sa + bproj_ref[0]
    # TODO(synk): dropout omitted (inference / p=0 behaviour).
    x1 = x + sa

    # ---- sublayer 2: x = x + FFN(LN2(x)) ------------------------------------
    xn2 = _layernorm(x1, ln2g_ref[0], ln2b_ref[0])
    h1 = jnp.maximum(
        jnp.dot(xn2.astype(cd), w1_ref[...],
                preferred_element_type=jnp.float32) + b1_ref[0], 0.0)
    ff = jnp.dot(h1.astype(cd), w2_ref[...],
                 preferred_element_type=jnp.float32) + b2_ref[0]

    out_ref[0] = (x1 + ff).astype(out_ref.dtype)


def transformer_block(x, params, *, compute_dtype=jnp.bfloat16):
    B, T, C = x.shape
    H, _, hs = params["wq"].shape

    # Fuse per-head Q/K/V weights (H, C, hs) -> one MXU-shaped (C, 3C) weight,
    # matching torch.cat([head_h(x) ...], dim=-1) column order per head.
    def fuse(w):                                   # (H, C, hs) -> (C, H*hs)
        return w.transpose(1, 0, 2).reshape(C, H * hs)

    wqkv = jnp.concatenate(
        [fuse(params["wq"]), fuse(params["wk"]), fuse(params["wv"])],
        axis=1).astype(compute_dtype)                            # (C, 3C)

    ordered = [
        params["ln1_g"].astype(jnp.float32),
        params["ln1_b"].astype(jnp.float32),
        wqkv,
        params["wproj"].astype(compute_dtype),
        params["bproj"].astype(jnp.float32),
        params["ln2_g"].astype(jnp.float32),
        params["ln2_b"].astype(jnp.float32),
        params["w1"].astype(compute_dtype),
        params["b1"].astype(jnp.float32),
        params["w2"].astype(compute_dtype),
        params["b2"].astype(jnp.float32),
    ]

    # Weights are grid-invariant (constant index_map): Pallas does not re-DMA
    # them between grid steps.
    def full_spec(p):
        nd = p.ndim
        return pl.BlockSpec(p.shape, lambda b, _nd=nd: (0,) * _nd)

    in_specs = [pl.BlockSpec((1, T, C), lambda b: (b, 0, 0))]
    in_specs += [full_spec(p) for p in ordered]

    kernel = functools.partial(block_kernel, num_heads=H,
                               compute_dtype=compute_dtype)

    return pl.pallas_call(
        kernel,
        out_shape=jax.ShapeDtypeStruct((B, T, C), x.dtype),
        grid_spec=pltpu.PrefetchScalarGridSpec(
            num_scalar_prefetch=0,
            grid=(B,),
            in_specs=in_specs,
            out_specs=pl.BlockSpec((1, T, C), lambda b: (b, 0, 0)),
        ),
        compiler_params=pltpu.CompilerParams(
            dimension_semantics=("parallel",),
            vmem_limit_bytes=32 * 1024 * 1024),
    )(x, *ordered)


def make_params(key, C, H):
    hs = C // H
    ks = jax.random.split(key, 13)
    s = 0.02
    return {
        "ln1_g": 1.0 + 0.1 * jax.random.normal(ks[0], (1, C), jnp.float32),
        "ln1_b": 0.1 * jax.random.normal(ks[1], (1, C), jnp.float32),
        "wq": s * jax.random.normal(ks[2], (H, C, hs), jnp.float32),
        "wk": s * jax.random.normal(ks[3], (H, C, hs), jnp.float32),
        "wv": s * jax.random.normal(ks[4], (H, C, hs), jnp.float32),
        "wproj": s * jax.random.normal(ks[5], (H * hs, C), jnp.float32),
        "bproj": s * jax.random.normal(ks[6], (1, C), jnp.float32),
        "ln2_g": 1.0 + 0.1 * jax.random.normal(ks[7], (1, C), jnp.float32),
        "ln2_b": 0.1 * jax.random.normal(ks[8], (1, C), jnp.float32),
        "w1": s * jax.random.normal(ks[9], (C, 4 * C), jnp.float32),
        "b1": s * jax.random.normal(ks[10], (1, 4 * C), jnp.float32),
        "w2": s * jax.random.normal(ks[11], (4 * C, C), jnp.float32),
        "b2": s * jax.random.normal(ks[12], (1, C), jnp.float32),
    }


def block_reference(x, p):
    """Pure-JAX f32 reference mirroring the PyTorch forward (eval mode)."""
    B, T, C = x.shape
    H, _, hs = p["wq"].shape

    def ln(v, g, b):
        mu = v.mean(-1, keepdims=True)
        var = ((v - mu) ** 2).mean(-1, keepdims=True)
        return (v - mu) / jnp.sqrt(var + LN_EPS) * g + b

    xn = ln(x, p["ln1_g"][0], p["ln1_b"][0])
    q = jnp.einsum("btc,hcd->bhtd", xn, p["wq"])
    k = jnp.einsum("btc,hcd->bhtd", xn, p["wk"])
    v = jnp.einsum("btc,hcd->bhtd", xn, p["wv"])
    s = jnp.einsum("bhtd,bhsd->bhts", q, k) * hs ** -0.5
    mask = jnp.tril(jnp.ones((T, T), bool))
    s = jnp.where(mask, s, -jnp.inf)
    a = jax.nn.softmax(s, axis=-1)
    o = jnp.einsum("bhts,bhsd->bhtd", a, v)
    cat = o.transpose(0, 2, 1, 3).reshape(B, T, C)
    sa = cat @ p["wproj"] + p["bproj"][0]
    x1 = x + sa
    xn2 = ln(x1, p["ln2_g"][0], p["ln2_b"][0])
    ff = jnp.maximum(xn2 @ p["w1"] + p["b1"][0], 0.0) @ p["w2"] + p["b2"][0]
    return x1 + ff


if __name__ == "__main__":
    # Small but lane-dense config: C multiple of 128, head_size = 128.
    B, T, C, H = 2, 32, 256, 2        # batch, block_size (seq), embeddings, heads
    key = jax.random.PRNGKey(0)
    kx, kp = jax.random.split(key)
    x = jax.random.normal(kx, (B, T, C), jnp.float32)
    params = make_params(kp, C, H)

    ref = block_reference(x, params)

    # Algorithmic check: f32 compute path, tight tolerance.
    out_f32 = jax.block_until_ready(
        transformer_block(x, params, compute_dtype=jnp.float32))
    assert out_f32.shape == (B, T, C)
    assert jnp.allclose(out_f32, ref, atol=2e-3, rtol=2e-3), "f32 path mismatch"

    # Default performance path: bf16 MXU operands, f32 accumulation.
    out = jax.block_until_ready(transformer_block(x, params))
    assert out.shape == (B, T, C)
    assert jnp.allclose(out, ref, atol=3e-2, rtol=3e-2), "bf16 path mismatch"

    print("KERNEL_OK")
</pallas_src>

<mosaic_0001>
module attributes {stable_mosaic.version = 11 : i64} {
  func.func @block_kernel(%arg0: i32, %arg1: memref<1x32x256xf32, #tpu.memory_space<vmem>>, %arg2: memref<1x256xf32, #tpu.memory_space<vmem>>, %arg3: memref<1x256xf32, #tpu.memory_space<vmem>>, %arg4: memref<256x768xf32, #tpu.memory_space<vmem>>, %arg5: memref<256x256xf32, #tpu.memory_space<vmem>>, %arg6: memref<1x256xf32, #tpu.memory_space<vmem>>, %arg7: memref<1x256xf32, #tpu.memory_space<vmem>>, %arg8: memref<1x256xf32, #tpu.memory_space<vmem>>, %arg9: memref<256x1024xf32, #tpu.memory_space<vmem>>, %arg10: memref<1x1024xf32, #tpu.memory_space<vmem>>, %arg11: memref<1024x256xf32, #tpu.memory_space<vmem>>, %arg12: memref<1x256xf32, #tpu.memory_space<vmem>>, %arg13: memref<1x32x256xf32, #tpu.memory_space<vmem>>) attributes {dimension_semantics = [#tpu.dimension_semantics<parallel>], iteration_bounds = array<i64: 2>, scalar_prefetch = 0 : i64, scratch_operands = 0 : i64, tpu.core_type = #tpu.core_type<tc>, window_params = [{transform_indices = @transform_0, window_bounds = array<i64: 1, 32, 256>}, {pipeline_mode = #tpu.pipeline_mode<synchronous>, transform_indices = @transform_1, window_bounds = array<i64: 1, 256>}, {pipeline_mode = #tpu.pipeline_mode<synchronous>, transform_indices = @transform_2, window_bounds = array<i64: 1, 256>}, {pipeline_mode = #tpu.pipeline_mode<synchronous>, transform_indices = @transform_3, window_bounds = array<i64: 256, 768>}, {pipeline_mode = #tpu.pipeline_mode<synchronous>, transform_indices = @transform_4, window_bounds = array<i64: 256, 256>}, {pipeline_mode = #tpu.pipeline_mode<synchronous>, transform_indices = @transform_5, window_bounds = array<i64: 1, 256>}, {pipeline_mode = #tpu.pipeline_mode<synchronous>, transform_indices = @transform_6, window_bounds = array<i64: 1, 256>}, {pipeline_mode = #tpu.pipeline_mode<synchronous>, transform_indices = @transform_7, window_bounds = array<i64: 1, 256>}, {pipeline_mode = #tpu.pipeline_mode<synchronous>, transform_indices = @transform_8, window_bounds = array<i64: 256, 1024>}, {pipeline_mode = #tpu.pipeline_mode<synchronous>, transform_indices = @transform_9, window_bounds = array<i64: 1, 1024>}, {pipeline_mode = #tpu.pipeline_mode<synchronous>, transform_indices = @transform_10, window_bounds = array<i64: 1024, 256>}, {pipeline_mode = #tpu.pipeline_mode<synchronous>, transform_indices = @transform_11, window_bounds = array<i64: 1, 256>}, {transform_indices = @transform_12, window_bounds = array<i64: 1, 32, 256>}]} {
    %c0 = arith.constant 0 : index
    %c0_0 = arith.constant 0 : index
    %c0_1 = arith.constant 0 : index
    %0 = vector.load %arg1[%c0, %c0_0, %c0_1] : memref<1x32x256xf32, #tpu.memory_space<vmem>>, vector<1x32x256xf32>
    %1 = vector.shape_cast %0 : vector<1x32x256xf32> to vector<32x256xf32>
    %2 = tpu.iota {dimensions = array<i32: 0>} : vector<32x32xi32>
    %3 = tpu.iota {dimensions = array<i32: 1>} : vector<32x32xi32>
    %4 = arith.cmpi sge, %2, %3 : vector<32x32xi32>
    %c0_2 = arith.constant 0 : index
    %c0_3 = arith.constant 0 : index
    %5 = vector.load %arg2[%c0_2, %c0_3] : memref<1x256xf32, #tpu.memory_space<vmem>>, vector<1x256xf32>
    %6 = vector.shape_cast %5 : vector<1x256xf32> to vector<256xf32>
    %c0_4 = arith.constant 0 : index
    %c0_5 = arith.constant 0 : index
    %7 = vector.load %arg3[%c0_4, %c0_5] : memref<1x256xf32, #tpu.memory_space<vmem>>, vector<1x256xf32>
    %8 = vector.shape_cast %7 : vector<1x256xf32> to vector<256xf32>
    %cst = arith.constant dense<0.000000e+00> : vector<32xf32>
    %9 = vector.multi_reduction <add>, %1, %cst [1] : vector<32x256xf32> to vector<32xf32>
    %10 = vector.shape_cast %9 : vector<32xf32> to vector<32x1xf32>
    %cst_6 = arith.constant 2.560000e+02 : f32
    %11 = vector.broadcast %cst_6 : f32 to vector<32x1xf32>
    %12 = arith.divf %10, %11 : vector<32x1xf32>
    %13 = vector.broadcast %12 : vector<32x1xf32> to vector<32x256xf32>
    %14 = arith.subf %1, %13 : vector<32x256xf32>
    %15 = arith.mulf %14, %14 : vector<32x256xf32>
    %cst_7 = arith.constant dense<0.000000e+00> : vector<32xf32>
    %16 = vector.multi_reduction <add>, %15, %cst_7 [1] : vector<32x256xf32> to vector<32xf32>
    %17 = vector.shape_cast %16 : vector<32xf32> to vector<32x1xf32>
    %cst_8 = arith.constant 2.560000e+02 : f32
    %18 = vector.broadcast %cst_8 : f32 to vector<32x1xf32>
    %19 = arith.divf %17, %18 : vector<32x1xf32>
    %20 = vector.broadcast %12 : vector<32x1xf32> to vector<32x256xf32>
    %21 = arith.subf %1, %20 : vector<32x256xf32>
    %cst_9 = arith.constant 9.99999974E-6 : f32
    %22 = vector.broadcast %cst_9 : f32 to vector<32x1xf32>
    %23 = arith.addf %19, %22 : vector<32x1xf32>
    %24 = math.rsqrt %23 : vector<32x1xf32>
    %25 = vector.broadcast %24 : vector<32x1xf32> to vector<32x256xf32>
    %26 = arith.mulf %21, %25 : vector<32x256xf32>
    %27 = vector.shape_cast %6 : vector<256xf32> to vector<1x256xf32>
    %28 = vector.broadcast %27 : vector<1x256xf32> to vector<32x256xf32>
    %29 = arith.mulf %26, %28 : vector<32x256xf32>
    %30 = vector.shape_cast %8 : vector<256xf32> to vector<1x256xf32>
    %31 = vector.broadcast %30 : vector<1x256xf32> to vector<32x256xf32>
    %32 = arith.addf %29, %31 : vector<32x256xf32>
    %c0_10 = arith.constant 0 : index
    %c0_11 = arith.constant 0 : index
    %33 = vector.load %arg4[%c0_10, %c0_11] : memref<256x768xf32, #tpu.memory_space<vmem>>, vector<256x768xf32>
    %cst_12 = arith.constant dense<0.000000e+00> : vector<32x768xf32>
    %34 = tpu.matmul %32, %33, %cst_12 {dimension_numbers = #tpu.dot_dimension_numbers<[1], [0], [0], [1], [0, 0, 1, 1], [], []>} : vector<32x256xf32>, vector<256x768xf32>, vector<32x768xf32> -> vector<32x768xf32>
    %cst_13 = arith.constant 0.000000e+00 : f32
    %35 = vector.broadcast %cst_13 : f32 to vector<32x256xf32>
    %36 = vector.extract_strided_slice %34 {offsets = [0, 0], sizes = [32, 128], strides = [1, 1]} : vector<32x768xf32> to vector<32x128xf32>
    %37 = vector.extract_strided_slice %34 {offsets = [0, 256], sizes = [32, 128], strides = [1, 1]} : vector<32x768xf32> to vector<32x128xf32>
    %38 = vector.extract_strided_slice %34 {offsets = [0, 512], sizes = [32, 128], strides = [1, 1]} : vector<32x768xf32> to vector<32x128xf32>
    "tpu.trace_start"() <{level = 10 : i32, message = "qd,kd->qk"}> : () -> ()
    %cst_14 = arith.constant dense<0.000000e+00> : vector<32x32xf32>
    %39 = tpu.matmul %36, %37, %cst_14 {dimension_numbers = #tpu.dot_dimension_numbers<[1], [1], [0], [0], [0, 0, 1, 0], [], []>} : vector<32x128xf32>, vector<32x128xf32>, vector<32x32xf32> -> vector<32x32xf32>
    "tpu.trace_stop"() : () -> ()
    %cst_15 = arith.constant 0.0883883461 : f32
    %40 = vector.broadcast %cst_15 : f32 to vector<32x32xf32>
    %41 = arith.mulf %39, %40 : vector<32x32xf32>
    %cst_16 = arith.constant -1.000000e+30 : f32
    %42 = vector.broadcast %cst_16 : f32 to vector<32x32xf32>
    %43 = arith.select %4, %41, %42 : vector<32x32xi1>, vector<32x32xf32>
    %cst_17 = arith.constant dense<0xFF800000> : vector<32xf32>
    %44 = vector.multi_reduction <maximumf>, %43, %cst_17 [1] : vector<32x32xf32> to vector<32xf32>
    %45 = vector.shape_cast %44 : vector<32xf32> to vector<32x1xf32>
    %46 = vector.broadcast %45 : vector<32x1xf32> to vector<32x32xf32>
    %47 = arith.subf %43, %46 : vector<32x32xf32>
    %48 = math.exp %47 : vector<32x32xf32>
    %cst_18 = arith.constant dense<0.000000e+00> : vector<32xf32>
    %49 = vector.multi_reduction <add>, %48, %cst_18 [1] : vector<32x32xf32> to vector<32xf32>
    %50 = vector.shape_cast %49 : vector<32xf32> to vector<32x1xf32>
    %51 = tpu.reciprocal %50 {approx = true} : vector<32x1xf32> -> vector<32x1xf32>
    %52 = vector.broadcast %51 : vector<32x1xf32> to vector<32x32xf32>
    %53 = arith.mulf %48, %52 : vector<32x32xf32>
    %cst_19 = arith.constant dense<0.000000e+00> : vector<32x128xf32>
    %54 = tpu.matmul %53, %38, %cst_19 {dimension_numbers = #tpu.dot_dimension_numbers<[1], [0], [0], [1], [0, 0, 1, 1], [], []>} : vector<32x32xf32>, vector<32x128xf32>, vector<32x128xf32> -> vector<32x128xf32>
    %c0_20 = arith.constant 0 : index
    %c0_21 = arith.constant 0 : index
    %55 = vector.load %arg5[%c0_20, %c0_21] : memref<256x256xf32, #tpu.memory_space<vmem>>, vector<128x256xf32>
    %cst_22 = arith.constant dense<0.000000e+00> : vector<32x256xf32>
    %56 = tpu.matmul %54, %55, %cst_22 {dimension_numbers = #tpu.dot_dimension_numbers<[1], [0], [0], [1], [0, 0, 1, 1], [], []>} : vector<32x128xf32>, vector<128x256xf32>, vector<32x256xf32> -> vector<32x256xf32>
    %57 = arith.addf %35, %56 : vector<32x256xf32>
    %58 = vector.extract_strided_slice %34 {offsets = [0, 128], sizes = [32, 128], strides = [1, 1]} : vector<32x768xf32> to vector<32x128xf32>
    %59 = vector.extract_strided_slice %34 {offsets = [0, 384], sizes = [32, 128], strides = [1, 1]} : vector<32x768xf32> to vector<32x128xf32>
    %60 = vector.extract_strided_slice %34 {offsets = [0, 640], sizes = [32, 128], strides = [1, 1]} : vector<32x768xf32> to vector<32x128xf32>
    "tpu.trace_start"() <{level = 10 : i32, message = "qd,kd->qk"}> : () -> ()
    %cst_23 = arith.constant dense<0.000000e+00> : vector<32x32xf32>
    %61 = tpu.matmul %58, %59, %cst_23 {dimension_numbers = #tpu.dot_dimension_numbers<[1], [1], [0], [0], [0, 0, 1, 0], [], []>} : vector<32x128xf32>, vector<32x128xf32>, vector<32x32xf32> -> vector<32x32xf32>
    "tpu.trace_stop"() : () -> ()
    %cst_24 = arith.constant 0.0883883461 : f32
    %62 = vector.broadcast %cst_24 : f32 to vector<32x32xf32>
    %63 = arith.mulf %61, %62 : vector<32x32xf32>
    %cst_25 = arith.constant -1.000000e+30 : f32
    %64 = vector.broadcast %cst_25 : f32 to vector<32x32xf32>
    %65 = arith.select %4, %63, %64 : vector<32x32xi1>, vector<32x32xf32>
    %cst_26 = arith.constant dense<0xFF800000> : vector<32xf32>
    %66 = vector.multi_reduction <maximumf>, %65, %cst_26 [1] : vector<32x32xf32> to vector<32xf32>
    %67 = vector.shape_cast %66 : vector<32xf32> to vector<32x1xf32>
    %68 = vector.broadcast %67 : vector<32x1xf32> to vector<32x32xf32>
    %69 = arith.subf %65, %68 : vector<32x32xf32>
    %70 = math.exp %69 : vector<32x32xf32>
    %cst_27 = arith.constant dense<0.000000e+00> : vector<32xf32>
    %71 = vector.multi_reduction <add>, %70, %cst_27 [1] : vector<32x32xf32> to vector<32xf32>
    %72 = vector.shape_cast %71 : vector<32xf32> to vector<32x1xf32>
    %73 = tpu.reciprocal %72 {approx = true} : vector<32x1xf32> -> vector<32x1xf32>
    %74 = vector.broadcast %73 : vector<32x1xf32> to vector<32x32xf32>
    %75 = arith.mulf %70, %74 : vector<32x32xf32>
    %cst_28 = arith.constant dense<0.000000e+00> : vector<32x128xf32>
    %76 = tpu.matmul %75, %60, %cst_28 {dimension_numbers = #tpu.dot_dimension_numbers<[1], [0], [0], [1], [0, 0, 1, 1], [], []>} : vector<32x32xf32>, vector<32x128xf32>, vector<32x128xf32> -> vector<32x128xf32>
    %c128 = arith.constant 128 : index
    %c0_29 = arith.constant 0 : index
    %77 = vector.load %arg5[%c128, %c0_29] : memref<256x256xf32, #tpu.memory_space<vmem>>, vector<128x256xf32>
    %cst_30 = arith.constant dense<0.000000e+00> : vector<32x256xf32>
    %78 = tpu.matmul %76, %77, %cst_30 {dimension_numbers = #tpu.dot_dimension_numbers<[1], [0], [0], [1], [0, 0, 1, 1], [], []>} : vector<32x128xf32>, vector<128x256xf32>, vector<32x256xf32> -> vector<32x256xf32>
    %79 = arith.addf %57, %78 : vector<32x256xf32>
    %c0_31 = arith.constant 0 : index
    %c0_32 = arith.constant 0 : index
    %80 = vector.load %arg6[%c0_31, %c0_32] : memref<1x256xf32, #tpu.memory_space<vmem>>, vector<1x256xf32>
    %81 = vector.shape_cast %80 : vector<1x256xf32> to vector<256xf32>
    %82 = vector.shape_cast %81 : vector<256xf32> to vector<1x256xf32>
    %83 = vector.broadcast %82 : vector<1x256xf32> to vector<32x256xf32>
    %84 = arith.addf %79, %83 : vector<32x256xf32>
    %85 = arith.addf %1, %84 : vector<32x256xf32>
    %c0_33 = arith.constant 0 : index
    %c0_34 = arith.constant 0 : index
    %86 = vector.load %arg7[%c0_33, %c0_34] : memref<1x256xf32, #tpu.memory_space<vmem>>, vector<1x256xf32>
    %87 = vector.shape_cast %86 : vector<1x256xf32> to vector<256xf32>
    %c0_35 = arith.constant 0 : index
    %c0_36 = arith.constant 0 : index
    %88 = vector.load %arg8[%c0_35, %c0_36] : memref<1x256xf32, #tpu.memory_space<vmem>>, vector<1x256xf32>
    %89 = vector.shape_cast %88 : vector<1x256xf32> to vector<256xf32>
    %cst_37 = arith.constant dense<0.000000e+00> : vector<32xf32>
    %90 = vector.multi_reduction <add>, %85, %cst_37 [1] : vector<32x256xf32> to vector<32xf32>
    %91 = vector.shape_cast %90 : vector<32xf32> to vector<32x1xf32>
    %cst_38 = arith.constant 2.560000e+02 : f32
    %92 = vector.broadcast %cst_38 : f32 to vector<32x1xf32>
    %93 = arith.divf %91, %92 : vector<32x1xf32>
    %94 = vector.broadcast %93 : vector<32x1xf32> to vector<32x256xf32>
    %95 = arith.subf %85, %94 : vector<32x256xf32>
    %96 = arith.mulf %95, %95 : vector<32x256xf32>
    %cst_39 = arith.constant dense<0.000000e+00> : vector<32xf32>
    %97 = vector.multi_reduction <add>, %96, %cst_39 [1] : vector<32x256xf32> to vector<32xf32>
    %98 = vector.shape_cast %97 : vector<32xf32> to vector<32x1xf32>
    %cst_40 = arith.constant 2.560000e+02 : f32
    %99 = vector.broadcast %cst_40 : f32 to vector<32x1xf32>
    %100 = arith.divf %98, %99 : vector<32x1xf32>
    %101 = vector.broadcast %93 : vector<32x1xf32> to vector<32x256xf32>
    %102 = arith.subf %85, %101 : vector<32x256xf32>
    %cst_41 = arith.constant 9.99999974E-6 : f32
    %103 = vector.broadcast %cst_41 : f32 to vector<32x1xf32>
    %104 = arith.addf %100, %103 : vector<32x1xf32>
    %105 = math.rsqrt %104 : vector<32x1xf32>
    %106 = vector.broadcast %105 : vector<32x1xf32> to vector<32x256xf32>
    %107 = arith.mulf %102, %106 : vector<32x256xf32>
    %108 = vector.shape_cast %87 : vector<256xf32> to vector<1x256xf32>
    %109 = vector.broadcast %108 : vector<1x256xf32> to vector<32x256xf32>
    %110 = arith.mulf %107, %109 : vector<32x256xf32>
    %111 = vector.shape_cast %89 : vector<256xf32> to vector<1x256xf32>
    %112 = vector.broadcast %111 : vector<1x256xf32> to vector<32x256xf32>
    %113 = arith.addf %110, %112 : vector<32x256xf32>
    %c0_42 = arith.constant 0 : index
    %c0_43 = arith.constant 0 : index
    %114 = vector.load %arg9[%c0_42, %c0_43] : memref<256x1024xf32, #tpu.memory_space<vmem>>, vector<256x1024xf32>
    %cst_44 = arith.constant dense<0.000000e+00> : vector<32x1024xf32>
    %115 = tpu.matmul %113, %114, %cst_44 {dimension_numbers = #tpu.dot_dimension_numbers<[1], [0], [0], [1], [0, 0, 1, 1], [], []>} : vector<32x256xf32>, vector<256x1024xf32>, vector<32x1024xf32> -> vector<32x1024xf32>
    %c0_45 = arith.constant 0 : index
    %c0_46 = arith.constant 0 : index
    %116 = vector.load %arg10[%c0_45, %c0_46] : memref<1x1024xf32, #tpu.memory_space<vmem>>, vector<1x1024xf32>
    %117 = vector.shape_cast %116 : vector<1x1024xf32> to vector<1024xf32>
    %118 = vector.shape_cast %117 : vector<1024xf32> to vector<1x1024xf32>
    %119 = vector.broadcast %118 : vector<1x1024xf32> to vector<32x1024xf32>
    %120 = arith.addf %115, %119 : vector<32x1024xf32>
    %cst_47 = arith.constant 0.000000e+00 : f32
    %121 = vector.broadcast %cst_47 : f32 to vector<32x1024xf32>
    %122 = arith.maximumf %120, %121 : vector<32x1024xf32>
    %c0_48 = arith.constant 0 : index
    %c0_49 = arith.constant 0 : index
    %123 = vector.load %arg11[%c0_48, %c0_49] : memref<1024x256xf32, #tpu.memory_space<vmem>>, vector<1024x256xf32>
    %cst_50 = arith.constant dense<0.000000e+00> : vector<32x256xf32>
    %124 = tpu.matmul %122, %123, %cst_50 {dimension_numbers = #tpu.dot_dimension_numbers<[1], [0], [0], [1], [0, 0, 1, 1], [], []>} : vector<32x1024xf32>, vector<1024x256xf32>, vector<32x256xf32> -> vector<32x256xf32>
    %c0_51 = arith.constant 0 : index
    %c0_52 = arith.constant 0 : index
    %125 = vector.load %arg12[%c0_51, %c0_52] : memref<1x256xf32, #tpu.memory_space<vmem>>, vector<1x256xf32>
    %126 = vector.shape_cast %125 : vector<1x256xf32> to vector<256xf32>
    %127 = vector.shape_cast %126 : vector<256xf32> to vector<1x256xf32>
    %128 = vector.broadcast %127 : vector<1x256xf32> to vector<32x256xf32>
    %129 = arith.addf %124, %128 : vector<32x256xf32>
    %130 = arith.addf %85, %129 : vector<32x256xf32>
    %c0_53 = arith.constant 0 : index
    %c0_54 = arith.constant 0 : index
    %c0_55 = arith.constant 0 : index
    %131 = vector.load %arg13[%c0_53, %c0_54, %c0_55] : memref<1x32x256xf32, #tpu.memory_space<vmem>>, vector<1x32x256xf32>
    %132 = vector.shape_cast %131 : vector<1x32x256xf32> to vector<32x256xf32>
    %133 = vector.shape_cast %130 : vector<32x256xf32> to vector<1x32x256xf32>
    tpu.vector_store %arg13[%c0_53, %c0_54, %c0_55], %133 {strides = array<i32>} : memref<1x32x256xf32, #tpu.memory_space<vmem>>, vector<1x32x256xf32>,
    return
  }
  func.func @transform_0(%arg0: i32) -> (i32, i32, i32) {
    %c0_i32 = arith.constant 0 : i32
    %c0_i32_0 = arith.constant 0 : i32
    %c0_i32_1 = arith.constant 0 : i32
    return %arg0, %c0_i32, %c0_i32_0 : i32, i32, i32
  }
  func.func @transform_1(%arg0: i32) -> (i32, i32) {
    %c0_i32 = arith.constant 0 : i32
    %c0_i32_0 = arith.constant 0 : i32
    %c0_i32_1 = arith.constant 0 : i32
    return %c0_i32, %c0_i32_0 : i32, i32
  }
  func.func @transform_2(%arg0: i32) -> (i32, i32) {
    %c0_i32 = arith.constant 0 : i32
    %c0_i32_0 = arith.constant 0 : i32
    %c0_i32_1 = arith.constant 0 : i32
    return %c0_i32, %c0_i32_0 : i32, i32
  }
  func.func @transform_3(%arg0: i32) -> (i32, i32) {
    %c0_i32 = arith.constant 0 : i32
    %c0_i32_0 = arith.constant 0 : i32
    %c0_i32_1 = arith.constant 0 : i32
    return %c0_i32, %c0_i32_0 : i32, i32
  }
  func.func @transform_4(%arg0: i32) -> (i32, i32) {
    %c0_i32 = arith.constant 0 : i32
    %c0_i32_0 = arith.constant 0 : i32
    %c0_i32_1 = arith.constant 0 : i32
    return %c0_i32, %c0_i32_0 : i32, i32
  }
  func.func @transform_5(%arg0: i32) -> (i32, i32) {
    %c0_i32 = arith.constant 0 : i32
    %c0_i32_0 = arith.constant 0 : i32
    %c0_i32_1 = arith.constant 0 : i32
    return %c0_i32, %c0_i32_0 : i32, i32
  }
  func.func @transform_6(%arg0: i32) -> (i32, i32) {
    %c0_i32 = arith.constant 0 : i32
    %c0_i32_0 = arith.constant 0 : i32
    %c0_i32_1 = arith.constant 0 : i32
    return %c0_i32, %c0_i32_0 : i32, i32
  }
  func.func @transform_7(%arg0: i32) -> (i32, i32) {
    %c0_i32 = arith.constant 0 : i32
    %c0_i32_0 = arith.constant 0 : i32
    %c0_i32_1 = arith.constant 0 : i32
    return %c0_i32, %c0_i32_0 : i32, i32
  }
  func.func @transform_8(%arg0: i32) -> (i32, i32) {
    %c0_i32 = arith.constant 0 : i32
    %c0_i32_0 = arith.constant 0 : i32
    %c0_i32_1 = arith.constant 0 : i32
    return %c0_i32, %c0_i32_0 : i32, i32
  }
  func.func @transform_9(%arg0: i32) -> (i32, i32) {
    %c0_i32 = arith.constant 0 : i32
    %c0_i32_0 = arith.constant 0 : i32
    %c0_i32_1 = arith.constant 0 : i32
    return %c0_i32, %c0_i32_0 : i32, i32
  }
  func.func @transform_10(%arg0: i32) -> (i32, i32) {
    %c0_i32 = arith.constant 0 : i32
    %c0_i32_0 = arith.constant 0 : i32
    %c0_i32_1 = arith.constant 0 : i32
    return %c0_i32, %c0_i32_0 : i32, i32
  }
  func.func @transform_11(%arg0: i32) -> (i32, i32) {
    %c0_i32 = arith.constant 0 : i32
    %c0_i32_0 = arith.constant 0 : i32
    %c0_i32_1 = arith.constant 0 : i32
    return %c0_i32, %c0_i32_0 : i32, i32
  }
  func.func @transform_12(%arg0: i32) -> (i32, i32, i32) {
    %c0_i32 = arith.constant 0 : i32
    %c0_i32_0 = arith.constant 0 : i32
    %c0_i32_1 = arith.constant 0 : i32
    return %arg0, %c0_i32, %c0_i32_0 : i32, i32, i32
  }
}

</mosaic_0001>

<bundles_post_ra>
// kernel: tpu_custom_call.1
= control target key start
LH: loop header
LB: loop body
LE: loop exit
PB: predicated region body
PF: predicated region fallthrough
CT: control target
= control target key end

     0   :  { %s5283_s0 = inlined_call_operand.hbm [shape: f32[2,32,256], index: 0, kind: input, shape index: {}]   ;;  %s5284_s1 = inlined_call_operand.hbm [shape: f32[1,256], index: 1, kind: input, shape index: {}]   ;;  %s5285_s2 = inlined_call_operand.hbm [shape: f32[1,256], index: 2, kind: input, shape index: {}]   ;;  %s5286_s3 = inlined_call_operand.hbm [shape: f32[256,768], index: 3, kind: input, shape index: {}]   ;;  %s5287_s4 = inlined_call_operand.hbm [shape: f32[256,256], index: 4, kind: input, shape index: {}]   ;;  %s5288_s5 = inlined_call_operand.hbm [shape: f32[1,256], index: 5, kind: input, shape index: {}]   ;;  %s5289_s6 = inlined_call_operand.hbm [shape: f32[1,256], index: 6, kind: input, shape index: {}]   ;;  %s5290_s7 = inlined_call_operand.hbm [shape: f32[1,256], index: 7, kind: input, shape index: {}]   ;;  %s5291_s8 = inlined_call_operand.hbm [shape: f32[256,1024], index: 8, kind: input, shape index: {}]   ;;  %s5292_s9 = inlined_call_operand.vmem [shape: f32[1,1024], index: 9, kind: input, shape index: {}]   ;;  %s5293_s10 = inlined_call_operand.hbm [shape: f32[1024,256], index: 10, kind: input, shape index: {}]   ;;  %s5294_s11 = inlined_call_operand.vmem [shape: f32[1,256], index: 11, kind: input, shape index: {}]   ;;  %s5295_s12 = inlined_call_operand.hbm [shape: f32[2,32,256], index: 12, kind: output, shape index: {}]  }
   0x1   :  { %5313 = sst [smem:[#allocation27_spill]] %s5284_s1 }
   0x2   :  { %5314 = sst [smem:[#allocation28_spill]] %s5285_s2 }
   0x3   :  { %5315 = sst [smem:[#allocation29_spill]] %s5286_s3 }
   0x4   :  { %5316 = sst [smem:[#allocation30_spill]] %s5287_s4 }
   0x5   :  { %5317 = sst [smem:[#allocation31_spill]] %s5294_s11 }
   0x6   :  { %5318 = sst [smem:[#allocation32_spill]] %s5295_s12 }
   0x7   :  { %17 = vsyncpa [#allocation3], 0 }
   0x8   :  { %19 = vsyncpa [#allocation3 + $0x1], 0 }
   0x9   :  { %20 = vsyncpa [#allocation6], 0 }
   0xa   :  { %21 = vsyncpa [#allocation9], 0 }
   0xb   :  { %22 = vsyncpa [#allocation12], 0 }
   0xc   :  { %23 = vsyncpa [#allocation15], 0 }
   0xd   :  { %24 = vsyncpa [#allocation18], 0 }
   0xe   :  { %25 = vsyncpa [#allocation4], 0 }
   0xf   :  { %27 = vsyncpa [#allocation4 + $0x1], 0  ;;  %s4246_s21 = smov 0   ;;  %s4248_s22 = smov 0  }
  0x10   :  { %s4250_s23 = smov 0   ;;  %s4252_s24 = smov 0  }
  0x11 LB: > { %s5319_s1 = sld [smem:[#allocation27_spill]]  ;;  %s4270_s28 = sadd.s32 4294967295, %s4161_s24   ;;  %s4161_s24 = sphi %s4252_s24, %s5353_s24   ;;  %s4157_s23 = sphi %s4250_s23, %s5352_s23   ;;  %s4153_s22 = sphi %s4248_s22, %s5351_s22   ;;  %s4149_s21 = sphi %s4246_s21, %s5350_s21  }
  0x12   : > { %p3530_p0 = scmp.ge.s32.totalorder %s4161_s24, 1  ;;  %p54_p1 = scmp.eq.s32.totalorder %s4270_s28, 0 }
  0x13   : > { %p321_p2 = scmp.lt.s32.totalorder %s4161_s24, 3  ;;  %s4163_s30 = smov [#allocation5]  }
  0x14   : > { %s335_s13 = sshll.u32 %s4163_s30, 4  ;;  %s5321_s3 = sld [smem:[#allocation29_spill]]  ;;  %s336_s13 = int_to_ptr.vmem [resolvable:$true] %s335_s13 }
  0x15   : > { %p4275_p3 = pnand %p3530_p0, %p321_p2  ;;  %s4164_s18 = smov [#allocation8]  }
  0x16   : > { %s358_s19 = sshll.u32 %s4164_s18, 4  ;;  %s4165_s20 = smov 768   ;;  %s359_s19 = int_to_ptr.vmem [resolvable:$true] %s358_s19 }
  0x17   : > { %s333_s27 = sshll.u32 %s5319_s1, 4  ;;  %p3611_p5 = pneg %p4275_p3  ;;  %s334_s27 = int_to_ptr.hbm [resolvable:$true] %s333_s27 }
  0x18   : > { %s4166_s25 = smov 48   ;;  %s385_s14 = sshll.u32 %s5288_s5, 4  ;;  %s386_s14 = int_to_ptr.hbm [resolvable:$true] %s385_s14 }
  0x19   : > { %p4287_p6 = pnand %p3611_p5, %p54_p1  ;;  %s4167_s15 = smov [#allocation11]  }
  0x1a   : > { %s356_s16 = sshll.u32 %s5321_s3, 4  ;;  %s387_s1 = sshll.u32 %s4167_s15, 4  ;;  %s357_s16 = int_to_ptr.hbm [resolvable:$true] %s356_s16  ;;  %s388_s1 = int_to_ptr.vmem [resolvable:$true] %s387_s1 }
  0x1b   : > { %3614 = dma.hbm_to_vmem [thread:$0]  (!%p4287_p6), %s334_s27, 32, %s336_s13, [#allocation6]  }
  0x1c   : > { %3620 = dma.hbm_to_vmem [thread:$0]  (!%p4287_p6), %s357_s16, 24576, %s359_s19, [#allocation9], %s4165_s20, %s4165_s20, %s4166_s25  }
  0x1d   : > { %s409_s18 = sshll.u32 %s5290_s7, 4  ;;  %s4168_s27 = smov [#allocation14]   ;;  %s410_s18 = int_to_ptr.hbm [resolvable:$true] %s409_s18 }
  0x1e   : > { %3626 = dma.hbm_to_vmem [thread:$0]  (!%p4287_p6), %s386_s14, 32, %s388_s1, [#allocation12]  }
  0x1f   : > { %s411_s13 = sshll.u32 %s4168_s27, 4  ;;  %s5323_s2 = sld [smem:[#allocation28_spill]]  ;;  %s412_s13 = int_to_ptr.vmem [resolvable:$true] %s411_s13 }
  0x20   : > { %3632 = dma.hbm_to_vmem [thread:$0]  (!%p4287_p6), %s410_s18, 32, %s412_s13, [#allocation15]  }
  0x21   : > { %s5324_s4 = sld [smem:[#allocation30_spill]]  ;;  %s4169_s3 = smov [#allocation7]  }
  0x22   : > { %s347_s12 = sshll.u32 %s4169_s3, 4  ;;  %s4170_s1 = smov [#allocation10]   ;;  %s348_s12 = int_to_ptr.vmem [resolvable:$true] %s347_s12 }
  0x23   : > { %s372_s30 = sshll.u32 %s4170_s1, 4  ;;  %s5297_s11 = smov 256   ;;  %s373_s30 = int_to_ptr.vmem [resolvable:$true] %s372_s30 }
  0x24   : > { %s5298_s14 = smov 16   ;;  %s397_s27 = sshll.u32 %s5289_s6, 4  ;;  %s398_s27 = int_to_ptr.hbm [resolvable:$true] %s397_s27 }
  0x25   : > { %s345_s19 = sshll.u32 %s5323_s2, 4  ;;  %s4173_s13 = smov [#allocation13]   ;;  %s346_s19 = int_to_ptr.hbm [resolvable:$true] %s345_s19 }
  0x26   : > { %3617 = dma.hbm_to_vmem [thread:$0]  (!%p4287_p6), %s346_s19, 32, %s348_s12, [#allocation6]  }
  0x27   : > { %s370_s26 = sshll.u32 %s5324_s4, 4  ;;  %s399_s16 = sshll.u32 %s4173_s13, 4  ;;  %s371_s26 = int_to_ptr.hbm [resolvable:$true] %s370_s26  ;;  %s400_s16 = int_to_ptr.vmem [resolvable:$true] %s399_s16 }
  0x28   : > { %3623 = dma.hbm_to_vmem [thread:$0]  (!%p4287_p6), %s371_s26, 8192, %s373_s30, [#allocation9], %s5297_s11, %s5297_s11, %s5298_s14  }
  0x29   : > { %s420_s25 = sshll.u32 %s5291_s8, 4  ;;  %s4174_s26 = smov [#allocation16]   ;;  %s421_s25 = int_to_ptr.hbm [resolvable:$true] %s420_s25 }
  0x2a   : > { %3629 = dma.hbm_to_vmem [thread:$0]  (!%p4287_p6), %s398_s27, 32, %s400_s16, [#allocation12]  }
  0x2b   : > { %s422_s3 = sshll.u32 %s4174_s26, 4  ;;  %s4175_s12 = smov 1024   ;;  %s423_s3 = int_to_ptr.vmem [resolvable:$true] %s422_s3 }
  0x2c   : > { %s4176_s1 = smov 64   ;;  %s437_s18 = sshll.u32 %s5293_s10, 4  ;;  %s438_s18 = int_to_ptr.hbm [resolvable:$true] %s437_s18 }
  0x2d   : > { %3635 = dma.hbm_to_vmem [thread:$0]  (!%p4287_p6), %s421_s25, 32768, %s423_s3, [#allocation15], %s4175_s12, %s4175_s12, %s4176_s1  }
  0x2e   : > { %s4177_s27 = smov [#allocation17]   ;;  %s3529_s16 = sadd.s32 4294967294, %s4161_s24  }
  0x2f   : > { %s439_s13 = sshll.u32 %s4177_s27, 4  ;;  %s4338_s19 = sadd.s32 1, %s4161_s24   ;;  %s440_s13 = int_to_ptr.vmem [resolvable:$true] %s439_s13 }
  0x30   : > { %3638 = dma.hbm_to_vmem [thread:$0]  (!%p4287_p6), %s438_s18, 32768, %s440_s13, [#allocation18], %s5297_s11, %s5297_s11, %s5298_s14  }
  0x31   : > { %s40_s20 = sadd.s32 1, %s4157_s23  ;;  %s37_s25 = ssub.s32 %s4161_s24, %s4338_s19 }
  0x32   : > { %p47_p7 = scmp.ne.s32.totalorder %s4157_s23, %s4153_s22  ;;  %p38_p8 = scmp.eq.s32.totalorder %s37_s25, 0 }
  0x33   : > { %p48_p9 = scmp.eq.s32.totalorder %s4161_s24, 0  ;;  %p53_p10 = scmp.ne.s32.totalorder %s4153_s22, %s4149_s21 }
  0x34   : > { %p308_p11 = scmp.eq.s32.totalorder %s4270_s28, 1  ;;  %p314_p0 = scmp.eq.s32.totalorder %s3529_s16, 1 }
  0x35   : > { %s4350_s26 = scalar_select %p38_p8, %s4157_s23, %s40_s20  }
  0x36   : > { %p4354_p12 = por %p54_p1, %p53_p10  ;;  %p4358_p13 = por %p308_p11, %p47_p7 }
  0x37   : > { %p49_p2 = por %p48_p9, %p47_p7  ;;  %s456_s12 = sand.u32 1, %s4157_s23  }
  0x38   : > { %p4363_p5 = por %p314_p0, %p53_p10  ;;  %p3656_p6 = scmp.lt.s32.totalorder %s4161_s24, 2 }
  0x39   : > { %s3541_s30 = sshll.u32 %s456_s12, 6  ;;  %s3569_s15 = sshll.u32 %s4161_s24, 6 }
  0x3a   : > { %s465_s13 = scalar_lea.hbm %s5283_s0, %s3569_s15  ;;  %s460_s25 = scalar_lea.vmem [#allocation2], %s3541_s30 }
  0x3b   : > { %s466_s20 = sshll.u32 %s465_s13, 4  ;;  %s468_s11 = sshll.u32 %s460_s25, 4  ;;  %s467_s20 = int_to_ptr.hbm [resolvable:$true] %s466_s20  ;;  %s469_s11 = int_to_ptr.vmem [resolvable:$true] %s468_s11 }
  0x3c   : > { %p4372_p8 = pnand %p3656_p6, %p49_p2  ;;  %s457_s14 = scalar_lea.sflag [#allocation3], %s456_s12 }
  0x3d   : > { %s4045_s2 = sshra.s32 %s467_s20, 4  ;;  %s4052_s30 = scalar_lea.hbm %s5283_s0, 128  ;;  %s4046_s2 = int_to_ptr.hbm [resolvable:$true] %s4045_s2 }
  0x3e   : > { %s4047_s4 = scalar_lea.hbm %s4046_s2, 64  ;;  %p4049_p9 = pneg %p4372_p8 }
  0x3f   : > { %p4048_p7 = scmp.ne.s32.totalorder %s4046_s2, %s4047_s4  ;;  %p4053_p0 = scmp.lt.s32.totalorder %s4046_s2, %s5283_s0 }
  0x40   : > { %p4054_p2 = scmp.lt.s32.totalorder %s4052_s30, %s4047_s4 }
  0x41   : > { %p4050_p10 = pnand %p4049_p9, %p4048_p7 }
  0x42   : > { %p4055_p6 = por %p4054_p2, %p4053_p0 }
  0x43   : > { %p4051_p11 = pneg %p4050_p10 }
  0x45   : > { %p4056_p4 = pnand %p4055_p6, %p4051_p11 }
  0x47   : > { %4059 = shalt.err (!%p4056_p4)
}
  0x48   : > { %s5329_s12 = smov 16   ;;  %s5330_s25 = smov 256  }
  0x49   : > { %3642 = dma.hbm_to_vmem [thread:$0]  (!%p4372_p8), %s467_s20, 1024, %s469_s11, %s457_s14, %s5330_s25, %s5330_s25, %s5329_s12  }
  0x4a   : > { %480 = sbr.rel (%p4275_p3) target bundleno = 1954 (0x7a2), region = 68  ;;  %s4392_s15 = sand.u32 (!%p4275_p3), 1, %s4153_s22  }
  0x4b   : > { %s3545_s2 = sshll.u32 (!%p4275_p3), %s4392_s15, 6  ;;  %s483_s4 = scalar_lea.sflag (!%p4275_p3), [#allocation3], %s4392_s15 }
  0x4c   : > { %s4398_s18 = scalar_lea.vmem (!%p4275_p3), [#allocation2], %s3545_s2 }
  0x4f   : > { %4120 = dma.done.wait (%p4354_p12), %s483_s4, 1024  }
  0x50   : > { %4122 = vsyncadd (%p4354_p12), %s483_s4, 4294966272 }
  0x51   : > { %4124 = dma.done.wait (%p54_p1), [#allocation6], 64  }
  0x52   : > { %4126 = vsyncadd (%p54_p1), [#allocation6], 4294967232 }
  0x53   : > { %4128 = dma.done.wait (%p54_p1), [#allocation9], 32768  }
  0x54   : > { %4130 = vsyncadd (%p54_p1), [#allocation9], 4294934528 }
  0x55   : > { %4132 = dma.done.wait (%p54_p1), [#allocation12], 64  }
  0x56   : > { %4134 = vsyncadd (%p54_p1), [#allocation12], 4294967232 }
  0x57   : > { %4136 = dma.done.wait (%p54_p1), [#allocation15], 32800  }
  0x58   : > { %4138 = vsyncadd (%p54_p1), [#allocation15], 4294934496 }
  0x59   : > { %4140 = dma.done.wait (%p54_p1), [#allocation18], 32768  }
  0x5a   : > { %4142 = vsyncadd (%p54_p1), [#allocation18], 4294934528  ;;  %v577_v0 = vld [vmem:[%s4398_s18 + $0x20] sm:$0xff]  ;;  %v578_v1 = vld [vmem:[%s4398_s18 + $0x28] sm:$0xff]  ;;  %v4178_v12 = vmov 256.0   ;;  %vm1304_vm14 = vcmask 261120  }
  0x5b   : > { %v573_v2 = vld [vmem:[%s4398_s18] sm:$0xff]  ;;  %v600_v3 = vadd.f32 %v578_v1, %v577_v0  ;;  %v574_v4 = vld [vmem:[%s4398_s18 + $0x8] sm:$0xff]  ;;  %v579_v6 = vld [vmem:[%s4398_s18 + $0x30] sm:$0xff]  ;;  %3717 = vrcp.f32 %v4178_v12  ;;  %s5347_s20 = sld [smem:[#allocation31_spill]]  ;;  %s5231_s16 = scalar_lea.vmem [#allocation19], %s3545_s2 }
  0x5c   : > { %v594_v5 = vadd.f32 %v574_v4, %v573_v2  ;;  %v580_v7 = vld [vmem:[%s4398_s18 + $0x38] sm:$0xff]  ;;  %v575_v8 = vld [vmem:[%s4398_s18 + $0x10] sm:$0xff]  ;;  %v811_v20 = vld [vmem:[#allocation8 + $0x2a0] sm:$0xff]  ;;  %s3570_s30 = sshll.u32 %s4270_s28, 6  ;;  %s5348_s12 = sld [smem:[#allocation32_spill]] }
  0x5d   : > { %601 = vadd.xlane.f32.xlu1 %v600_v3  ;;  %v576_v9 = vld [vmem:[%s4398_s18 + $0x18] sm:$0xff]  ;;  %v603_v10 = vadd.f32 %v580_v7, %v579_v6  ;;  %v907_v21 = vld [vmem:[#allocation8 + $0x5a0] sm:$0xff]  ;;  %v812_v22 = vld [vmem:[#allocation8 + $0x2a8] sm:$0xff]  ;;  %s3367_s2 = sshll.u32 %s5231_s16, 4  ;;  %s3355_s28 = scalar_lea.sflag [#allocation4], %s4392_s15  ;;  %s3368_s2 = int_to_ptr.vmem [resolvable:$true] %s3367_s2 }
  0x5e   : > { %595 = vadd.xlane.f32.xlu0 %v594_v5  ;;  %v597_v11 = vadd.f32 %v576_v9, %v575_v8  ;;  %v817_v16 = vld [vmem:[#allocation8 + $0x2d0] sm:$0xff]  ;;  %v818_v18 = vld [vmem:[#allocation8 + $0x2d8] sm:$0xff]  ;;  %v908_v23 = vld [vmem:[#allocation8 + $0x5a8] sm:$0xff] }
  0x5f   : > { %v913_v17 = vld [vmem:[#allocation8 + $0x5d0] sm:$0xff]  ;;  %919 = vmatpush.msra.mxu0 %v817_v16  ;;  %v914_v19 = vld [vmem:[#allocation8 + $0x5d8] sm:$0xff]  ;;  %977 = vmatpush.msra.mxu2 %v818_v18  ;;  %v799_v59 = vld [vmem:[#allocation8 + $0x240] sm:$0xff] }
  0x60   : > { %948 = vmatpush.msra.mxu1 %v913_v17  ;;  %1006 = vmatpush.msra.mxu3 %v914_v19  ;;  %v805_v55 = vld [vmem:[#allocation8 + $0x270] sm:$0xff]  ;;  %v806_v57 = vld [vmem:[#allocation8 + $0x278] sm:$0xff]  ;;  %v895_v60 = vld [vmem:[#allocation8 + $0x540] sm:$0xff] }
  0x61   : > { %v3718_v13 = vpop.eup %3717  ;;  %920 = vmatpush.msra.mxu0 %v811_v20  ;;  %978 = vmatpush.msra.mxu2 %v812_v22  ;;  %v901_v56 = vld [vmem:[#allocation8 + $0x570] sm:$0xff]  ;;  %v902_v58 = vld [vmem:[#allocation8 + $0x578] sm:$0xff]  ;;  %v800_v61 = vld [vmem:[#allocation8 + $0x248] sm:$0xff] }
  0x62   : > { %v607_v14 = vmul.f32 256.0, %v3718_v13  ;;  %949 = vmatpush.msra.mxu1 %v907_v21  ;;  %1007 = vmatpush.msra.mxu3 %v908_v23  ;;  %vm611_vm0 = vweird.f32 %v3718_v13  ;;  %v896_v62 = vld [vmem:[#allocation8 + $0x548] sm:$0xff]  ;;  %v793_v63 = vld [vmem:[#allocation8 + $0x210] sm:$0xff]  ;;  %v787_v3 = vld [vmem:[#allocation8 + $0x1e0] sm:$0xff]  ;;  %s3366_s25 = scalar_lea.hbm %s5348_s12, %s3570_s30  ;;  %s4095_s17 = scalar_lea.hbm %s5348_s12, 128 }
  0x63   : > { %921 = vmatpush.msra.mxu0 %v805_v55  ;;  %979 = vmatpush.msra.mxu2 %v806_v57  ;;  %v788_v5 = vld [vmem:[#allocation8 + $0x1e8] sm:$0xff]  ;;  %v871_v12 = vld [vmem:[#allocation8 + $0x480] sm:$0xff]  ;;  %v865_v16 = vld [vmem:[#allocation8 + $0x450] sm:$0xff]  ;;  %s3369_s4 = sshll.u32 %s3366_s25, 4  ;;  %s3370_s4 = int_to_ptr.hbm [resolvable:$true] %s3369_s4 }
  0x64   : > { %v608_v15 = vsub.f32 1.0, %v607_v14  ;;  %950 = vmatpush.msra.mxu1 %v901_v56  ;;  %1008 = vmatpush.msra.mxu3 %v902_v58  ;;  %v872_v14 = vld [vmem:[#allocation8 + $0x488] sm:$0xff]  ;;  %v770_v17 = vld [vmem:[#allocation8 + $0x158] sm:$0xff]  ;;  %v763_v19 = vld [vmem:[#allocation8 + $0x120] sm:$0xff] }
  0x65   : > { %604 = vadd.xlane.f32.xlu1 %v603_v10  ;;  %922 = vmatpush.msra.mxu0 %v799_v59  ;;  %v878_v10 = vld [vmem:[#allocation8 + $0x4b8] sm:$0xff]  ;;  %v859_v20 = vld [vmem:[#allocation8 + $0x420] sm:$0xff]  ;;  %v764_v21 = vld [vmem:[#allocation8 + $0x128] sm:$0xff] }
  0x66   : > { %598 = vadd.xlane.f32.xlu0 %v597_v11  ;;  %v609_v24 = vmul.f32 %v3718_v13, %v608_v15  ;;  %951 = vmatpush.msra.mxu1 %v895_v60  ;;  %v775_v11 = vld [vmem:[#allocation8 + $0x180] sm:$0xff]  ;;  %v769_v15 = vld [vmem:[#allocation8 + $0x150] sm:$0xff]  ;;  %v866_v18 = vld [vmem:[#allocation8 + $0x458] sm:$0xff] }
  0x67   : > { %980 = vmatpush.msra.mxu2 %v800_v61  ;;  %1009 = vmatpush.msra.mxu3 %v896_v62  ;;  %v860_v22 = vld [vmem:[#allocation8 + $0x428] sm:$0xff]  ;;  %v757_v23 = vld [vmem:[#allocation8 + $0xf0] sm:$0xff]  ;;  %v819_v56 = vld [vmem:[#allocation8 + $0x2e0] sm:$0xff] }
  0x68   : > { %v610_v25 = vadd.f32 %v3718_v13, %v609_v24  ;;  %923 = vmatpush.msra.mxu0 %v793_v63  ;;  %v853_v24 = vld [vmem:[#allocation8 + $0x3f0] sm:$0xff]  ;;  %v824_v55 = vld [vmem:[#allocation8 + $0x308] sm:$0xff]  ;;  %v915_v57 = vld [vmem:[#allocation8 + $0x5e0] sm:$0xff] }
  0x69   : > { %v820_v58 = vld [vmem:[#allocation8 + $0x2e8] sm:$0xff]  ;;  %v813_v63 = vld [vmem:[#allocation8 + $0x2b0] sm:$0xff] }
  0x6a   : > { %v4432_v26 = vsel %vm611_vm0, %v3718_v13, %v610_v25  ;;  %924 = vmatpush.msra.mxu0 %v787_v3  ;;  %v776_v13 = vld [vmem:[#allocation8 + $0x188] sm:$0xff]  ;;  %v758_v25 = vld [vmem:[#allocation8 + $0xf8] sm:$0xff] }
  0x6b   : > { %v916_v60 = vld [vmem:[#allocation8 + $0x5e8] sm:$0xff]  ;;  %v910_v3 = vld [vmem:[#allocation8 + $0x5b8] sm:$0xff] }
  0xd0   : > { %v602_v27 = vpop.xlane.xlu1 %601 }
  0xd1   : > { %v615_v28 = vmul.f32 %v4432_v26, %v602_v27  ;;  %v596_v29 = vpop.xlane.xlu0 %595  ;;  %v854_v27 = vld [vmem:[#allocation8 + $0x3f8] sm:$0xff] }
  0xd2   : > { %v613_v30 = vmul.f32 %v4432_v26, %v596_v29  ;;  %v847_v29 = vld [vmem:[#allocation8 + $0x3c0] sm:$0xff] }
  0xd3   : > { %v4436_v31 = vsub.f32 %v577_v0, %v615_v28  ;;  %v4438_v32 = vsub.f32 %v578_v1, %v615_v28  ;;  %v889_v0 = vld [vmem:[#allocation8 + $0x510] sm:$0xff]  ;;  %v794_v1 = vld [vmem:[#allocation8 + $0x218] sm:$0xff]  ;;  %v751_v28 = vld [vmem:[#allocation8 + $0xc0] sm:$0xff] }
  0xd4   : > { %v4440_v33 = vsub.f32 %v573_v2, %v613_v30  ;;  %v4442_v34 = vsub.f32 %v574_v4, %v613_v30  ;;  %952 = vmatpush.msra.mxu1 %v889_v0  ;;  %v890_v2 = vld [vmem:[#allocation8 + $0x518] sm:$0xff]  ;;  %981 = vmatpush.msra.mxu2 %v794_v1  ;;  %v883_v4 = vld [vmem:[#allocation8 + $0x4e0] sm:$0xff]  ;;  %v752_v30 = vld [vmem:[#allocation8 + $0xc8] sm:$0xff] }
  0xd5   : > { %v629_v35 = vmul.f32 %v4436_v31, %v4436_v31  ;;  %v630_v36 = vmul.f32 %v4438_v32, %v4438_v32  ;;  %1010 = vmatpush.msra.mxu3 %v890_v2  ;;  %v909_v0 = vld [vmem:[#allocation8 + $0x5b0] sm:$0xff]  ;;  %v814_v1 = vld [vmem:[#allocation8 + $0x2b8] sm:$0xff] }
  0xd6   : > { %v625_v37 = vmul.f32 %v4440_v33, %v4440_v33  ;;  %v626_v38 = vmul.f32 %v4442_v34, %v4442_v34  ;;  %953 = vmatpush.msra.mxu1 %v883_v4  ;;  %982 = vmatpush.msra.mxu2 %v788_v5  ;;  %v807_v5 = vld [vmem:[#allocation8 + $0x280] sm:$0xff] }
  0xd7   : > { %v639_v39 = vadd.f32 %v630_v36, %v629_v35  ;;  %v848_v35 = vld [vmem:[#allocation8 + $0x3c8] sm:$0xff]  ;;  %v745_v36 = vld [vmem:[#allocation8 + $0x90] sm:$0xff] }
  0xd8   : > { %v605_v40 = vpop.xlane.xlu1 %604  ;;  %v633_v41 = vadd.f32 %v626_v38, %v625_v37  ;;  %v841_v37 = vld [vmem:[#allocation8 + $0x390] sm:$0xff]  ;;  %v746_v38 = vld [vmem:[#allocation8 + $0x98] sm:$0xff] }
  0xd9   : > { %v616_v42 = vmul.f32 %v4432_v26, %v605_v40  ;;  %v599_v43 = vpop.xlane.xlu0 %598  ;;  %640 = vadd.xlane.f32.xlu0 %v639_v39  ;;  %v842_v39 = vld [vmem:[#allocation8 + $0x398] sm:$0xff]  ;;  %v739_v40 = vld [vmem:[#allocation8 + $0x60] sm:$0xff] }
  0xda   : > { %v614_v44 = vmul.f32 %v4432_v26, %v599_v43  ;;  %634 = vadd.xlane.f32.xlu2 %v633_v41  ;;  %v835_v41 = vld [vmem:[#allocation8 + $0x360] sm:$0xff]  ;;  %v836_v43 = vld [vmem:[#allocation8 + $0x368] sm:$0xff] }
  0xdb   : > { %v4454_v45 = vsub.f32 %v579_v6, %v616_v42  ;;  %v4456_v46 = vsub.f32 %v580_v7, %v616_v42  ;;  %v884_v6 = vld [vmem:[#allocation8 + $0x4e8] sm:$0xff]  ;;  %v781_v7 = vld [vmem:[#allocation8 + $0x1b0] sm:$0xff] }
  0xdc   : > { %v4458_v47 = vsub.f32 %v575_v8, %v614_v44  ;;  %v4460_v48 = vsub.f32 %v576_v9, %v614_v44  ;;  %1011 = vmatpush.msra.mxu3 %v884_v6  ;;  %v877_v8 = vld [vmem:[#allocation8 + $0x4b0] sm:$0xff]  ;;  %v782_v9 = vld [vmem:[#allocation8 + $0x1b8] sm:$0xff]  ;;  %925 = vmatpush.msra.mxu0 %v781_v7  ;;  %v740_v42 = vld [vmem:[#allocation8 + $0x68] sm:$0xff] }
  0xdd   : > { %v631_v49 = vmul.f32 %v4454_v45, %v4454_v45  ;;  %v632_v50 = vmul.f32 %v4456_v46, %v4456_v46  ;;  %954 = vmatpush.msra.mxu1 %v877_v8  ;;  %983 = vmatpush.msra.mxu2 %v782_v9  ;;  %v733_v44 = vld [vmem:[#allocation8 + $0x30] sm:$0xff]  ;;  %v903_v6 = vld [vmem:[#allocation8 + $0x580] sm:$0xff]  ;;  %v808_v7 = vld [vmem:[#allocation8 + $0x288] sm:$0xff] }
  0xde   : > { %v627_v51 = vmul.f32 %v4458_v47, %v4458_v47  ;;  %v628_v52 = vmul.f32 %v4460_v48, %v4460_v48  ;;  %1012 = vmatpush.msra.mxu3 %v878_v10  ;;  %926 = vmatpush.msra.mxu0 %v775_v11  ;;  %v904_v9 = vld [vmem:[#allocation8 + $0x588] sm:$0xff]  ;;  %v801_v10 = vld [vmem:[#allocation8 + $0x250] sm:$0xff] }
  0xdf   : > { %v642_v53 = vadd.f32 %v632_v50, %v631_v49  ;;  %955 = vmatpush.msra.mxu1 %v871_v12  ;;  %984 = vmatpush.msra.mxu2 %v776_v13  ;;  %v829_v49 = vld [vmem:[#allocation8 + $0x330] sm:$0xff]  ;;  %v734_v50 = vld [vmem:[#allocation8 + $0x38] sm:$0xff] }
  0xe0   : > { %v636_v54 = vadd.f32 %v628_v52, %v627_v51  ;;  %1013 = vmatpush.msra.mxu3 %v872_v14  ;;  %927 = vmatpush.msra.mxu0 %v769_v15  ;;  %v830_v51 = vld [vmem:[#allocation8 + $0x338] sm:$0xff]  ;;  %v727_v52 = vld [vmem:[#allocation8] sm:$0xff]  ;;  %v897_v11 = vld [vmem:[#allocation8 + $0x550] sm:$0xff] }
  0xe1   : > { %643 = vadd.xlane.f32.xlu1 %v642_v53  ;;  %956 = vmatpush.msra.mxu1 %v865_v16  ;;  %v823_v53 = vld [vmem:[#allocation8 + $0x300] sm:$0xff]  ;;  %v802_v12 = vld [vmem:[#allocation8 + $0x258] sm:$0xff]  ;;  %v796_v16 = vld [vmem:[#allocation8 + $0x228] sm:$0xff] }
  0xe2   : > { %637 = vadd.xlane.f32.xlu2 %v636_v54  ;;  %985 = vmatpush.msra.mxu2 %v770_v17  ;;  %v728_v54 = vld [vmem:[#allocation8 + $0x8] sm:$0xff]  ;;  %v898_v13 = vld [vmem:[#allocation8 + $0x558] sm:$0xff]  ;;  %v795_v14 = vld [vmem:[#allocation8 + $0x220] sm:$0xff] }
  0xe3   : > { %1014 = vmatpush.msra.mxu3 %v866_v18  ;;  %928 = vmatpush.msra.mxu0 %v763_v19  ;;  %v891_v15 = vld [vmem:[#allocation8 + $0x520] sm:$0xff]  ;;  %v892_v18 = vld [vmem:[#allocation8 + $0x528] sm:$0xff]  ;;  %v789_v19 = vld [vmem:[#allocation8 + $0x1f0] sm:$0xff] }
  0xe4   : > { %957 = vmatpush.msra.mxu1 %v859_v20  ;;  %986 = vmatpush.msra.mxu2 %v764_v21  ;;  %v885_v20 = vld [vmem:[#allocation8 + $0x4f0] sm:$0xff] }
  0xe5   : > { %1015 = vmatpush.msra.mxu3 %v860_v22  ;;  %929 = vmatpush.msra.mxu0 %v757_v23  ;;  %v790_v23 = vld [vmem:[#allocation8 + $0x1f8] sm:$0xff] }
  0xe6   : > { %958 = vmatpush.msra.mxu1 %v853_v24  ;;  %987 = vmatpush.msra.mxu2 %v758_v25  ;;  %v886_v24 = vld [vmem:[#allocation8 + $0x4f8] sm:$0xff]  ;;  %v783_v25 = vld [vmem:[#allocation8 + $0x1c0] sm:$0xff] }
  0xe7   : > { %1016 = vmatpush.msra.mxu3 %v854_v27  ;;  %930 = vmatpush.msra.mxu0 %v751_v28  ;;  %v879_v28 = vld [vmem:[#allocation8 + $0x4c0] sm:$0xff] }
  0xe8   : > { %959 = vmatpush.msra.mxu1 %v847_v29  ;;  %988 = vmatpush.msra.mxu2 %v752_v30  ;;  %v784_v29 = vld [vmem:[#allocation8 + $0x1c8] sm:$0xff] }
  0xe9   : > { %1017 = vmatpush.msra.mxu3 %v848_v35  ;;  %931 = vmatpush.msra.mxu0 %v745_v36  ;;  %v880_v30 = vld [vmem:[#allocation8 + $0x4c8] sm:$0xff] }
  0xea   : > { %960 = vmatpush.msra.mxu1 %v841_v37  ;;  %989 = vmatpush.msra.mxu2 %v746_v38  ;;  %v777_v37 = vld [vmem:[#allocation8 + $0x190] sm:$0xff] }
  0xeb   : > { %1018 = vmatpush.msra.mxu3 %v842_v39  ;;  %932 = vmatpush.msra.mxu0 %v739_v40  ;;  %v873_v38 = vld [vmem:[#allocation8 + $0x490] sm:$0xff] }
  0xec   : > { %961 = vmatpush.msra.mxu1 %v835_v41  ;;  %990 = vmatpush.msra.mxu2 %v740_v42  ;;  %v778_v42 = vld [vmem:[#allocation8 + $0x198] sm:$0xff] }
  0xed   : > { %1019 = vmatpush.msra.mxu3 %v836_v43  ;;  %933 = vmatpush.msra.mxu0 %v733_v44  ;;  %v874_v43 = vld [vmem:[#allocation8 + $0x498] sm:$0xff] }
  0xee   : > { %962 = vmatpush.msra.mxu1 %v829_v49  ;;  %991 = vmatpush.msra.mxu2 %v734_v50  ;;  %v771_v50 = vld [vmem:[#allocation8 + $0x160] sm:$0xff] }
  0xef   : > { %1020 = vmatpush.msra.mxu3 %v830_v51  ;;  %934 = vmatpush.msra.mxu0 %v727_v52  ;;  %v867_v51 = vld [vmem:[#allocation8 + $0x460] sm:$0xff]  ;;  %v772_v52 = vld [vmem:[#allocation8 + $0x168] sm:$0xff] }
  0xf0   : > { %963 = vmatpush.msra.mxu1 %v823_v53  ;;  %992 = vmatpush.msra.mxu2 %v728_v54  ;;  %v868_v54 = vld [vmem:[#allocation8 + $0x468] sm:$0xff] }
  0xf1   : > { %1021 = vmatpush.msra.mxu3 %v824_v55  ;;  %1035 = vmatpush.msrb.mxu0 %v819_v56  ;;  %v765_v55 = vld [vmem:[#allocation8 + $0x130] sm:$0xff] }
  0xf2   : > { %1064 = vmatpush.msrb.mxu1 %v915_v57  ;;  %1093 = vmatpush.msrb.mxu2 %v820_v58  ;;  %v861_v56 = vld [vmem:[#allocation8 + $0x430] sm:$0xff]  ;;  %v766_v58 = vld [vmem:[#allocation8 + $0x138] sm:$0xff] }
  0xf3   : > { %1122 = vmatpush.msrb.mxu3 %v916_v60  ;;  %1036 = vmatpush.msrb.mxu0 %v813_v63  ;;  %v759_v60 = vld [vmem:[#allocation8 + $0x100] sm:$0xff]  ;;  %v856_v63 = vld [vmem:[#allocation8 + $0x408] sm:$0xff] }
  0xf4   : > { %1065 = vmatpush.msrb.mxu1 %v909_v0  ;;  %1094 = vmatpush.msrb.mxu2 %v814_v1  ;;  %v592_v1 = vld [vmem:[#allocation5] sm:$0x3] }
  0xf5   : > { %1123 = vmatpush.msrb.mxu3 %v910_v3  ;;  %1037 = vmatpush.msrb.mxu0 %v807_v5  ;;  %v753_v3 = vld [vmem:[#allocation8 + $0xd0] sm:$0xff] }
  0xf6   : > { %1066 = vmatpush.msrb.mxu1 %v903_v6  ;;  %1095 = vmatpush.msrb.mxu2 %v808_v7  ;;  %v849_v5 = vld [vmem:[#allocation8 + $0x3d0] sm:$0xff]  ;;  %v593_v7 = vld [vmem:[#allocation7] sm:$0x3] }
  0xf7   : > { %1124 = vmatpush.msrb.mxu3 %v904_v9  ;;  %1038 = vmatpush.msrb.mxu0 %v801_v10  ;;  %v754_v10 = vld [vmem:[#allocation8 + $0xd8] sm:$0xff] }
  0xf8   : > { %1067 = vmatpush.msrb.mxu1 %v897_v11  ;;  %1096 = vmatpush.msrb.mxu2 %v802_v12 }
  0xf9   : > { %1125 = vmatpush.msrb.mxu3 %v898_v13  ;;  %1039 = vmatpush.msrb.mxu0 %v795_v14  ;;  %v850_v14 = vld [vmem:[#allocation8 + $0x3d8] sm:$0xff] }
  0xfa   : > { %1068 = vmatpush.msrb.mxu1 %v891_v15  ;;  %1097 = vmatpush.msrb.mxu2 %v796_v16  ;;  %v4507_v15 = vperm.slane %v592_v1, 0  ;;  %v4509_v16 = vperm.slane %v592_v1, 1  ;;  %v822_v1 = vld [vmem:[#allocation8 + $0x2f8] sm:$0xff] }
  0xfb   : > { %1126 = vmatpush.msrb.mxu3 %v892_v18  ;;  %1040 = vmatpush.msrb.mxu0 %v789_v19  ;;  %v747_v19 = vld [vmem:[#allocation8 + $0xa0] sm:$0xff] }
  0xfc   : > { %1069 = vmatpush.msrb.mxu1 %v885_v20  ;;  %1098 = vmatpush.msrb.mxu2 %v790_v23  ;;  %v843_v20 = vld [vmem:[#allocation8 + $0x3a0] sm:$0xff] }
  0xfd   : > { %1127 = vmatpush.msrb.mxu3 %v886_v24  ;;  %1041 = vmatpush.msrb.mxu0 %v783_v25 }
  0xfe   : > { %1070 = vmatpush.msrb.mxu1 %v879_v28  ;;  %1099 = vmatpush.msrb.mxu2 %v784_v29  ;;  %v741_v28 = vld [vmem:[#allocation8 + $0x70] sm:$0xff] }
  0xff   : > { %1128 = vmatpush.msrb.mxu3 %v880_v30  ;;  %1042 = vmatpush.msrb.mxu0 %v777_v37  ;;  %v837_v29 = vld [vmem:[#allocation8 + $0x370] sm:$0xff] }
 0x100   : > { %1071 = vmatpush.msrb.mxu1 %v873_v38  ;;  %1100 = vmatpush.msrb.mxu2 %v778_v42  ;;  %v742_v38 = vld [vmem:[#allocation8 + $0x78] sm:$0xff] }
 0x101   : > { %1129 = vmatpush.msrb.mxu3 %v874_v43  ;;  %1043 = vmatpush.msrb.mxu0 %v771_v50  ;;  %v736_v43 = vld [vmem:[#allocation8 + $0x48] sm:$0xff] }
 0x102   : > { %1072 = vmatpush.msrb.mxu1 %v867_v51  ;;  %1101 = vmatpush.msrb.mxu2 %v772_v52  ;;  %v779_v52 = vld [vmem:[#allocation8 + $0x1a0] sm:$0xff] }
 0x103   : > { %1130 = vmatpush.msrb.mxu3 %v868_v54  ;;  %1044 = vmatpush.msrb.mxu0 %v765_v55  ;;  %v832_v55 = vld [vmem:[#allocation8 + $0x348] sm:$0xff] }
 0x104   : > { %1073 = vmatpush.msrb.mxu1 %v861_v56  ;;  %1102 = vmatpush.msrb.mxu2 %v766_v58  ;;  %v729_v56 = vld [vmem:[#allocation8 + $0x10] sm:$0xff] }
 0x105   : > { %1045 = vmatpush.msrb.mxu0 %v759_v60 }
 0x107   : > { %1046 = vmatpush.msrb.mxu0 %v753_v3  ;;  %v918_v3 = vld [vmem:[#allocation8 + $0x5f8] sm:$0xff] }
 0x109   : > { %1047 = vmatpush.msrb.mxu0 %v747_v19 }
 0x10b   : > { %1048 = vmatpush.msrb.mxu0 %v741_v28  ;;  %v798_v28 = vld [vmem:[#allocation8 + $0x238] sm:$0xff] }
 0x14c   : > { %v641_v59 = vpop.xlane.xlu0 %640 }
 0x14d   : > { %v635_v61 = vpop.xlane.xlu2 %634  ;;  %v647_v62 = vmul.f32 %v641_v59, %v4432_v26  ;;  %v862_v59 = vld [vmem:[#allocation8 + $0x438] sm:$0xff] }
 0x14e   : > { %v645_v2 = vmul.f32 %v635_v61, %v4432_v26  ;;  %v855_v61 = vld [vmem:[#allocation8 + $0x400] sm:$0xff]  ;;  %1131 = vmatpush.msrb.mxu3 %v862_v59  ;;  %v821_v59 = vld [vmem:[#allocation8 + $0x2f0] sm:$0xff] }
 0x14f   : > { %v4472_v4 = vadd.f32 1e-05, %v647_v62  ;;  %v760_v62 = vld [vmem:[#allocation8 + $0x108] sm:$0xff]  ;;  %1074 = vmatpush.msrb.mxu1 %v855_v61 }
 0x150   : > { %v4474_v8 = vadd.f32 1e-05, %v645_v2  ;;  %1103 = vmatpush.msrb.mxu2 %v760_v62  ;;  %1132 = vmatpush.msrb.mxu3 %v856_v63  ;;  %v917_v63 = vld [vmem:[#allocation8 + $0x5f0] sm:$0xff] }
 0x151   : > { %3719 = vrsqrt.f32 %v4472_v4  ;;  %1075 = vmatpush.msrb.mxu1 %v849_v5  ;;  %vm679_vm4 = vweird.f32 %v4472_v4  ;;  %v815_v5 = vld [vmem:[#allocation8 + $0x2c0] sm:$0xff] }
 0x152   : > { %3721 = vrsqrt.f32 %v4474_v8  ;;  %vm659_vm2 = vweird.f32 %v4474_v8  ;;  %1104 = vmatpush.msrb.mxu2 %v754_v10  ;;  %1133 = vmatpush.msrb.mxu3 %v850_v14 }
 0x153   : > { %1076 = vmatpush.msrb.mxu1 %v843_v20  ;;  %v899_v20 = vld [vmem:[#allocation8 + $0x560] sm:$0xff] }
 0x154   : > { %v644_v17 = vpop.xlane.xlu1 %643 }
 0x155   : > { %v648_v21 = vmul.f32 %v644_v17, %v4432_v26  ;;  %v638_v22 = vpop.xlane.xlu2 %637  ;;  %v4513_v17 = vperm.slane %v593_v7, 0  ;;  %1077 = vmatpush.msrb.mxu1 %v837_v29 }
 0x156   : > { %v646_v27 = vmul.f32 %v638_v22, %v4432_v26  ;;  %v4517_v22 = vperm.slane %v593_v7, 1 }
 0x157   : > { %v4480_v35 = vpop.eup %3719  ;;  %v4482_v36 = vadd.f32 1e-05, %v648_v21  ;;  %v748_v21 = vld [vmem:[#allocation8 + $0xa8] sm:$0xff] }
 0x158   : > { %v4484_v39 = vpop.eup %3721  ;;  %v674_v40 = vmul.f32 %v4480_v35, %v4472_v4  ;;  %v4488_v41 = vadd.f32 1e-05, %v646_v27  ;;  %v844_v27 = vld [vmem:[#allocation8 + $0x3a8] sm:$0xff]  ;;  %1105 = vmatpush.msrb.mxu2 %v748_v21  ;;  %vm680_vm5 = vweird.f32 %v4480_v35  ;;  %v825_v4 = vld [vmem:[#allocation8 + $0x310] sm:$0xff] }
 0x159   : > { %v654_v44 = vmul.f32 %v4484_v39, %v4474_v8  ;;  %3723 = vrsqrt.f32 %v4482_v36  ;;  %vm660_vm1 = vweird.f32 %v4484_v39  ;;  %1134 = vmatpush.msrb.mxu3 %v844_v27  ;;  %vm4536_vm7 = vmor %vm679_vm4, %vm680_vm5  ;;  %vm689_vm10 = vweird.f32 %v4482_v36  ;;  %v804_v21 = vld [vmem:[#allocation8 + $0x268] sm:$0xff]  ;;  %v893_v27 = vld [vmem:[#allocation8 + $0x530] sm:$0xff] }
 0x15a   : > { %3725 = vrsqrt.f32 %v4488_v41  ;;  %v675_v53 = vmul.f32 %v4480_v35, %v674_v40  ;;  %vm661_vm3 = vmor %vm659_vm2, %vm660_vm1  ;;  %v735_v40 = vld [vmem:[#allocation8 + $0x40] sm:$0xff]  ;;  %1106 = vmatpush.msrb.mxu2 %v742_v38  ;;  %vm669_vm8 = vweird.f32 %v4488_v41  ;;  %v894_v38 = vld [vmem:[#allocation8 + $0x538] sm:$0xff] }
 0x15b   : > { %v655_v49 = vmul.f32 %v4484_v39, %v654_v44  ;;  %1049 = vmatpush.msrb.mxu0 %v735_v40  ;;  %v887_v40 = vld [vmem:[#allocation8 + $0x500] sm:$0xff] }
 0x15c   : > { %v676_v9 = vmul.f32 0.5, %v675_v53  ;;  %1107 = vmatpush.msrb.mxu2 %v736_v43  ;;  %v881_v43 = vld [vmem:[#allocation8 + $0x4d0] sm:$0xff] }
 0x15d   : > { %v656_v57 = vmul.f32 0.5, %v655_v49  ;;  %1050 = vmatpush.msrb.mxu0 %v729_v56  ;;  %v773_v56 = vld [vmem:[#allocation8 + $0x170] sm:$0xff] }
 0x15e   : > { %v677_v25 = vsub.f32 1.5, %v676_v9  ;;  %v816_v9 = vld [vmem:[#allocation8 + $0x2c8] sm:$0xff] }
 0x15f   : > { %v4496_v0 = vpop.eup %3723  ;;  %v657_v2 = vsub.f32 1.5, %v656_v57  ;;  %v730_v57 = vld [vmem:[#allocation8 + $0x18] sm:$0xff] }
 0x160   : > { %v4499_v6 = vpop.eup %3725  ;;  %v684_v12 = vmul.f32 %v4496_v0, %v4482_v36  ;;  %v678_v51 = vmul.f32 %v4480_v35, %v677_v25  ;;  %1108 = vmatpush.msrb.mxu2 %v730_v57  ;;  %vm690_vm11 = vweird.f32 %v4496_v0  ;;  %v809_v36 = vld [vmem:[#allocation8 + $0x290] sm:$0xff]  ;;  %v774_v57 = vld [vmem:[#allocation8 + $0x178] sm:$0xff] }
 0x161   : > { %v658_v11 = vmul.f32 %v4484_v39, %v657_v2  ;;  %v664_v13 = vmul.f32 %v4499_v6, %v4488_v41  ;;  %vm670_vm6 = vweird.f32 %v4499_v6  ;;  %v826_v41 = vld [vmem:[#allocation8 + $0x318] sm:$0xff]  ;;  %vm691_vm12 = vmor %vm689_vm10, %vm690_vm11  ;;  %v797_v25 = vld [vmem:[#allocation8 + $0x230] sm:$0xff] }
 0x162   : > { %v685_v30 = vmul.f32 %v4496_v0, %v684_v12  ;;  %vm671_vm9 = vmor %vm669_vm8, %vm670_vm6  ;;  %v682_v60 = vsel %vm4536_vm7, %v4480_v35, %v678_v51  ;;  %v911_v35 = vld [vmem:[#allocation8 + $0x5c0] sm:$0xff]  ;;  %v882_v51 = vld [vmem:[#allocation8 + $0x4d8] sm:$0xff] }
 0x163   : > { %v662_v8 = vsel %vm661_vm3, %v4484_v39, %v658_v11  ;;  %v665_v18 = vmul.f32 %v4499_v6, %v664_v13  ;;  %v838_v39 = vld [vmem:[#allocation8 + $0x378] sm:$0xff] }
 0x164   : > { %v693_v23 = vmul.f32 %v662_v8, %v4440_v33  ;;  %v694_v24 = vmul.f32 %v662_v8, %v4442_v34  ;;  %v831_v34 = vld [vmem:[#allocation8 + $0x340] sm:$0xff]  ;;  %1135 = vmatpush.msrb.mxu3 %v838_v39  ;;  %v686_v53 = vmul.f32 0.5, %v685_v30  ;;  %v810_v13 = vld [vmem:[#allocation8 + $0x298] sm:$0xff] }
 0x165   : > { %v666_v37 = vmul.f32 0.5, %v665_v18  ;;  %1078 = vmatpush.msrb.mxu1 %v831_v34  ;;  %v906_v8 = vld [vmem:[#allocation8 + $0x598] sm:$0xff]  ;;  %v803_v18 = vld [vmem:[#allocation8 + $0x260] sm:$0xff] }
 0x166   : > { %v706_v42 = vmul.f32 %v4507_v15, %v693_v23  ;;  %v707_v33 = vmul.f32 %v4509_v16, %v694_v24  ;;  %1136 = vmatpush.msrb.mxu3 %v832_v55  ;;  %v687_v2 = vsub.f32 1.5, %v686_v53  ;;  %v900_v24 = vld [vmem:[#allocation8 + $0x568] sm:$0xff]  ;;  %v791_v39 = vld [vmem:[#allocation8 + $0x200] sm:$0xff] }
 0x167   : > { %v667_v44 = vsub.f32 1.5, %v666_v37  ;;  %1079 = vmatpush.msrb.mxu1 %v825_v4  ;;  %v875_v53 = vld [vmem:[#allocation8 + $0x4a0] sm:$0xff]  ;;  %v869_v4 = vld [vmem:[#allocation8 + $0x470] sm:$0xff] }
 0x168   : > { %v4528_v49 = vadd.f32 %v4513_v17, %v706_v42  ;;  %v4531_v50 = vadd.f32 %v4517_v22, %v707_v33  ;;  %1137 = vmatpush.msrb.mxu3 %v826_v41  ;;  %v688_v12 = vmul.f32 %v4496_v0, %v687_v2  ;;  %v792_v42 = vld [vmem:[#allocation8 + $0x208] sm:$0xff]  ;;  %v851_v2 = vld [vmem:[#allocation8 + $0x3e0] sm:$0xff] }
 0x169   : > { %v668_v54 = vmul.f32 %v4499_v6, %v667_v44  ;;  %v888_v33 = vld [vmem:[#allocation8 + $0x508] sm:$0xff]  ;;  %v786_v44 = vld [vmem:[#allocation8 + $0x1d8] sm:$0xff] }
 0x16a   : > { %935 = vmatmul.f32.vlgmr.msra.gmra.mxu0 %v4528_v49  ;;  %964 = vmatmul.f32.vlgmr.msra.gmra.mxu1 %v4531_v50  ;;  %v692_v23 = vsel %vm691_vm12, %v4496_v0, %v688_v12  ;;  %v768_v41 = vld [vmem:[#allocation8 + $0x148] sm:$0xff] }
 0x16b   : > { %v672_v58 = vsel %vm671_vm9, %v4499_v6, %v668_v54  ;;  %993 = vmatmul.f32.vlgmr.msra.gmra.mxu2 %v4528_v49  ;;  %1022 = vmatmul.f32.vlgmr.msra.gmra.mxu3 %v4531_v50  ;;  %v699_v37 = vmul.f32 %v692_v23, %v4454_v45  ;;  %v700_v0 = vmul.f32 %v692_v23, %v4456_v46  ;;  %v785_v45 = vld [vmem:[#allocation8 + $0x1d0] sm:$0xff]  ;;  %v780_v54 = vld [vmem:[#allocation8 + $0x1a8] sm:$0xff] }
 0x16c   : > { %v695_v61 = vmul.f32 %v672_v58, %v4458_v47  ;;  %v696_v62 = vmul.f32 %v672_v58, %v4460_v48  ;;  %1151 = vmatpush.msra.mxu0 %v821_v59  ;;  %v697_v47 = vmul.f32 %v682_v60, %v4436_v31  ;;  %1180 = vmatpush.msra.mxu1 %v917_v63  ;;  %v912_v31 = vld [vmem:[#allocation8 + $0x5c8] sm:$0xff]  ;;  %v767_v58 = vld [vmem:[#allocation8 + $0x140] sm:$0xff]  ;;  %v858_v63 = vld [vmem:[#allocation8 + $0x418] sm:$0xff] }
 0x16d   : > { %1209 = vmatpush.msra.mxu2 %v822_v1  ;;  %v698_v48 = vmul.f32 %v682_v60, %v4438_v32  ;;  %1238 = vmatpush.msra.mxu3 %v918_v3  ;;  %v905_v32 = vld [vmem:[#allocation8 + $0x590] sm:$0xff]  ;;  %v712_v46 = vmul.f32 %v4507_v15, %v699_v37  ;;  %v713_v34 = vmul.f32 %v4509_v16, %v700_v0  ;;  %v864_v59 = vld [vmem:[#allocation8 + $0x448] sm:$0xff]  ;;  %v755_v1 = vld [vmem:[#allocation8 + $0xe0] sm:$0xff] }
 0x16e   : > { %v708_v6 = vmul.f32 %v4507_v15, %v695_v61  ;;  %v709_v7 = vmul.f32 %v4509_v16, %v696_v62  ;;  %1152 = vmatpush.msra.mxu0 %v815_v5  ;;  %1181 = vmatpush.msra.mxu1 %v911_v35  ;;  %v710_v14 = vmul.f32 %v4507_v15, %v697_v47  ;;  %v761_v60 = vld [vmem:[#allocation8 + $0x110] sm:$0xff]  ;;  %v762_v62 = vld [vmem:[#allocation8 + $0x118] sm:$0xff]  ;;  %v756_v3 = vld [vmem:[#allocation8 + $0xe8] sm:$0xff] }
 0x16f   : > { %1210 = vmatpush.msra.mxu2 %v816_v9  ;;  %v711_v19 = vmul.f32 %v4509_v16, %v698_v48  ;;  %1239 = vmatpush.msra.mxu3 %v912_v31  ;;  %v4589_v55 = vadd.f32 %v4513_v17, %v712_v46  ;;  %v4592_v15 = vadd.f32 %v4517_v22, %v713_v34  ;;  %v876_v16 = vld [vmem:[#allocation8 + $0x4a8] sm:$0xff]  ;;  %v857_v61 = vld [vmem:[#allocation8 + $0x410] sm:$0xff]  ;;  %v750_v35 = vld [vmem:[#allocation8 + $0xb8] sm:$0xff] }
 0x170   : > { %v4561_v10 = vadd.f32 %v4513_v17, %v708_v6  ;;  %v4564_v11 = vadd.f32 %v4517_v22, %v709_v7  ;;  %1153 = vmatpush.msra.mxu0 %v809_v36  ;;  %1182 = vmatpush.msra.mxu1 %v905_v32  ;;  %v4575_v29 = vadd.f32 %v4513_v17, %v710_v14  ;;  %v870_v17 = vld [vmem:[#allocation8 + $0x478] sm:$0xff]  ;;  %v852_v5 = vld [vmem:[#allocation8 + $0x3e8] sm:$0xff]  ;;  %v749_v6 = vld [vmem:[#allocation8 + $0xb0] sm:$0xff] }
 0x171   : > { %1211 = vmatpush.msra.mxu2 %v810_v13  ;;  %1240 = vmatpush.msra.mxu3 %v906_v8  ;;  %v4578_v30 = vadd.f32 %v4517_v22, %v711_v19  ;;  %v863_v22 = vld [vmem:[#allocation8 + $0x440] sm:$0xff]  ;;  %v845_v7 = vld [vmem:[#allocation8 + $0x3b0] sm:$0xff]  ;;  %v846_v9 = vld [vmem:[#allocation8 + $0x3b8] sm:$0xff] }
 0x172   : > { %938 = vmatmul.f32.gmra.mxu0 %v4561_v10  ;;  %967 = vmatmul.f32.gmra.mxu1 %v4564_v11  ;;  %v743_v47 = vld [vmem:[#allocation8 + $0x80] sm:$0xff]  ;;  %v744_v12 = vld [vmem:[#allocation8 + $0x88] sm:$0xff]  ;;  %v737_v36 = vld [vmem:[#allocation8 + $0x50] sm:$0xff] }
 0x173   : > { %996 = vmatmul.f32.gmra.mxu2 %v4561_v10  ;;  %1025 = vmatmul.f32.gmra.mxu3 %v4564_v11  ;;  %v839_v48 = vld [vmem:[#allocation8 + $0x380] sm:$0xff]  ;;  %v840_v31 = vld [vmem:[#allocation8 + $0x388] sm:$0xff]  ;;  %v833_v32 = vld [vmem:[#allocation8 + $0x350] sm:$0xff] }
 0x174   : > { %1154 = vmatpush.msra.mxu0 %v803_v18  ;;  %1183 = vmatpush.msra.mxu1 %v899_v20  ;;  %v738_v13 = vld [vmem:[#allocation8 + $0x58] sm:$0xff]  ;;  %v731_v8 = vld [vmem:[#allocation8 + $0x20] sm:$0xff]  ;;  %v732_v19 = vld [vmem:[#allocation8 + $0x28] sm:$0xff] }
 0x175   : > { %1212 = vmatpush.msra.mxu2 %v804_v21  ;;  %1241 = vmatpush.msra.mxu3 %v900_v24  ;;  %v834_v14 = vld [vmem:[#allocation8 + $0x358] sm:$0xff]  ;;  %v827_v18 = vld [vmem:[#allocation8 + $0x320] sm:$0xff]  ;;  %v828_v20 = vld [vmem:[#allocation8 + $0x328] sm:$0xff] }
 0x176   : > { %1155 = vmatpush.msra.mxu0 %v797_v25  ;;  %1184 = vmatpush.msra.mxu1 %v893_v27 }
 0x177   : > { %1213 = vmatpush.msra.mxu2 %v798_v28  ;;  %1242 = vmatpush.msra.mxu3 %v894_v38 }
 0x178   : > { %1156 = vmatpush.msra.mxu0 %v791_v39  ;;  %1185 = vmatpush.msra.mxu1 %v887_v40 }
 0x179   : > { %1214 = vmatpush.msra.mxu2 %v792_v42  ;;  %1243 = vmatpush.msra.mxu3 %v888_v33 }
 0x17a   : > { %941 = vmatmul.f32.gmra.mxu0 %v4575_v29  ;;  %970 = vmatmul.f32.gmra.mxu1 %v4578_v30 }
 0x17b   : > { %999 = vmatmul.f32.gmra.mxu2 %v4575_v29  ;;  %1028 = vmatmul.f32.gmra.mxu3 %v4578_v30 }
 0x17c   : > { %1157 = vmatpush.msra.mxu0 %v785_v45  ;;  %1186 = vmatpush.msra.mxu1 %v881_v43 }
 0x17d   : > { %1215 = vmatpush.msra.mxu2 %v786_v44  ;;  %1244 = vmatpush.msra.mxu3 %v882_v51 }
 0x17e   : > { %1158 = vmatpush.msra.mxu0 %v779_v52  ;;  %1187 = vmatpush.msra.mxu1 %v875_v53 }
 0x17f   : > { %1216 = vmatpush.msra.mxu2 %v780_v54  ;;  %1245 = vmatpush.msra.mxu3 %v876_v16 }
 0x180   : > { %1159 = vmatpush.msra.mxu0 %v773_v56  ;;  %1188 = vmatpush.msra.mxu1 %v869_v4 }
 0x181   : > { %1217 = vmatpush.msra.mxu2 %v774_v57  ;;  %1246 = vmatpush.msra.mxu3 %v870_v17 }
 0x182   : > { %944 = vmatmul.f32.gmra.mxu0 %v4589_v55  ;;  %973 = vmatmul.f32.gmra.mxu1 %v4592_v15 }
 0x183   : > { %1002 = vmatmul.f32.gmra.mxu2 %v4589_v55  ;;  %1031 = vmatmul.f32.gmra.mxu3 %v4592_v15 }
 0x184   : > { %1160 = vmatpush.msra.mxu0 %v767_v58  ;;  %1189 = vmatpush.msra.mxu1 %v863_v22 }
 0x185   : > { %1218 = vmatpush.msra.mxu2 %v768_v41  ;;  %1247 = vmatpush.msra.mxu3 %v864_v59 }
 0x186   : > { %1161 = vmatpush.msra.mxu0 %v761_v60  ;;  %1190 = vmatpush.msra.mxu1 %v857_v61 }
 0x187   : > { %1219 = vmatpush.msra.mxu2 %v762_v62  ;;  %1248 = vmatpush.msra.mxu3 %v858_v63 }
 0x188   : > { %1162 = vmatpush.msra.mxu0 %v755_v1  ;;  %1191 = vmatpush.msra.mxu1 %v851_v2 }
 0x189   : > { %1220 = vmatpush.msra.mxu2 %v756_v3  ;;  %1249 = vmatpush.msra.mxu3 %v852_v5 }
 0x18a   : > { %1051 = vmatmul.f32.vlgmr.msrb.gmra.mxu0 %v4528_v49  ;;  %1080 = vmatmul.f32.vlgmr.msrb.gmra.mxu1 %v4531_v50 }
 0x18b   : > { %1109 = vmatmul.f32.vlgmr.msrb.gmra.mxu2 %v4528_v49  ;;  %1138 = vmatmul.f32.vlgmr.msrb.gmra.mxu3 %v4531_v50 }
 0x18c   : > { %1163 = vmatpush.msra.mxu0 %v749_v6  ;;  %1192 = vmatpush.msra.mxu1 %v845_v7 }
 0x18d   : > { %1221 = vmatpush.msra.mxu2 %v750_v35  ;;  %1250 = vmatpush.msra.mxu3 %v846_v9 }
 0x18e   : > { %1164 = vmatpush.msra.mxu0 %v743_v47  ;;  %1193 = vmatpush.msra.mxu1 %v839_v48 }
 0x18f   : > { %1222 = vmatpush.msra.mxu2 %v744_v12  ;;  %1251 = vmatpush.msra.mxu3 %v840_v31 }
 0x190   : > { %1165 = vmatpush.msra.mxu0 %v737_v36  ;;  %1194 = vmatpush.msra.mxu1 %v833_v32 }
 0x191   : > { %1223 = vmatpush.msra.mxu2 %v738_v13  ;;  %1252 = vmatpush.msra.mxu3 %v834_v14 }
 0x192   : > { %1054 = vmatmul.f32.gmra.mxu0 %v4561_v10  ;;  %1083 = vmatmul.f32.gmra.mxu1 %v4564_v11 }
 0x193   : > { %1112 = vmatmul.f32.gmra.mxu2 %v4561_v10  ;;  %1141 = vmatmul.f32.gmra.mxu3 %v4564_v11 }
 0x194   : > { %1166 = vmatpush.msra.mxu0 %v731_v8  ;;  %1195 = vmatpush.msra.mxu1 %v827_v18 }
 0x195   : > { %1224 = vmatpush.msra.mxu2 %v732_v19  ;;  %1253 = vmatpush.msra.mxu3 %v828_v20 }
 0x19a   : > { %1057 = vmatmul.f32.gmra.mxu0 %v4575_v29  ;;  %1086 = vmatmul.f32.gmra.mxu1 %v4578_v30 }
 0x19b   : > { %1115 = vmatmul.f32.gmra.mxu2 %v4575_v29  ;;  %1144 = vmatmul.f32.gmra.mxu3 %v4578_v30 }
 0x1a2   : > { %1060 = vmatmul.f32.gmra.mxu0 %v4589_v55  ;;  %1089 = vmatmul.f32.gmra.mxu1 %v4592_v15 }
 0x1a3   : > { %1118 = vmatmul.f32.gmra.mxu2 %v4589_v55  ;;  %1147 = vmatmul.f32.gmra.mxu3 %v4592_v15 }
 0x1aa   : > { %1167 = vmatmul.f32.vlgmr.msra.gmra.mxu0 %v4528_v49  ;;  %1196 = vmatmul.f32.vlgmr.msra.gmra.mxu1 %v4531_v50 }
 0x1ab   : > { %1225 = vmatmul.f32.vlgmr.msra.gmra.mxu2 %v4528_v49  ;;  %1254 = vmatmul.f32.vlgmr.msra.gmra.mxu3 %v4531_v50 }
 0x1b2   : > { %1170 = vmatmul.f32.gmra.mxu0 %v4561_v10  ;;  %1199 = vmatmul.f32.gmra.mxu1 %v4564_v11 }
 0x1b3   : > { %1228 = vmatmul.f32.gmra.mxu2 %v4561_v10  ;;  %1257 = vmatmul.f32.gmra.mxu3 %v4564_v11 }
 0x1ba   : > { %1173 = vmatmul.f32.gmra.mxu0 %v4575_v29  ;;  %1202 = vmatmul.f32.gmra.mxu1 %v4578_v30 }
 0x1bb   : > { %1231 = vmatmul.f32.gmra.mxu2 %v4575_v29  ;;  %1260 = vmatmul.f32.gmra.mxu3 %v4578_v30 }
 0x1c2   : > { %1176 = vmatmul.f32.gmra.mxu0 %v4589_v55  ;;  %1205 = vmatmul.f32.gmra.mxu1 %v4592_v15 }
 0x1c3   : > { %1234 = vmatmul.f32.gmra.mxu2 %v4589_v55  ;;  %1263 = vmatmul.f32.gmra.mxu3 %v4592_v15 }
 0x1e7   : > { %v936_v49 = vpop.f32.mrf.mxu0  ;;  %v965_v50 = vpop.f32.mrf.mxu1 }
 0x1e8   : > { %v966_v63 = vadd.f32 %v965_v50, %v936_v49 }
 0x1ee   : > { %v994_v10 = vpop.f32.mrf.mxu2  ;;  %v1023_v11 = vpop.f32.mrf.mxu3 }
 0x1ef   : > { %v939_v21 = vpop.f32.mrf.mxu0  ;;  %v968_v23 = vpop.f32.mrf.mxu1  ;;  %v1024_v6 = vadd.f32 %v1023_v11, %v994_v10 }
 0x1f0   : > { %v969_v48 = vadd.f32 %v968_v23, %v939_v21 }
 0x1f6   : > { %v997_v24 = vpop.f32.mrf.mxu2  ;;  %v1026_v25 = vpop.f32.mrf.mxu3 }
 0x1f7   : > { %v942_v27 = vpop.f32.mrf.mxu0  ;;  %v971_v28 = vpop.f32.mrf.mxu1  ;;  %v1027_v36 = vadd.f32 %v1026_v25, %v997_v24 }
 0x1f8   : > { %v972_v14 = vadd.f32 %v971_v28, %v942_v27  ;;  %v581_v28 = vlaneseq }
 0x1fe   : > { %v4630_v29 = vpop.f32.mrf.mxu2  ;;  %v4632_v30 = vpop.f32.mrf.mxu3 }
 0x1ff   : > { %v4634_v37 = vpop.f32.mrf.mxu0  ;;  %v4636_v0 = vpop.f32.mrf.mxu1  ;;  %v1030_v10 = vadd.f32 %v4632_v30, %v4630_v29  ;;  %v582_v29 = vshrl.u32 %v581_v28, 7  ;;  %v587_v30 = vand.u32 127, %v581_v28 }
 0x200   : > { %v975_v21 = vadd.f32 %v4636_v0, %v4634_v37 }
 0x201   : > { %vm588_vm13 = vcmp.ge.s32.totalorder %v582_v29, %v587_v30 }
 0x206   : > { %v4638_v38 = vpop.f32.mrf.mxu2  ;;  %v4640_v39 = vpop.f32.mrf.mxu3 }
 0x207   : > { %v1052_v40 = vpop.f32.mrf.mxu0  ;;  %v1081_v42 = vpop.f32.mrf.mxu1  ;;  %v1033_v27 = vadd.f32 %v4640_v39, %v4638_v38 }
 0x208   : > { %v1082_v60 = vadd.f32 %v1081_v42, %v1052_v40 }
 0x20e   : > { %v1110_v33 = vpop.f32.mrf.mxu2  ;;  %v1139_v45 = vpop.f32.mrf.mxu3 }
 0x20f   : > { %v1055_v46 = vpop.f32.mrf.mxu0  ;;  %v1084_v34 = vpop.f32.mrf.mxu1  ;;  %v1140_v5 = vadd.f32 %v1139_v45, %v1110_v33  ;;  %v583_v33 = vadd.s32 8, %v582_v29 }
 0x210   : > { %v1085_v41 = vadd.f32 %v1084_v34, %v1055_v46 }
 0x211   : > { %vm589_vm15 = vcmp.ge.s32.totalorder %v583_v33, %v587_v30 }
 0x216   : > { %v1113_v43 = vpop.f32.mrf.mxu2  ;;  %v1142_v44 = vpop.f32.mrf.mxu3 }
 0x217   : > { %v1058_v51 = vpop.f32.mrf.mxu0  ;;  %v1087_v52 = vpop.f32.mrf.mxu1  ;;  %v1143_v1 = vadd.f32 %v1142_v44, %v1113_v43  ;;  %v584_v44 = vadd.s32 16, %v582_v29 }
 0x218   : > { %v1088_v56 = vadd.f32 %v1087_v52, %v1058_v51 }
 0x219   : > { %vm590_vm0 = vcmp.ge.s32.totalorder %v584_v44, %v587_v30 }
 0x21e   : > { %v1116_v53 = vpop.f32.mrf.mxu2  ;;  %v1145_v54 = vpop.f32.mrf.mxu3 }
 0x21f   : > { %v1061_v55 = vpop.f32.mrf.mxu0  ;;  %v1090_v15 = vpop.f32.mrf.mxu1  ;;  %v1146_v59 = vadd.f32 %v1145_v54, %v1116_v53 }
 0x220   : > { %v1091_v16 = vadd.f32 %v1090_v15, %v1061_v55 }
 0x222   : > { %1279 = vmatpush.xpose.msrb.mxu0 %v1091_v16 }
 0x226   : > { %v1119_v4 = vpop.f32.mrf.mxu2  ;;  %v1148_v57 = vpop.f32.mrf.mxu3  ;;  %1280 = vmatpush.xpose.msrb.mxu0 %v1088_v56  ;;  %v585_v56 = vadd.s32 24, %v582_v29 }
 0x227   : > { %v1149_v17 = vadd.f32 %v1148_v57, %v1119_v4  ;;  %v1168_v58 = vpop.f32.mrf.mxu0  ;;  %v1197_v22 = vpop.f32.mrf.mxu1 }
 0x228   : > { %v1198_v20 = vadd.f32 %v1197_v22, %v1168_v58  ;;  %vm591_vm1 = vcmp.ge.s32.totalorder %v585_v56, %v587_v30  ;;  %v1421_v56 = vld [vmem:[#allocation10 + $0xf8] sm:$0xff] }
 0x229   : > { %1434 = vmatpush.xpose.msrb.mxu2 %v1149_v17 }
 0x22a   : > { %1281 = vmatpush.xpose.msrb.mxu0 %v1085_v41 }
 0x22d   : > { %1435 = vmatpush.xpose.msrb.mxu2 %v1146_v59 }
 0x22e   : > { %v1226_v61 = vpop.f32.mrf.mxu2  ;;  %v1255_v62 = vpop.f32.mrf.mxu3  ;;  %1282 = vmatpush.xpose.msrb.mxu0 %v1082_v60 }
 0x22f   : > { %v1171_v2 = vpop.f32.mrf.mxu0  ;;  %v1200_v3 = vpop.f32.mrf.mxu1  ;;  %v1256_v25 = vadd.f32 %v1255_v62, %v1226_v61 }
 0x230   : > { %v1201_v19 = vadd.f32 %v1200_v3, %v1171_v2 }
 0x231   : > { %1436 = vmatpush.xpose.msrb.mxu2 %v1143_v1  ;;  %1283 = vmatmul.f32.vlgmr.msrb.gmra.mxu0 %v966_v63 }
 0x235   : > { %1437 = vmatpush.xpose.msrb.mxu2 %v1140_v5 }
 0x236   : > { %v1229_v7 = vpop.f32.mrf.mxu2  ;;  %v1258_v35 = vpop.f32.mrf.mxu3 }
 0x237   : > { %v1174_v9 = vpop.f32.mrf.mxu0  ;;  %v1203_v47 = vpop.f32.mrf.mxu1  ;;  %v1259_v24 = vadd.f32 %v1258_v35, %v1229_v7 }
 0x238   : > { %1438 = vmatmul.f32.vlgmr.msrb.gmra.mxu2 %v1024_v6  ;;  %v1204_v18 = vadd.f32 %v1203_v47, %v1174_v9 }
 0x239   : > { %1286 = vmatmul.f32.gmra.mxu0 %v969_v48 }
 0x23e   : > { %v1232_v12 = vpop.f32.mrf.mxu2  ;;  %v1261_v31 = vpop.f32.mrf.mxu3 }
 0x23f   : > { %v1177_v32 = vpop.f32.mrf.mxu0  ;;  %v1206_v13 = vpop.f32.mrf.mxu1  ;;  %v1262_v23 = vadd.f32 %v1261_v31, %v1232_v12 }
 0x240   : > { %v1207_v8 = vadd.f32 %v1206_v13, %v1177_v32  ;;  %1441 = vmatmul.f32.gmra.mxu2 %v1027_v36 }
 0x241   : > { %1289 = vmatmul.f32.gmra.mxu0 %v972_v14 }
 0x242   : > { %1373 = vmatpush.msrb.mxu1 %v1207_v8 }
 0x244   : > { %1374 = vmatpush.msrb.mxu1 %v1204_v18 }
 0x246   : > { %v1235_v49 = vpop.f32.mrf.mxu2  ;;  %v1264_v50 = vpop.f32.mrf.mxu3  ;;  %1375 = vmatpush.msrb.mxu1 %v1201_v19 }
 0x247   : > { %v1265_v11 = vadd.f32 %v1264_v50, %v1235_v49 }
 0x248   : > { %1444 = vmatmul.f32.gmra.mxu2 %v1030_v10  ;;  %1376 = vmatpush.msrb.mxu1 %v1198_v20 }
 0x249   : > { %1527 = vmatpush.msrb.mxu3 %v1265_v11  ;;  %1292 = vmatmul.f32.gmra.mxu0 %v975_v21 }
 0x24b   : > { %1528 = vmatpush.msrb.mxu3 %v1262_v23 }
 0x24d   : > { %1529 = vmatpush.msrb.mxu3 %v1259_v24 }
 0x24f   : > { %1530 = vmatpush.msrb.mxu3 %v1256_v25 }
 0x250   : > { %1447 = vmatmul.f32.gmra.mxu2 %v1033_v27 }
 0x251   : > { %1663 = vmatpush.msra.mxu3 %v1421_v56  ;;  %v1391_v56 = vld [vmem:[#allocation10 + $0x8] sm:$0xff] }
 0x2ae   : > { %v1284_v40 = vpop.f32.mrf.mxu0 }
 0x2af   : > { %v1296_v37 = vmul.f32 0.088388346, %v1284_v40 }
 0x2b1   : > { %v1300_v0 = vsel %vm588_vm13, %v1296_v37, -1e+30 }
 0x2b2   : > { %v1305_v42 = vsel %vm1304_vm14, %v1300_v0, -inf }
 0x2b3   : > { %1306 = vmax.xlane.f32.xlu2 %v1305_v42 }
 0x2b6   : > { %v1287_v45 = vpop.f32.mrf.mxu0 }
 0x2b7   : > { %v1297_v46 = vmul.f32 0.088388346, %v1287_v45 }
 0x2b9   : > { %v1301_v38 = vsel %vm589_vm15, %v1297_v46, -1e+30 }
 0x2ba   : > { %v1308_v39 = vsel %vm1304_vm14, %v1301_v38, -inf }
 0x2bb   : > { %v1439_v34 = vpop.f32.mrf.mxu2  ;;  %1309 = vmax.xlane.f32.xlu1 %v1308_v39 }
 0x2bc   : > { %v1451_v43 = vmul.f32 0.088388346, %v1439_v34 }
 0x2be   : > { %v1290_v51 = vpop.f32.mrf.mxu0  ;;  %v1455_v52 = vsel %vm588_vm13, %v1451_v43, -1e+30 }
 0x2bf   : > { %v1459_v53 = vsel %vm1304_vm14, %v1455_v52, -inf  ;;  %v1298_v54 = vmul.f32 0.088388346, %v1290_v51 }
 0x2c0   : > { %1460 = vmax.xlane.f32.xlu0 %v1459_v53 }
 0x2c1   : > { %v1302_v16 = vsel %vm590_vm0, %v1298_v54, -1e+30 }
 0x2c2   : > { %v1311_v58 = vsel %vm1304_vm14, %v1302_v16, -inf }
 0x2c3   : > { %v1442_v55 = vpop.f32.mrf.mxu2 }
 0x2c4   : > { %v1452_v15 = vmul.f32 0.088388346, %v1442_v55 }
 0x2c6   : > { %v1293_v4 = vpop.f32.mrf.mxu0  ;;  %v1456_v57 = vsel %vm589_vm15, %v1452_v15, -1e+30 }
 0x2c7   : > { %v1462_v17 = vsel %vm1304_vm14, %v1456_v57, -inf  ;;  %v1299_v22 = vmul.f32 0.088388346, %v1293_v4  ;;  %v1418_v4 = vld [vmem:[#allocation10 + $0xe0] sm:$0xff] }
 0x2c8   : > { %1463 = vmax.xlane.f32.xlu2 %v1462_v17  ;;  %1312 = vmax.xlane.f32.xlu0 %v1311_v58  ;;  %v1419_v17 = vld [vmem:[#allocation10 + $0xe8] sm:$0xff]  ;;  %v1416_v58 = vld [vmem:[#allocation10 + $0xd0] sm:$0xff] }
 0x2c9   : > { %v1303_v60 = vsel %vm591_vm1, %v1299_v22, -1e+30  ;;  %v1417_v22 = vld [vmem:[#allocation10 + $0xd8] sm:$0xff]  ;;  %1664 = vmatpush.msra.mxu3 %v1419_v17  ;;  %v1558_v17 = vld [vmem:[#allocation10 + $0x170] sm:$0xff] }
 0x2ca   : > { %v1314_v63 = vsel %vm1304_vm14, %v1303_v60, -inf }
 0x2cb   : > { %v1445_v41 = vpop.f32.mrf.mxu2  ;;  %1665 = vmatpush.msra.mxu3 %v1417_v22  ;;  %v1556_v22 = vld [vmem:[#allocation10 + $0x160] sm:$0xff] }
 0x2cc   : > { %v1453_v59 = vmul.f32 0.088388346, %v1445_v41  ;;  %v1414_v41 = vld [vmem:[#allocation10 + $0xc0] sm:$0xff] }
 0x2ce   : > { %v1457_v61 = vsel %vm590_vm0, %v1453_v59, -1e+30 }
 0x2cf   : > { %v1465_v62 = vsel %vm1304_vm14, %v1457_v61, -inf }
 0x2d0   : > { %1466 = vmax.xlane.f32.xlu1 %v1465_v62  ;;  %1315 = vmax.xlane.f32.xlu2 %v1314_v63  ;;  %v1412_v63 = vld [vmem:[#allocation10 + $0xb0] sm:$0xff] }
 0x2d3   : > { %v1448_v1 = vpop.f32.mrf.mxu2 }
 0x2d4   : > { %v1454_v2 = vmul.f32 0.088388346, %v1448_v1  ;;  %v1574_v1 = vld [vmem:[#allocation10 + $0x1f0] sm:$0xff] }
 0x2d5   : > { %1576 = vmatpush.msra.mxu0 %v1574_v1  ;;  %v1548_v1 = vld [vmem:[#allocation10 + $0x120] sm:$0xff] }
 0x2d6   : > { %v1458_v3 = vsel %vm591_vm1, %v1454_v2, -1e+30  ;;  %v1575_v2 = vld [vmem:[#allocation10 + $0x1f8] sm:$0xff] }
 0x2d7   : > { %v1468_v5 = vsel %vm1304_vm14, %v1458_v3, -inf  ;;  %1605 = vmatpush.msra.mxu1 %v1575_v2  ;;  %v1549_v2 = vld [vmem:[#allocation10 + $0x128] sm:$0xff] }
 0x2d8   : > { %1469 = vmax.xlane.f32.xlu0 %v1468_v5  ;;  %v1572_v5 = vld [vmem:[#allocation10 + $0x1e0] sm:$0xff] }
 0x2d9   : > { %1577 = vmatpush.msra.mxu0 %v1572_v5  ;;  %v1547_v5 = vld [vmem:[#allocation10 + $0x118] sm:$0xff] }
 0x326   : > { %v1307_v6 = vpop.xlane.xlu2 %1306 }
 0x327   : > { %v1317_v7 = vsub.f32 %v1300_v0, %v1307_v6  ;;  %v1573_v6 = vld [vmem:[#allocation10 + $0x1e8] sm:$0xff] }
 0x328   : > { %1606 = vmatpush.msra.mxu1 %v1573_v6  ;;  %v1544_v6 = vld [vmem:[#allocation10 + $0x100] sm:$0xff] }
 0x329   : > { %v1321_v35 = vmul.f32 1.442695, %v1317_v7  ;;  %v1413_v7 = vld [vmem:[#allocation10 + $0xb8] sm:$0xff] }
 0x32b   : > { %3727 = vpow2.f32 %v1321_v35  ;;  %v1410_v35 = vld [vmem:[#allocation10 + $0xa0] sm:$0xff] }
 0x32e   : > { %v1310_v9 = vpop.xlane.xlu1 %1309 }
 0x32f   : > { %v1318_v47 = vsub.f32 %v1301_v38, %v1310_v9  ;;  %v1570_v9 = vld [vmem:[#allocation10 + $0x1d0] sm:$0xff] }
 0x330   : > { %1578 = vmatpush.msra.mxu0 %v1570_v9 }
 0x331   : > { %v3728_v48 = vpop.eup %3727  ;;  %v1323_v12 = vmul.f32 1.442695, %v1318_v47  ;;  %v1571_v47 = vld [vmem:[#allocation10 + $0x1d8] sm:$0xff] }
 0x332   : > { %v1329_v31 = vsel %vm1304_vm14, %v3728_v48, 0.0  ;;  %1607 = vmatpush.msra.mxu1 %v1571_v47 }
 0x333   : > { %3729 = vpow2.f32 %v1323_v12  ;;  %v1461_v36 = vpop.xlane.xlu0 %1460  ;;  %1330 = vadd.xlane.f32.xlu1 %v1329_v31  ;;  %v1408_v12 = vld [vmem:[#allocation10 + $0x90] sm:$0xff]  ;;  %v1568_v31 = vld [vmem:[#allocation10 + $0x1c0] sm:$0xff] }
 0x334   : > { %v1471_v32 = vsub.f32 %v1455_v52, %v1461_v36  ;;  %v1569_v36 = vld [vmem:[#allocation10 + $0x1c8] sm:$0xff]  ;;  %1579 = vmatpush.msra.mxu0 %v1568_v31 }
 0x335   : > { %1608 = vmatpush.msra.mxu1 %v1569_v36 }
 0x336   : > { %v1475_v13 = vmul.f32 1.442695, %v1471_v32  ;;  %v1409_v32 = vld [vmem:[#allocation10 + $0x98] sm:$0xff] }
 0x338   : > { %3731 = vpow2.f32 %v1475_v13  ;;  %v1406_v13 = vld [vmem:[#allocation10 + $0x80] sm:$0xff] }
 0x339   : > { %v3730_v14 = vpop.eup %3729 }
 0x33a   : > { %v1332_v8 = vsel %vm1304_vm14, %v3730_v14, 0.0 }
 0x33b   : > { %v1464_v18 = vpop.xlane.xlu2 %1463  ;;  %v1313_v19 = vpop.xlane.xlu0 %1312  ;;  %1333 = vadd.xlane.f32.xlu0 %v1332_v8  ;;  %v1566_v8 = vld [vmem:[#allocation10 + $0x1b0] sm:$0xff] }
 0x33c   : > { %v1472_v20 = vsub.f32 %v1456_v57, %v1464_v18  ;;  %v1319_v49 = vsub.f32 %v1302_v16, %v1313_v19  ;;  %v1420_v16 = vld [vmem:[#allocation10 + $0xf0] sm:$0xff]  ;;  %1580 = vmatpush.msra.mxu0 %v1566_v8  ;;  %v1692_v8 = vld [vmem:[#allocation11] sm:$0x3] }
 0x33d   : > { %1634 = vmatpush.msra.mxu2 %v1420_v16  ;;  %v1390_v16 = vld [vmem:[#allocation10] sm:$0xff] }
 0x33e   : > { %v3732_v50 = vpop.eup %3731  ;;  %v1477_v10 = vmul.f32 1.442695, %v1472_v20  ;;  %v1325_v11 = vmul.f32 1.442695, %v1319_v49  ;;  %v1407_v49 = vld [vmem:[#allocation10 + $0x88] sm:$0xff] }
 0x33f   : > { %v1483_v21 = vsel %vm1304_vm14, %v3732_v50, 0.0  ;;  %1635 = vmatpush.msra.mxu2 %v1418_v4  ;;  %v1560_v4 = vld [vmem:[#allocation10 + $0x180] sm:$0xff] }
 0x340   : > { %3733 = vpow2.f32 %v1477_v10  ;;  %1484 = vadd.xlane.f32.xlu2 %v1483_v21  ;;  %v1567_v21 = vld [vmem:[#allocation10 + $0x1b8] sm:$0xff] }
 0x341   : > { %3735 = vpow2.f32 %v1325_v11  ;;  %1636 = vmatpush.msra.mxu2 %v1416_v58  ;;  %v1404_v11 = vld [vmem:[#allocation10 + $0x70] sm:$0xff]  ;;  %1609 = vmatpush.msra.mxu1 %v1567_v21  ;;  %v1559_v58 = vld [vmem:[#allocation10 + $0x178] sm:$0xff] }
 0x343   : > { %v1467_v23 = vpop.xlane.xlu1 %1466  ;;  %v1316_v24 = vpop.xlane.xlu2 %1315  ;;  %1637 = vmatpush.msra.mxu2 %v1414_v41  ;;  %v1554_v41 = vld [vmem:[#allocation10 + $0x150] sm:$0xff] }
 0x344   : > { %v1473_v25 = vsub.f32 %v1457_v61, %v1467_v23  ;;  %v1320_v27 = vsub.f32 %v1303_v60, %v1316_v24  ;;  %v1415_v60 = vld [vmem:[#allocation10 + $0xc8] sm:$0xff]  ;;  %v1405_v23 = vld [vmem:[#allocation10 + $0x78] sm:$0xff]  ;;  %v1564_v24 = vld [vmem:[#allocation10 + $0x1a0] sm:$0xff] }
 0x345   : > { %1666 = vmatpush.msra.mxu3 %v1415_v60  ;;  %1638 = vmatpush.msra.mxu2 %v1412_v63  ;;  %v1552_v60 = vld [vmem:[#allocation10 + $0x140] sm:$0xff]  ;;  %v1551_v63 = vld [vmem:[#allocation10 + $0x138] sm:$0xff] }
 0x346   : > { %v4665_v28 = vpop.eup %3733  ;;  %v1479_v29 = vmul.f32 1.442695, %v1473_v25  ;;  %v1327_v30 = vmul.f32 1.442695, %v1320_v27  ;;  %v1402_v25 = vld [vmem:[#allocation10 + $0x60] sm:$0xff]  ;;  %v1565_v27 = vld [vmem:[#allocation10 + $0x1a8] sm:$0xff]  ;;  %1581 = vmatpush.msra.mxu0 %v1564_v24 }
 0x347   : > { %v4667_v40 = vpop.eup %3735  ;;  %v1486_v37 = vsel %vm1304_vm14, %v4665_v28, 0.0  ;;  %1667 = vmatpush.msra.mxu3 %v1413_v7  ;;  %1639 = vmatpush.msra.mxu2 %v1410_v35  ;;  %v1545_v7 = vld [vmem:[#allocation10 + $0x108] sm:$0xff] }
 0x348   : > { %3737 = vpow2.f32 %v1479_v29  ;;  %1487 = vadd.xlane.f32.xlu1 %v1486_v37  ;;  %v1335_v0 = vsel %vm1304_vm14, %v4667_v40, 0.0  ;;  %v1400_v29 = vld [vmem:[#allocation10 + $0x50] sm:$0xff]  ;;  %1610 = vmatpush.msra.mxu1 %v1565_v27  ;;  %v1398_v37 = vld [vmem:[#allocation10 + $0x40] sm:$0xff] }
 0x349   : > { %3739 = vpow2.f32 %v1327_v30  ;;  %1336 = vadd.xlane.f32.xlu2 %v1335_v0  ;;  %1640 = vmatpush.msra.mxu2 %v1408_v12  ;;  %v1401_v30 = vld [vmem:[#allocation10 + $0x58] sm:$0xff] }
 0x34b   : > { %v1470_v42 = vpop.xlane.xlu0 %1469  ;;  %1641 = vmatpush.msra.mxu2 %v1406_v13 }
 0x34c   : > { %v1474_v33 = vsub.f32 %v1458_v3, %v1470_v42 }
 0x34d   : > { %1642 = vmatpush.msra.mxu2 %v1404_v11 }
 0x34e   : > { %v4673_v45 = vpop.eup %3737  ;;  %v1481_v46 = vmul.f32 1.442695, %v1474_v33 }
 0x34f   : > { %v4675_v38 = vpop.eup %3739  ;;  %v1489_v39 = vsel %vm1304_vm14, %v4673_v45, 0.0  ;;  %1643 = vmatpush.msra.mxu2 %v1402_v25  ;;  %v3767_v25 = vld [vmem:[%s4398_s18] sm:$0xff] }
 0x350   : > { %3741 = vpow2.f32 %v1481_v46  ;;  %1490 = vadd.xlane.f32.xlu0 %v1489_v39  ;;  %v1338_v34 = vsel %vm1304_vm14, %v4675_v38, 0.0  ;;  %v1399_v46 = vld [vmem:[#allocation10 + $0x48] sm:$0xff] }
 0x351   : > { %1339 = vadd.xlane.f32.xlu1 %v1338_v34  ;;  %1644 = vmatpush.msra.mxu2 %v1400_v29  ;;  %v1396_v34 = vld [vmem:[#allocation10 + $0x30] sm:$0xff] }
 0x353   : > { %1645 = vmatpush.msra.mxu2 %v1398_v37 }
 0x355   : > { %1646 = vmatpush.msra.mxu2 %v1396_v34 }
 0x356   : > { %v4681_v43 = vpop.eup %3741 }
 0x357   : > { %v1492_v44 = vsel %vm1304_vm14, %v4681_v43, 0.0 }
 0x358   : > { %1493 = vadd.xlane.f32.xlu2 %v1492_v44  ;;  %v1397_v44 = vld [vmem:[#allocation10 + $0x38] sm:$0xff] }
 0x3a6   : > { %v1331_v51 = vpop.xlane.xlu1 %1330 }
 0x3a7   : > { %3743 = vrcp.f32 %v1331_v51  ;;  %v1394_v51 = vld [vmem:[#allocation10 + $0x20] sm:$0xff] }
 0x3a8   : > { %1647 = vmatpush.msra.mxu2 %v1394_v51 }
 0x3ad   : > { %v3744_v52 = vpop.eup %3743 }
 0x3ae   : > { %v1345_v53 = vmul.f32 %v3744_v52, %v3728_v48  ;;  %v1334_v54 = vpop.xlane.xlu0 %1333  ;;  %v1411_v48 = vld [vmem:[#allocation10 + $0xa8] sm:$0xff] }
 0x3af   : > { %3745 = vrcp.f32 %v1334_v54  ;;  %1668 = vmatpush.msra.mxu3 %v1411_v48  ;;  %v1395_v52 = vld [vmem:[#allocation10 + $0x28] sm:$0xff] }
 0x3b0   : > { %3556 = vmatmul.msk.f32.vlgmr.msrb.gmra.mxu1 %vm1304_vm14, %v1345_v53  ;;  %v1392_v53 = vld [vmem:[#allocation10 + $0x10] sm:$0xff] }
 0x3b1   : > { %1669 = vmatpush.msra.mxu3 %v1409_v32  ;;  %1648 = vmatpush.msra.mxu2 %v1392_v53 }
 0x3b3   : > { %v1485_v55 = vpop.xlane.xlu2 %1484  ;;  %1670 = vmatpush.msra.mxu3 %v1407_v49  ;;  %1649 = vmatpush.msra.mxu2 %v1390_v16 }
 0x3b4   : > { %3747 = vrcp.f32 %v1485_v55  ;;  %v1562_v55 = vld [vmem:[#allocation10 + $0x190] sm:$0xff] }
 0x3b5   : > { %v3746_v15 = vpop.eup %3745  ;;  %1671 = vmatpush.msra.mxu3 %v1405_v23  ;;  %1582 = vmatpush.msra.mxu0 %v1562_v55 }
 0x3b6   : > { %v1346_v57 = vmul.f32 %v3746_v15, %v3730_v14  ;;  %v1563_v15 = vld [vmem:[#allocation10 + $0x198] sm:$0xff] }
 0x3b7   : > { %1611 = vmatpush.msra.mxu1 %v1563_v15  ;;  %1583 = vmatpush.msra.mxu0 %v1560_v4  ;;  %v3771_v4 = vld [vmem:[%s4398_s18 + $0x20] sm:$0xff] }
 0x3b8   : > { %3557 = vmatmul.msk.f32.gmra.mxu1 %vm1304_vm14, %v1346_v57  ;;  %v1561_v57 = vld [vmem:[#allocation10 + $0x188] sm:$0xff] }
 0x3b9   : > { %1612 = vmatpush.msra.mxu1 %v1561_v57  ;;  %1584 = vmatpush.msra.mxu0 %v1558_v17  ;;  %v3772_v17 = vld [vmem:[%s4398_s18 + $0x28] sm:$0xff] }
 0x3ba   : > { %v3748_v59 = vpop.eup %3747 }
 0x3bb   : > { %v1499_v61 = vmul.f32 %v3748_v59, %v3732_v50  ;;  %v1488_v62 = vpop.xlane.xlu1 %1487  ;;  %1613 = vmatpush.msra.mxu1 %v1559_v58  ;;  %1585 = vmatpush.msra.mxu0 %v1556_v22  ;;  %v1555_v59 = vld [vmem:[#allocation10 + $0x158] sm:$0xff] }
 0x3bc   : > { %3749 = vrcp.f32 %v1488_v62  ;;  %v1337_v3 = vpop.xlane.xlu2 %1336  ;;  %v1550_v62 = vld [vmem:[#allocation10 + $0x130] sm:$0xff] }
 0x3bd   : > { %3751 = vrcp.f32 %v1337_v3  ;;  %3560 = vmatmul.msk.f32.vlgmr.msrb.gmra.mxu3 %vm1304_vm14, %v1499_v61  ;;  %1586 = vmatpush.msra.mxu0 %v1554_v41  ;;  %v1553_v61 = vld [vmem:[#allocation10 + $0x148] sm:$0xff]  ;;  %v1546_v3 = vld [vmem:[#allocation10 + $0x110] sm:$0xff] }
 0x3bf   : > { %1587 = vmatpush.msra.mxu0 %v1552_v60 }
 0x3c1   : > { %1588 = vmatpush.msra.mxu0 %v1550_v62 }
 0x3c2   : > { %v3750_v14 = vpop.eup %3749 }
 0x3c3   : > { %v3752_v18 = vpop.eup %3751  ;;  %v1491_v19 = vpop.xlane.xlu0 %1490  ;;  %v1500_v20 = vmul.f32 %v3750_v14, %v4665_v28  ;;  %v1403_v28 = vld [vmem:[#allocation10 + $0x68] sm:$0xff]  ;;  %1589 = vmatpush.msra.mxu0 %v1548_v1 }
 0x3c4   : > { %3753 = vrcp.f32 %v1491_v19  ;;  %v1340_v50 = vpop.xlane.xlu1 %1339  ;;  %v1347_v10 = vmul.f32 %v3752_v18, %v4667_v40  ;;  %1672 = vmatpush.msra.mxu3 %v1403_v28  ;;  %v1694_v18 = vperm.slane %v1692_v8, 0  ;;  %v1695_v19 = vperm.slane %v1692_v8, 1  ;;  %v3768_v28 = vld [vmem:[%s4398_s18 + $0x8] sm:$0xff]  ;;  %v1955_v8 = vld [vmem:[#allocation16 + $0x388] sm:$0xff] }
 0x3c5   : > { %3755 = vrcp.f32 %v1340_v50  ;;  %3561 = vmatmul.msk.f32.gmra.mxu3 %vm1304_vm14, %v1500_v20  ;;  %1590 = vmatpush.msra.mxu0 %v1546_v3 }
 0x3c6   : > { %3558 = vmatmul.msk.f32.gmra.mxu1 %vm1304_vm14, %v1347_v10  ;;  %1673 = vmatpush.msra.mxu3 %v1401_v30 }
 0x3c7   : > { %1591 = vmatpush.msra.mxu0 %v1544_v6 }
 0x3c8   : > { %1674 = vmatpush.msra.mxu3 %v1399_v46 }
 0x3ca   : > { %v3754_v40 = vpop.eup %3753  ;;  %1675 = vmatpush.msra.mxu3 %v1397_v44  ;;  %v3770_v44 = vld [vmem:[%s4398_s18 + $0x18] sm:$0xff] }
 0x3cb   : > { %v3756_v0 = vpop.eup %3755  ;;  %v1494_v42 = vpop.xlane.xlu2 %1493  ;;  %v1501_v33 = vmul.f32 %v3754_v40, %v4673_v45  ;;  %v1393_v45 = vld [vmem:[#allocation10 + $0x18] sm:$0xff] }
 0x3cc   : > { %3757 = vrcp.f32 %v1494_v42  ;;  %v1348_v39 = vmul.f32 %v3756_v0, %v4675_v38  ;;  %1676 = vmatpush.msra.mxu3 %v1395_v52 }
 0x3cd   : > { %3562 = vmatmul.msk.f32.gmra.mxu3 %vm1304_vm14, %v1501_v33 }
 0x3ce   : > { %3559 = vmatmul.msk.f32.gmra.mxu1 %vm1304_vm14, %v1348_v39  ;;  %1677 = vmatpush.msra.mxu3 %v1393_v45  ;;  %v3769_v39 = vld [vmem:[%s4398_s18 + $0x10] sm:$0xff] }
 0x3d0   : > { %1678 = vmatpush.msra.mxu3 %v1391_v56 }
 0x3d2   : > { %v3758_v54 = vpop.eup %3757 }
 0x3d3   : > { %v1502_v38 = vmul.f32 %v3758_v54, %v4681_v43  ;;  %v1557_v43 = vld [vmem:[#allocation10 + $0x168] sm:$0xff] }
 0x3d4   : > { %1614 = vmatpush.msra.mxu1 %v1557_v43 }
 0x3d5   : > { %3563 = vmatmul.msk.f32.gmra.mxu3 %vm1304_vm14, %v1502_v38 }
 0x3d6   : > { %1615 = vmatpush.msra.mxu1 %v1555_v59 }
 0x3d8   : > { %1616 = vmatpush.msra.mxu1 %v1553_v61 }
 0x3da   : > { %1617 = vmatpush.msra.mxu1 %v1551_v63 }
 0x3dc   : > { %1618 = vmatpush.msra.mxu1 %v1549_v2  ;;  %v3773_v2 = vld [vmem:[%s4398_s18 + $0x30] sm:$0xff] }
 0x3de   : > { %1619 = vmatpush.msra.mxu1 %v1547_v5  ;;  %v3774_v5 = vld [vmem:[%s4398_s18 + $0x38] sm:$0xff]  ;;  %s4089_s18 = sshra.s32 %s3370_s4, 4  ;;  %s4090_s18 = int_to_ptr.hbm [resolvable:$true] %s4089_s18 }
 0x3df   : > { %s4091_s29 = scalar_lea.hbm %s4090_s18, 64  ;;  %p4096_p12 = scmp.lt.s32.totalorder %s4090_s18, %s5348_s12 }
 0x3e0   : > { %1620 = vmatpush.msra.mxu1 %v1545_v7  ;;  %p4092_p1 = scmp.ne.s32.totalorder %s4090_s18, %s4091_s29  ;;  %p4097_p8 = scmp.lt.s32.totalorder %s4095_s17, %s4091_s29 }
 0x3e2   : > { %p4093_p3 = pnand %p4092_p1, %p4358_p13  ;;  %p4098_p7 = por %p4097_p8, %p4096_p12 }
 0x3e4   : > { %p4094_p4 = pneg %p4093_p3 }
 0x3e6   : > { %p4099_p9 = pnand %p4098_p7, %p4094_p4 }
 0x42d   : > { %v1378_v35 = vpop.f32.mrf.mxu1 }
 0x42e   : > { %1650 = vmatmul.f32.vlgmr.msra.gmra.mxu2 %v1378_v35  ;;  %1679 = vmatmul.f32.vlgmr.msra.gmra.mxu3 %v1378_v35 }
 0x435   : > { %v1381_v9 = vpop.f32.mrf.mxu1 }
 0x436   : > { %1653 = vmatmul.f32.gmra.mxu2 %v1381_v9  ;;  %1682 = vmatmul.f32.gmra.mxu3 %v1381_v9 }
 0x440   : > { %v1532_v47 = vpop.f32.mrf.mxu3 }
 0x441   : > { %1592 = vmatmul.f32.vlgmr.msra.gmra.mxu0 %v1532_v47  ;;  %1621 = vmatmul.f32.vlgmr.msra.gmra.mxu1 %v1532_v47  ;;  %v1962_v47 = vld [vmem:[#allocation16 + $0x3c0] sm:$0xff] }
 0x442   : > { %2116 = vmatpush.msrb.mxu0 %v1962_v47  ;;  %v2034_v47 = vld [vmem:[#allocation16 + $0x600] sm:$0xff] }
 0x443   : > { %v1384_v48 = vpop.f32.mrf.mxu1 }
 0x444   : > { %1656 = vmatmul.f32.gmra.mxu2 %v1384_v48  ;;  %1685 = vmatmul.f32.gmra.mxu3 %v1384_v48  ;;  %v2090_v48 = vld [vmem:[#allocation16 + $0x7c0] sm:$0xff] }
 0x445   : > { %2145 = vmatpush.msrb.mxu1 %v2090_v48  ;;  %v1907_v48 = vld [vmem:[#allocation16 + $0x208] sm:$0xff] }
 0x448   : > { %v1535_v12 = vpop.f32.mrf.mxu3 }
 0x449   : > { %1595 = vmatmul.f32.gmra.mxu0 %v1535_v12  ;;  %1624 = vmatmul.f32.gmra.mxu1 %v1535_v12  ;;  %v1963_v12 = vld [vmem:[#allocation16 + $0x3c8] sm:$0xff] }
 0x44a   : > { %2174 = vmatpush.msrb.mxu2 %v1963_v12  ;;  %v2035_v12 = vld [vmem:[#allocation16 + $0x608] sm:$0xff] }
 0x44b   : > { %v1387_v31 = vpop.f32.mrf.mxu1 }
 0x44c   : > { %1659 = vmatmul.f32.gmra.mxu2 %v1387_v31  ;;  %1688 = vmatmul.f32.gmra.mxu3 %v1387_v31  ;;  %v2091_v31 = vld [vmem:[#allocation16 + $0x7c8] sm:$0xff] }
 0x44d   : > { %2203 = vmatpush.msrb.mxu3 %v2091_v31  ;;  %2175 = vmatpush.msrb.mxu2 %v1955_v8  ;;  %v1898_v31 = vld [vmem:[#allocation16 + $0x1c0] sm:$0xff]  ;;  %v2027_v8 = vld [vmem:[#allocation16 + $0x5c8] sm:$0xff] }
 0x450   : > { %v1538_v36 = vpop.f32.mrf.mxu3 }
 0x451   : > { %1598 = vmatmul.f32.gmra.mxu0 %v1538_v36  ;;  %1627 = vmatmul.f32.gmra.mxu1 %v1538_v36  ;;  %v1954_v36 = vld [vmem:[#allocation16 + $0x380] sm:$0xff] }
 0x452   : > { %2117 = vmatpush.msrb.mxu0 %v1954_v36  ;;  %v2026_v36 = vld [vmem:[#allocation16 + $0x5c0] sm:$0xff] }
 0x458   : > { %v1541_v32 = vpop.f32.mrf.mxu3 }
 0x459   : > { %1601 = vmatmul.f32.gmra.mxu0 %v1541_v32  ;;  %1630 = vmatmul.f32.gmra.mxu1 %v1541_v32  ;;  %v2082_v32 = vld [vmem:[#allocation16 + $0x780] sm:$0xff] }
 0x45a   : > { %2146 = vmatpush.msrb.mxu1 %v2082_v32  ;;  %v1899_v32 = vld [vmem:[#allocation16 + $0x1c8] sm:$0xff] }
 0x4b1   : > { %v1651_v13 = vpop.f32.mrf.mxu2  ;;  %v1680_v14 = vpop.f32.mrf.mxu3 }
 0x4b9   : > { %v1654_v23 = vpop.f32.mrf.mxu2  ;;  %v1683_v24 = vpop.f32.mrf.mxu3 }
 0x4be   : > { %v1593_v20 = vpop.f32.mrf.mxu0  ;;  %v1622_v49 = vpop.f32.mrf.mxu1 }
 0x4bf   : > { %v1652_v50 = vadd.f32 %v1651_v13, %v1593_v20  ;;  %v1681_v10 = vadd.f32 %v1680_v14, %v1622_v49 }
 0x4c1   : > { %v1698_v11 = vadd.f32 %v1694_v18, %v1652_v50  ;;  %v1699_v21 = vadd.f32 %v1695_v19, %v1681_v10 }
 0x4c3   : > { %v4699_v27 = vadd.f32 %v3767_v25, %v1698_v11  ;;  %v4702_v29 = vadd.f32 %v3768_v28, %v1699_v21 }
 0x4c5   : > { %v1716_v30 = vadd.f32 %v4702_v29, %v4699_v27 }
 0x4c6   : > { %v1596_v40 = vpop.f32.mrf.mxu0  ;;  %v1625_v37 = vpop.f32.mrf.mxu1 }
 0x4c7   : > { %v1655_v0 = vadd.f32 %v1654_v23, %v1596_v40  ;;  %v1684_v42 = vadd.f32 %v1683_v24, %v1625_v37  ;;  %1717 = vadd.xlane.f32.xlu0 %v1716_v30  ;;  %v1657_v52 = vpop.f32.mrf.mxu2  ;;  %v1686_v53 = vpop.f32.mrf.mxu3 }
 0x4c9   : > { %v1700_v33 = vadd.f32 %v1694_v18, %v1655_v0  ;;  %v1701_v46 = vadd.f32 %v1695_v19, %v1684_v42 }
 0x4cb   : > { %v4707_v34 = vadd.f32 %v3769_v39, %v1700_v33  ;;  %v4710_v51 = vadd.f32 %v3770_v44, %v1701_v46 }
 0x4cd   : > { %v1719_v45 = vadd.f32 %v4710_v51, %v4707_v34 }
 0x4ce   : > { %v1599_v54 = vpop.f32.mrf.mxu0  ;;  %v1628_v38 = vpop.f32.mrf.mxu1 }
 0x4cf   : > { %v1658_v55 = vadd.f32 %v1657_v52, %v1599_v54  ;;  %v1687_v15 = vadd.f32 %v1686_v53, %v1628_v38  ;;  %1720 = vadd.xlane.f32.xlu1 %v1719_v45  ;;  %v1660_v22 = vpop.f32.mrf.mxu2  ;;  %v1689_v43 = vpop.f32.mrf.mxu3  ;;  %v1946_v38 = vld [vmem:[#allocation16 + $0x340] sm:$0xff] }
 0x4d0   : > { %2118 = vmatpush.msrb.mxu0 %v1946_v38  ;;  %v1987_v38 = vld [vmem:[#allocation16 + $0x488] sm:$0xff] }
 0x4d1   : > { %v1702_v16 = vadd.f32 %v1694_v18, %v1658_v55  ;;  %v1703_v56 = vadd.f32 %v1695_v19, %v1687_v15  ;;  %v2074_v55 = vld [vmem:[#allocation16 + $0x740] sm:$0xff]  ;;  %v1947_v15 = vld [vmem:[#allocation16 + $0x348] sm:$0xff] }
 0x4d2   : > { %2147 = vmatpush.msrb.mxu1 %v2074_v55  ;;  %2176 = vmatpush.msrb.mxu2 %v1947_v15  ;;  %v1850_v55 = vld [vmem:[#allocation16 + $0x40] sm:$0xff] }
 0x4d3   : > { %v4715_v57 = vadd.f32 %v3771_v4, %v1702_v16  ;;  %v4718_v58 = vadd.f32 %v3772_v17, %v1703_v56  ;;  %v2075_v16 = vld [vmem:[#allocation16 + $0x748] sm:$0xff]  ;;  %v1938_v56 = vld [vmem:[#allocation16 + $0x300] sm:$0xff] }
 0x4d4   : > { %v2066_v4 = vld [vmem:[#allocation16 + $0x700] sm:$0xff]  ;;  %v1939_v17 = vld [vmem:[#allocation16 + $0x308] sm:$0xff]  ;;  %2119 = vmatpush.msrb.mxu0 %v1938_v56 }
 0x4d5   : > { %v1722_v41 = vadd.f32 %v4718_v58, %v4715_v57  ;;  %2148 = vmatpush.msrb.mxu1 %v2066_v4  ;;  %2177 = vmatpush.msrb.mxu2 %v1939_v17  ;;  %v1978_v15 = vld [vmem:[#allocation16 + $0x440] sm:$0xff]  ;;  %v1979_v56 = vld [vmem:[#allocation16 + $0x448] sm:$0xff] }
 0x4d6   : > { %v1602_v59 = vpop.f32.mrf.mxu0  ;;  %v1631_v60 = vpop.f32.mrf.mxu1  ;;  %v1842_v4 = vld [vmem:[#allocation16] sm:$0xff] }
 0x4d7   : > { %v1661_v61 = vadd.f32 %v1660_v22, %v1602_v59  ;;  %v1690_v62 = vadd.f32 %v1689_v43, %v1631_v60  ;;  %1723 = vadd.xlane.f32.xlu2 %v1722_v41  ;;  %v2067_v22 = vld [vmem:[#allocation16 + $0x708] sm:$0xff]  ;;  %v1930_v43 = vld [vmem:[#allocation16 + $0x2c0] sm:$0xff] }
 0x4d8   : > { %v2058_v41 = vld [vmem:[#allocation16 + $0x6c0] sm:$0xff]  ;;  %v1931_v59 = vld [vmem:[#allocation16 + $0x2c8] sm:$0xff]  ;;  %2120 = vmatpush.msrb.mxu0 %v1930_v43 }
 0x4d9   : > { %v1704_v63 = vadd.f32 %v1694_v18, %v1661_v61  ;;  %v1705_v1 = vadd.f32 %v1695_v19, %v1690_v62  ;;  %v2083_v18 = vld [vmem:[#allocation16 + $0x788] sm:$0xff]  ;;  %2149 = vmatpush.msrb.mxu1 %v2058_v41  ;;  %2178 = vmatpush.msrb.mxu2 %v1931_v59  ;;  %v1922_v61 = vld [vmem:[#allocation16 + $0x280] sm:$0xff]  ;;  %v1964_v41 = vld [vmem:[#allocation16 + $0x3d0] sm:$0xff] }
 0x4da   : > { %2204 = vmatpush.msrb.mxu3 %v2083_v18  ;;  %v2059_v60 = vld [vmem:[#allocation16 + $0x6c8] sm:$0xff]  ;;  %v2050_v62 = vld [vmem:[#allocation16 + $0x680] sm:$0xff]  ;;  %2121 = vmatpush.msrb.mxu0 %v1922_v61  ;;  %v2092_v59 = vld [vmem:[#allocation16 + $0x7d0] sm:$0xff] }
 0x4db   : > { %v4723_v3 = vadd.f32 %v3773_v2, %v1704_v63  ;;  %v4726_v6 = vadd.f32 %v3774_v5, %v1705_v1  ;;  %v1923_v63 = vld [vmem:[#allocation16 + $0x288] sm:$0xff]  ;;  %2150 = vmatpush.msrb.mxu1 %v2050_v62  ;;  %v1914_v2 = vld [vmem:[#allocation16 + $0x240] sm:$0xff]  ;;  %v2093_v61 = vld [vmem:[#allocation16 + $0x7d8] sm:$0xff] }
 0x4dc   : > { %2205 = vmatpush.msrb.mxu3 %v2075_v16  ;;  %v2051_v1 = vld [vmem:[#allocation16 + $0x688] sm:$0xff]  ;;  %2179 = vmatpush.msrb.mxu2 %v1923_v63  ;;  %v2042_v5 = vld [vmem:[#allocation16 + $0x640] sm:$0xff]  ;;  %v1956_v63 = vld [vmem:[#allocation16 + $0x390] sm:$0xff] }
 0x4dd   : > { %v1725_v7 = vadd.f32 %v4726_v6, %v4723_v3  ;;  %2122 = vmatpush.msrb.mxu0 %v1914_v2  ;;  %2151 = vmatpush.msrb.mxu1 %v2042_v5  ;;  %v1890_v18 = vld [vmem:[#allocation16 + $0x180] sm:$0xff]  ;;  %v1851_v16 = vld [vmem:[#allocation16 + $0x48] sm:$0xff]  ;;  %v1957_v2 = vld [vmem:[#allocation16 + $0x398] sm:$0xff] }
 0x4de   : > { %2206 = vmatpush.msrb.mxu3 %v2067_v22  ;;  %v1970_v17 = vld [vmem:[#allocation16 + $0x400] sm:$0xff]  ;;  %v1843_v22 = vld [vmem:[#allocation16 + $0x8] sm:$0xff] }
 0x4df   : > { %1726 = vadd.xlane.f32.xlu0 %v1725_v7  ;;  %v1915_v7 = vld [vmem:[#allocation16 + $0x248] sm:$0xff]  ;;  %2152 = vmatpush.msrb.mxu1 %v2034_v47  ;;  %v1949_v47 = vld [vmem:[#allocation16 + $0x358] sm:$0xff] }
 0x4e0   : > { %2207 = vmatpush.msrb.mxu3 %v2059_v60  ;;  %2180 = vmatpush.msrb.mxu2 %v1915_v7  ;;  %v1971_v43 = vld [vmem:[#allocation16 + $0x408] sm:$0xff]  ;;  %v1965_v60 = vld [vmem:[#allocation16 + $0x3d8] sm:$0xff] }
 0x4e1   : > { %2153 = vmatpush.msrb.mxu1 %v2026_v36  ;;  %v2085_v7 = vld [vmem:[#allocation16 + $0x798] sm:$0xff]  ;;  %v2068_v36 = vld [vmem:[#allocation16 + $0x710] sm:$0xff] }
 0x4e2   : > { %2208 = vmatpush.msrb.mxu3 %v2051_v1  ;;  %2181 = vmatpush.msrb.mxu2 %v1907_v48  ;;  %v2084_v1 = vld [vmem:[#allocation16 + $0x790] sm:$0xff] }
 0x4e4   : > { %2182 = vmatpush.msrb.mxu2 %v1899_v32  ;;  %v1941_v32 = vld [vmem:[#allocation16 + $0x318] sm:$0xff] }
 0x53a   : > { %v1718_v35 = vpop.xlane.xlu0 %1717 }
 0x53b   : > { %v1728_v9 = vmul.f32 %v1718_v35, %v4432_v26  ;;  %v2043_v35 = vld [vmem:[#allocation16 + $0x648] sm:$0xff] }
 0x53c   : > { %2209 = vmatpush.msrb.mxu3 %v2043_v35  ;;  %v1948_v35 = vld [vmem:[#allocation16 + $0x350] sm:$0xff] }
 0x53d   : > { %v4732_v13 = vsub.f32 %v4699_v27, %v1728_v9  ;;  %v4735_v14 = vsub.f32 %v4702_v29, %v1728_v9  ;;  %v1906_v9 = vld [vmem:[#allocation16 + $0x200] sm:$0xff] }
 0x53e   : > { %2123 = vmatpush.msrb.mxu0 %v1906_v9  ;;  %2210 = vmatpush.msrb.mxu3 %v2035_v12  ;;  %v2076_v9 = vld [vmem:[#allocation16 + $0x750] sm:$0xff]  ;;  %v2077_v12 = vld [vmem:[#allocation16 + $0x758] sm:$0xff] }
 0x53f   : > { %v1740_v19 = vmul.f32 %v4732_v13, %v4732_v13  ;;  %v1741_v20 = vmul.f32 %v4735_v14, %v4735_v14 }
 0x540   : > { %2124 = vmatpush.msrb.mxu0 %v1898_v31  ;;  %2211 = vmatpush.msrb.mxu3 %v2027_v8  ;;  %v1940_v31 = vld [vmem:[#allocation16 + $0x310] sm:$0xff]  ;;  %v2069_v8 = vld [vmem:[#allocation16 + $0x718] sm:$0xff] }
 0x541   : > { %v1748_v49 = vadd.f32 %v1741_v20, %v1740_v19  ;;  %v2018_v19 = vld [vmem:[#allocation16 + $0x580] sm:$0xff]  ;;  %v1891_v20 = vld [vmem:[#allocation16 + $0x188] sm:$0xff] }
 0x542   : > { %v1721_v50 = vpop.xlane.xlu1 %1720  ;;  %2125 = vmatpush.msrb.mxu0 %v1890_v18  ;;  %2154 = vmatpush.msrb.mxu1 %v2018_v19  ;;  %v1932_v18 = vld [vmem:[#allocation16 + $0x2d0] sm:$0xff] }
 0x543   : > { %v1729_v10 = vmul.f32 %v1721_v50, %v4432_v26  ;;  %1749 = vadd.xlane.f32.xlu1 %v1748_v49  ;;  %v2019_v49 = vld [vmem:[#allocation16 + $0x588] sm:$0xff]  ;;  %2183 = vmatpush.msrb.mxu2 %v1891_v20  ;;  %v1882_v50 = vld [vmem:[#allocation16 + $0x140] sm:$0xff]  ;;  %v2060_v19 = vld [vmem:[#allocation16 + $0x6d0] sm:$0xff] }
 0x544   : > { %2212 = vmatpush.msrb.mxu3 %v2019_v49  ;;  %2126 = vmatpush.msrb.mxu0 %v1882_v50  ;;  %v1933_v20 = vld [vmem:[#allocation16 + $0x2d8] sm:$0xff] }
 0x545   : > { %v4743_v11 = vsub.f32 %v4707_v34, %v1729_v10  ;;  %v4746_v21 = vsub.f32 %v4710_v51, %v1729_v10  ;;  %v2010_v10 = vld [vmem:[#allocation16 + $0x540] sm:$0xff]  ;;  %v2061_v49 = vld [vmem:[#allocation16 + $0x6d8] sm:$0xff] }
 0x546   : > { %2155 = vmatpush.msrb.mxu1 %v2010_v10  ;;  %v1924_v10 = vld [vmem:[#allocation16 + $0x290] sm:$0xff] }
 0x547   : > { %v1742_v23 = vmul.f32 %v4743_v11, %v4743_v11  ;;  %v1743_v24 = vmul.f32 %v4746_v21, %v4746_v21 }
 0x549   : > { %v1751_v25 = vadd.f32 %v1743_v24, %v1742_v23  ;;  %v1883_v23 = vld [vmem:[#allocation16 + $0x148] sm:$0xff] }
 0x54a   : > { %v1724_v28 = vpop.xlane.xlu2 %1723  ;;  %v2011_v24 = vld [vmem:[#allocation16 + $0x548] sm:$0xff]  ;;  %2184 = vmatpush.msrb.mxu2 %v1883_v23  ;;  %v2052_v23 = vld [vmem:[#allocation16 + $0x690] sm:$0xff] }
 0x54b   : > { %v1730_v30 = vmul.f32 %v1724_v28, %v4432_v26  ;;  %1752 = vadd.xlane.f32.xlu2 %v1751_v25  ;;  %2213 = vmatpush.msrb.mxu3 %v2011_v24  ;;  %v1874_v25 = vld [vmem:[#allocation16 + $0x100] sm:$0xff]  ;;  %v1925_v24 = vld [vmem:[#allocation16 + $0x298] sm:$0xff] }
 0x54c   : > { %v2002_v28 = vld [vmem:[#allocation16 + $0x500] sm:$0xff]  ;;  %2127 = vmatpush.msrb.mxu0 %v1874_v25 }
 0x54d   : > { %v4754_v40 = vsub.f32 %v4715_v57, %v1730_v30  ;;  %v4757_v37 = vsub.f32 %v4718_v58, %v1730_v30  ;;  %v1875_v30 = vld [vmem:[#allocation16 + $0x108] sm:$0xff]  ;;  %2156 = vmatpush.msrb.mxu1 %v2002_v28  ;;  %v2053_v28 = vld [vmem:[#allocation16 + $0x698] sm:$0xff] }
 0x54e   : > { %2185 = vmatpush.msrb.mxu2 %v1875_v30  ;;  %v1916_v30 = vld [vmem:[#allocation16 + $0x250] sm:$0xff] }
 0x54f   : > { %v1744_v0 = vmul.f32 %v4754_v40, %v4754_v40  ;;  %v1745_v42 = vmul.f32 %v4757_v37, %v4757_v37 }
 0x551   : > { %v1754_v33 = vadd.f32 %v1745_v42, %v1744_v0  ;;  %v2003_v0 = vld [vmem:[#allocation16 + $0x508] sm:$0xff]  ;;  %v1866_v42 = vld [vmem:[#allocation16 + $0xc0] sm:$0xff] }
 0x552   : > { %v1727_v46 = vpop.xlane.xlu0 %1726  ;;  %2214 = vmatpush.msrb.mxu3 %v2003_v0  ;;  %2128 = vmatpush.msrb.mxu0 %v1866_v42  ;;  %v2044_v0 = vld [vmem:[#allocation16 + $0x650] sm:$0xff]  ;;  %v1917_v42 = vld [vmem:[#allocation16 + $0x258] sm:$0xff] }
 0x553   : > { %v1731_v39 = vmul.f32 %v1727_v46, %v4432_v26  ;;  %1755 = vadd.xlane.f32.xlu0 %v1754_v33  ;;  %v1994_v33 = vld [vmem:[#allocation16 + $0x4c0] sm:$0xff]  ;;  %v1867_v46 = vld [vmem:[#allocation16 + $0xc8] sm:$0xff] }
 0x554   : > { %2157 = vmatpush.msrb.mxu1 %v1994_v33  ;;  %2186 = vmatpush.msrb.mxu2 %v1867_v46 }
 0x555   : > { %v4765_v44 = vsub.f32 %v4723_v3, %v1731_v39  ;;  %v4768_v52 = vsub.f32 %v4726_v6, %v1731_v39  ;;  %v1995_v39 = vld [vmem:[#allocation16 + $0x4c8] sm:$0xff] }
 0x556   : > { %2215 = vmatpush.msrb.mxu3 %v1995_v39  ;;  %v2045_v39 = vld [vmem:[#allocation16 + $0x658] sm:$0xff] }
 0x557   : > { %v1746_v53 = vmul.f32 %v4765_v44, %v4765_v44  ;;  %v1747_v45 = vmul.f32 %v4768_v52, %v4768_v52 }
 0x558   : > { %2216 = vmatpush.msrb.mxu3 %v1987_v38  ;;  %v1909_v38 = vld [vmem:[#allocation16 + $0x218] sm:$0xff] }
 0x559   : > { %v1757_v54 = vadd.f32 %v1747_v45, %v1746_v53  ;;  %v1858_v53 = vld [vmem:[#allocation16 + $0x80] sm:$0xff] }
 0x55a   : > { %v1986_v45 = vld [vmem:[#allocation16 + $0x480] sm:$0xff]  ;;  %2129 = vmatpush.msrb.mxu0 %v1858_v53  ;;  %2217 = vmatpush.msrb.mxu3 %v1979_v56  ;;  %v2028_v56 = vld [vmem:[#allocation16 + $0x5d0] sm:$0xff] }
 0x55b   : > { %1758 = vadd.xlane.f32.xlu1 %v1757_v54  ;;  %v1859_v54 = vld [vmem:[#allocation16 + $0x88] sm:$0xff]  ;;  %2158 = vmatpush.msrb.mxu1 %v1986_v45  ;;  %v1908_v45 = vld [vmem:[#allocation16 + $0x210] sm:$0xff] }
 0x55c   : > { %2187 = vmatpush.msrb.mxu2 %v1859_v54  ;;  %2130 = vmatpush.msrb.mxu0 %v1850_v55  ;;  %v2036_v54 = vld [vmem:[#allocation16 + $0x610] sm:$0xff]  ;;  %v2037_v55 = vld [vmem:[#allocation16 + $0x618] sm:$0xff] }
 0x55d   : > { %2159 = vmatpush.msrb.mxu1 %v1978_v15  ;;  %2218 = vmatpush.msrb.mxu3 %v1971_v43 }
 0x55e   : > { %2188 = vmatpush.msrb.mxu2 %v1851_v16  ;;  %2131 = vmatpush.msrb.mxu0 %v1842_v4  ;;  %v1900_v16 = vld [vmem:[#allocation16 + $0x1d0] sm:$0xff]  ;;  %v1901_v4 = vld [vmem:[#allocation16 + $0x1d8] sm:$0xff] }
 0x55f   : > { %2160 = vmatpush.msrb.mxu1 %v1970_v17  ;;  %2319 = vmatpush.msra.mxu3 %v2093_v61  ;;  %v2029_v17 = vld [vmem:[#allocation16 + $0x5d8] sm:$0xff] }
 0x560   : > { %2189 = vmatpush.msrb.mxu2 %v1843_v22  ;;  %2232 = vmatpush.msra.mxu0 %v1964_v41  ;;  %v1892_v41 = vld [vmem:[#allocation16 + $0x190] sm:$0xff]  ;;  %v1714_v61 = vld [vmem:[#allocation13] sm:$0x3] }
 0x561   : > { %2261 = vmatpush.msra.mxu1 %v2092_v59  ;;  %2320 = vmatpush.msra.mxu3 %v2085_v7  ;;  %v2020_v59 = vld [vmem:[#allocation16 + $0x590] sm:$0xff]  ;;  %v1885_v7 = vld [vmem:[#allocation16 + $0x158] sm:$0xff] }
 0x562   : > { %2290 = vmatpush.msra.mxu2 %v1965_v60  ;;  %2233 = vmatpush.msra.mxu0 %v1956_v63  ;;  %v1893_v60 = vld [vmem:[#allocation16 + $0x198] sm:$0xff] }
 0x563   : > { %2262 = vmatpush.msra.mxu1 %v2084_v1  ;;  %2321 = vmatpush.msra.mxu3 %v2077_v12  ;;  %v2021_v63 = vld [vmem:[#allocation16 + $0x598] sm:$0xff]  ;;  %v1876_v12 = vld [vmem:[#allocation16 + $0x110] sm:$0xff] }
 0x564   : > { %2291 = vmatpush.msra.mxu2 %v1957_v2  ;;  %2234 = vmatpush.msra.mxu0 %v1948_v35  ;;  %v1884_v2 = vld [vmem:[#allocation16 + $0x150] sm:$0xff] }
 0x565   : > { %2263 = vmatpush.msra.mxu1 %v2076_v9  ;;  %2322 = vmatpush.msra.mxu3 %v2069_v8 }
 0x566   : > { %2292 = vmatpush.msra.mxu2 %v1949_v47  ;;  %2235 = vmatpush.msra.mxu0 %v1940_v31  ;;  %v2013_v47 = vld [vmem:[#allocation16 + $0x558] sm:$0xff]  ;;  %v2004_v31 = vld [vmem:[#allocation16 + $0x510] sm:$0xff] }
 0x567   : > { %2264 = vmatpush.msra.mxu1 %v2068_v36  ;;  %2323 = vmatpush.msra.mxu3 %v2061_v49  ;;  %v1715_v36 = vld [vmem:[#allocation14] sm:$0x3]  ;;  %v4799_v49 = vperm.slane %v1714_v61, 1 }
 0x568   : > { %2293 = vmatpush.msra.mxu2 %v1941_v32  ;;  %2236 = vmatpush.msra.mxu0 %v1932_v18  ;;  %v1877_v18 = vld [vmem:[#allocation16 + $0x118] sm:$0xff] }
 0x569   : > { %2265 = vmatpush.msra.mxu1 %v2060_v19  ;;  %2324 = vmatpush.msra.mxu3 %v2053_v28  ;;  %v2005_v19 = vld [vmem:[#allocation16 + $0x518] sm:$0xff]  ;;  %v4808_v28 = vperm.slane %v1715_v36, 1 }
 0x56a   : > { %2294 = vmatpush.msra.mxu2 %v1933_v20  ;;  %2237 = vmatpush.msra.mxu0 %v1924_v10  ;;  %v4797_v20 = vperm.slane %v1714_v61, 0  ;;  %v1868_v10 = vld [vmem:[#allocation16 + $0xd0] sm:$0xff] }
 0x56b   : > { %2266 = vmatpush.msra.mxu1 %v2052_v23  ;;  %2325 = vmatpush.msra.mxu3 %v2045_v39  ;;  %v1996_v23 = vld [vmem:[#allocation16 + $0x4d0] sm:$0xff] }
 0x56c   : > { %2295 = vmatpush.msra.mxu2 %v1925_v24  ;;  %2238 = vmatpush.msra.mxu0 %v1916_v30  ;;  %v1869_v24 = vld [vmem:[#allocation16 + $0xd8] sm:$0xff]  ;;  %v1860_v39 = vld [vmem:[#allocation16 + $0x90] sm:$0xff] }
 0x56d   : > { %2267 = vmatpush.msra.mxu1 %v2044_v0  ;;  %2326 = vmatpush.msra.mxu3 %v2037_v55  ;;  %v1852_v55 = vld [vmem:[#allocation16 + $0x50] sm:$0xff] }
 0x56e   : > { %2296 = vmatpush.msra.mxu2 %v1917_v42  ;;  %2239 = vmatpush.msra.mxu0 %v1908_v45  ;;  %v1997_v42 = vld [vmem:[#allocation16 + $0x4d8] sm:$0xff]  ;;  %v1844_v61 = vld [vmem:[#allocation16 + $0x10] sm:$0xff] }
 0x56f   : > { %2268 = vmatpush.msra.mxu1 %v2036_v54  ;;  %2327 = vmatpush.msra.mxu3 %v2029_v17  ;;  %v1861_v54 = vld [vmem:[#allocation16 + $0x98] sm:$0xff] }
 0x570   : > { %2297 = vmatpush.msra.mxu2 %v1909_v38  ;;  %2240 = vmatpush.msra.mxu0 %v1900_v16  ;;  %v1989_v38 = vld [vmem:[#allocation16 + $0x498] sm:$0xff] }
 0x571   : > { %2269 = vmatpush.msra.mxu1 %v2028_v56  ;;  %2328 = vmatpush.msra.mxu3 %v2021_v63  ;;  %v1853_v56 = vld [vmem:[#allocation16 + $0x58] sm:$0xff] }
 0x572   : > { %2298 = vmatpush.msra.mxu2 %v1901_v4  ;;  %2241 = vmatpush.msra.mxu0 %v1892_v41  ;;  %v1981_v4 = vld [vmem:[#allocation16 + $0x458] sm:$0xff] }
 0x573   : > { %2270 = vmatpush.msra.mxu1 %v2020_v59  ;;  %2329 = vmatpush.msra.mxu3 %v2013_v47  ;;  %v1845_v63 = vld [vmem:[#allocation16 + $0x18] sm:$0xff] }
 0x574   : > { %2299 = vmatpush.msra.mxu2 %v1893_v60  ;;  %2242 = vmatpush.msra.mxu0 %v1884_v2 }
 0x575   : > { %2330 = vmatpush.msra.mxu3 %v2005_v19 }
 0x576   : > { %2300 = vmatpush.msra.mxu2 %v1885_v7  ;;  %2243 = vmatpush.msra.mxu0 %v1876_v12  ;;  %v2094_v7 = vld [vmem:[#allocation16 + $0x7e0] sm:$0xff] }
 0x577   : > { %2331 = vmatpush.msra.mxu3 %v1997_v42  ;;  %v2078_v42 = vld [vmem:[#allocation16 + $0x760] sm:$0xff] }
 0x578   : > { %2301 = vmatpush.msra.mxu2 %v1877_v18  ;;  %2244 = vmatpush.msra.mxu0 %v1868_v10 }
 0x579   : > { %2332 = vmatpush.msra.mxu3 %v1989_v38 }
 0x57a   : > { %2302 = vmatpush.msra.mxu2 %v1869_v24  ;;  %2245 = vmatpush.msra.mxu0 %v1860_v39  ;;  %v1951_v39 = vld [vmem:[#allocation16 + $0x368] sm:$0xff] }
 0x57b   : > { %2333 = vmatpush.msra.mxu3 %v1981_v4 }
 0x57c   : > { %2303 = vmatpush.msra.mxu2 %v1861_v54  ;;  %2246 = vmatpush.msra.mxu0 %v1852_v55  ;;  %v2070_v54 = vld [vmem:[#allocation16 + $0x720] sm:$0xff] }
 0x57e   : > { %2304 = vmatpush.msra.mxu2 %v1853_v56  ;;  %2247 = vmatpush.msra.mxu0 %v1844_v61  ;;  %v2062_v56 = vld [vmem:[#allocation16 + $0x6e0] sm:$0xff] }
 0x580   : > { %2305 = vmatpush.msra.mxu2 %v1845_v63  ;;  %v2054_v63 = vld [vmem:[#allocation16 + $0x6a0] sm:$0xff] }
 0x5b6   : > { %v1750_v62 = vpop.xlane.xlu1 %1749 }
 0x5b7   : > { %v1760_v5 = vmul.f32 %v1750_v62, %v4432_v26 }
 0x5b9   : > { %v4775_v48 = vadd.f32 1e-05, %v1760_v5  ;;  %v2012_v5 = vld [vmem:[#allocation16 + $0x550] sm:$0xff] }
 0x5ba   : > { %2271 = vmatpush.msra.mxu1 %v2012_v5  ;;  %v1966_v5 = vld [vmem:[#allocation16 + $0x3e0] sm:$0xff] }
 0x5bb   : > { %3759 = vrsqrt.f32 %v4775_v48  ;;  %vm1774_vm3 = vweird.f32 %v4775_v48 }
 0x5bc   : > { %2272 = vmatpush.msra.mxu1 %v2004_v31  ;;  %v1967_v31 = vld [vmem:[#allocation16 + $0x3e8] sm:$0xff] }
 0x5be   : > { %v1753_v50 = vpop.xlane.xlu2 %1752  ;;  %2273 = vmatpush.msra.mxu1 %v1996_v23 }
 0x5bf   : > { %v1761_v25 = vmul.f32 %v1753_v50, %v4432_v26 }
 0x5c1   : > { %v4779_v33 = vpop.eup %3759  ;;  %v4781_v46 = vadd.f32 1e-05, %v1761_v25  ;;  %v4806_v25 = vperm.slane %v1715_v36, 0  ;;  %v2095_v36 = vld [vmem:[#allocation16 + $0x7e8] sm:$0xff] }
 0x5c2   : > { %v1769_v53 = vmul.f32 %v4779_v33, %v4775_v48  ;;  %vm1775_vm2 = vweird.f32 %v4779_v33 }
 0x5c3   : > { %3761 = vrsqrt.f32 %v4781_v46  ;;  %vm1776_vm4 = vmor %vm1774_vm3, %vm1775_vm2  ;;  %vm1784_vm6 = vweird.f32 %v4781_v46 }
 0x5c4   : > { %v1770_v15 = vmul.f32 %v4779_v33, %v1769_v53 }
 0x5c6   : > { %v1771_v22 = vmul.f32 0.5, %v1770_v15  ;;  %v1756_v43 = vpop.xlane.xlu0 %1755 }
 0x5c7   : > { %v1762_v62 = vmul.f32 %v1756_v43, %v4432_v26 }
 0x5c8   : > { %v1772_v1 = vsub.f32 1.5, %v1771_v22 }
 0x5c9   : > { %v4789_v35 = vpop.eup %3761  ;;  %v4791_v9 = vadd.f32 1e-05, %v1762_v62  ;;  %v1972_v62 = vld [vmem:[#allocation16 + $0x410] sm:$0xff] }
 0x5ca   : > { %v1773_v32 = vmul.f32 %v4779_v33, %v1772_v1  ;;  %v1779_v8 = vmul.f32 %v4789_v35, %v4781_v46  ;;  %vm1785_vm5 = vweird.f32 %v4789_v35  ;;  %v1973_v1 = vld [vmem:[#allocation16 + $0x418] sm:$0xff] }
 0x5cb   : > { %3763 = vrsqrt.f32 %v4791_v9  ;;  %vm1786_vm7 = vmor %vm1784_vm6, %vm1785_vm5  ;;  %2334 = vmatpush.msra.mxu3 %v1973_v1  ;;  %vm1794_vm9 = vweird.f32 %v4791_v9  ;;  %v1927_v1 = vld [vmem:[#allocation16 + $0x2a8] sm:$0xff] }
 0x5cc   : > { %v1777_v48 = vsel %vm1776_vm4, %v4779_v33, %v1773_v32  ;;  %v1780_v50 = vmul.f32 %v4789_v35, %v1779_v8  ;;  %v1988_v33 = vld [vmem:[#allocation16 + $0x490] sm:$0xff]  ;;  %v2086_v8 = vld [vmem:[#allocation16 + $0x7a0] sm:$0xff] }
 0x5cd   : > { %v1808_v30 = vmul.f32 %v1777_v48, %v4732_v13  ;;  %v1809_v0 = vmul.f32 %v1777_v48, %v4735_v14  ;;  %2274 = vmatpush.msra.mxu1 %v1988_v33  ;;  %v1980_v14 = vld [vmem:[#allocation16 + $0x450] sm:$0xff]  ;;  %v1959_v48 = vld [vmem:[#allocation16 + $0x3a8] sm:$0xff] }
 0x5ce   : > { %v1781_v53 = vmul.f32 0.5, %v1780_v50  ;;  %v1759_v45 = vpop.xlane.xlu1 %1758  ;;  %v2087_v50 = vld [vmem:[#allocation16 + $0x7a8] sm:$0xff] }
 0x5cf   : > { %v1821_v15 = vmul.f32 %v4797_v20, %v1808_v30  ;;  %v1822_v16 = vmul.f32 %v4799_v49, %v1809_v0  ;;  %v1763_v13 = vmul.f32 %v1759_v45, %v4432_v26  ;;  %2275 = vmatpush.msra.mxu1 %v1980_v14  ;;  %v1950_v0 = vld [vmem:[#allocation16 + $0x360] sm:$0xff]  ;;  %v2079_v33 = vld [vmem:[#allocation16 + $0x768] sm:$0xff] }
 0x5d0   : > { %v1782_v17 = vsub.f32 1.5, %v1781_v53  ;;  %v1934_v14 = vld [vmem:[#allocation16 + $0x2e0] sm:$0xff] }
 0x5d1   : > { %v4816_v22 = vpop.eup %3763  ;;  %v4819_v43 = vadd.f32 %v4806_v25, %v1821_v15  ;;  %v4822_v41 = vadd.f32 %v4808_v28, %v1822_v16  ;;  %v4824_v59 = vadd.f32 1e-05, %v1763_v13  ;;  %2276 = vmatpush.msra.mxu1 %v1972_v62  ;;  %v1943_v15 = vld [vmem:[#allocation16 + $0x328] sm:$0xff]  ;;  %v1926_v62 = vld [vmem:[#allocation16 + $0x2a0] sm:$0xff] }
 0x5d2   : > { %v1783_v26 = vmul.f32 %v4789_v35, %v1782_v17  ;;  %v1789_v60 = vmul.f32 %v4816_v22, %v4791_v9  ;;  %vm1795_vm8 = vweird.f32 %v4816_v22  ;;  %v1942_v9 = vld [vmem:[#allocation16 + $0x320] sm:$0xff]  ;;  %v2071_v16 = vld [vmem:[#allocation16 + $0x728] sm:$0xff] }
 0x5d3   : > { %3765 = vrsqrt.f32 %v4824_v59  ;;  %2132 = vmatmul.f32.vlgmr.msrb.gmra.mxu0 %v4819_v43  ;;  %2161 = vmatmul.f32.vlgmr.msrb.gmra.mxu1 %v4822_v41  ;;  %vm1796_vm10 = vmor %vm1794_vm9, %vm1795_vm8  ;;  %vm1804_vm12 = vweird.f32 %v4824_v59 }
 0x5d4   : > { %v1787_v46 = vsel %vm1786_vm7, %v4789_v35, %v1783_v26  ;;  %v1790_v2 = vmul.f32 %v4816_v22, %v1789_v60  ;;  %2190 = vmatmul.f32.vlgmr.msrb.gmra.mxu2 %v4819_v43  ;;  %2219 = vmatmul.f32.vlgmr.msrb.gmra.mxu3 %v4822_v41  ;;  %v1958_v35 = vld [vmem:[#allocation16 + $0x3a0] sm:$0xff]  ;;  %v2063_v26 = vld [vmem:[#allocation16 + $0x6e8] sm:$0xff] }
 0x5d5   : > { %v1810_v47 = vmul.f32 %v1787_v46, %v4743_v11  ;;  %v1811_v12 = vmul.f32 %v1787_v46, %v4746_v21  ;;  %2348 = vmatpush.msrb.mxu0 %v1966_v5  ;;  %2377 = vmatpush.msrb.mxu1 %v2094_v7  ;;  %v2055_v46 = vld [vmem:[#allocation16 + $0x6a8] sm:$0xff]  ;;  %v1918_v5 = vld [vmem:[#allocation16 + $0x260] sm:$0xff] }
 0x5d6   : > { %v1791_v32 = vmul.f32 0.5, %v1790_v2  ;;  %2406 = vmatpush.msrb.mxu2 %v1967_v31  ;;  %2435 = vmatpush.msrb.mxu3 %v2095_v36  ;;  %v2046_v7 = vld [vmem:[#allocation16 + $0x660] sm:$0xff]  ;;  %v2047_v31 = vld [vmem:[#allocation16 + $0x668] sm:$0xff] }
 0x5d7   : > { %v1823_v18 = vmul.f32 %v4797_v20, %v1810_v47  ;;  %v1824_v19 = vmul.f32 %v4799_v49, %v1811_v12  ;;  %2349 = vmatpush.msrb.mxu0 %v1958_v35  ;;  %2378 = vmatpush.msrb.mxu1 %v2086_v8  ;;  %v1919_v12 = vld [vmem:[#allocation16 + $0x268] sm:$0xff]  ;;  %v1910_v36 = vld [vmem:[#allocation16 + $0x220] sm:$0xff] }
 0x5d8   : > { %v1792_v11 = vsub.f32 1.5, %v1791_v32  ;;  %2407 = vmatpush.msrb.mxu2 %v1959_v48  ;;  %2436 = vmatpush.msrb.mxu3 %v2087_v50  ;;  %v2038_v32 = vld [vmem:[#allocation16 + $0x620] sm:$0xff]  ;;  %v2031_v50 = vld [vmem:[#allocation16 + $0x5e8] sm:$0xff] }
 0x5d9   : > { %v3766_v21 = vpop.eup %3765  ;;  %v4845_v10 = vadd.f32 %v4806_v25, %v1823_v18  ;;  %v4848_v23 = vadd.f32 %v4808_v28, %v1824_v19  ;;  %2350 = vmatpush.msrb.mxu0 %v1950_v0  ;;  %2379 = vmatpush.msrb.mxu1 %v2078_v42  ;;  %v1911_v18 = vld [vmem:[#allocation16 + $0x228] sm:$0xff]  ;;  %v1902_v48 = vld [vmem:[#allocation16 + $0x1e0] sm:$0xff] }
 0x5da   : > { %v1793_v24 = vmul.f32 %v4816_v22, %v1792_v11  ;;  %v1799_v30 = vmul.f32 %v3766_v21, %v4824_v59  ;;  %2408 = vmatpush.msrb.mxu2 %v1951_v39  ;;  %2437 = vmatpush.msrb.mxu3 %v2079_v33  ;;  %vm1805_vm11 = vweird.f32 %v3766_v21  ;;  %v2039_v19 = vld [vmem:[#allocation16 + $0x628] sm:$0xff]  ;;  %v2022_v11 = vld [vmem:[#allocation16 + $0x5a0] sm:$0xff] }
 0x5db   : > { %2135 = vmatmul.f32.gmra.mxu0 %v4845_v10  ;;  %2164 = vmatmul.f32.gmra.mxu1 %v4848_v23  ;;  %vm1806_vm13 = vmor %vm1804_vm12, %vm1805_vm11  ;;  %v1887_v0 = vld [vmem:[#allocation16 + $0x168] sm:$0xff]  ;;  %v1878_v39 = vld [vmem:[#allocation16 + $0x120] sm:$0xff] }
 0x5dc   : > { %v1797_v53 = vsel %vm1796_vm10, %v4816_v22, %v1793_v24  ;;  %v1800_v45 = vmul.f32 %v3766_v21, %v1799_v30  ;;  %2193 = vmatmul.f32.gmra.mxu2 %v4845_v10  ;;  %2222 = vmatmul.f32.gmra.mxu3 %v4848_v23  ;;  %v1935_v22 = vld [vmem:[#allocation16 + $0x2e8] sm:$0xff]  ;;  %v1886_v24 = vld [vmem:[#allocation16 + $0x160] sm:$0xff] }
 0x5dd   : > { %v1812_v38 = vmul.f32 %v1797_v53, %v4754_v40  ;;  %v1813_v55 = vmul.f32 %v1797_v53, %v4757_v37  ;;  %2351 = vmatpush.msrb.mxu0 %v1942_v9  ;;  %2380 = vmatpush.msrb.mxu1 %v2070_v54  ;;  %v2014_v30 = vld [vmem:[#allocation16 + $0x560] sm:$0xff]  ;;  %v2015_v42 = vld [vmem:[#allocation16 + $0x568] sm:$0xff] }
 0x5de   : > { %v1801_v13 = vmul.f32 0.5, %v1800_v45  ;;  %2409 = vmatpush.msrb.mxu2 %v1943_v15  ;;  %2438 = vmatpush.msrb.mxu3 %v2071_v16  ;;  %v2006_v33 = vld [vmem:[#allocation16 + $0x520] sm:$0xff]  ;;  %v1879_v53 = vld [vmem:[#allocation16 + $0x128] sm:$0xff] }
 0x5df   : > { %v1825_v4 = vmul.f32 %v4797_v20, %v1812_v38  ;;  %v1826_v17 = vmul.f32 %v4799_v49, %v1813_v55  ;;  %2352 = vmatpush.msrb.mxu0 %v1934_v14  ;;  %2381 = vmatpush.msrb.mxu1 %v2062_v56  ;;  %v2007_v45 = vld [vmem:[#allocation16 + $0x528] sm:$0xff]  ;;  %v1870_v9 = vld [vmem:[#allocation16 + $0xe0] sm:$0xff] }
 0x5e0   : > { %v1802_v40 = vsub.f32 1.5, %v1801_v13  ;;  %2410 = vmatpush.msrb.mxu2 %v1935_v22  ;;  %2439 = vmatpush.msrb.mxu3 %v2063_v26  ;;  %v1998_v54 = vld [vmem:[#allocation16 + $0x4e0] sm:$0xff]  ;;  %v1871_v38 = vld [vmem:[#allocation16 + $0xe8] sm:$0xff] }
 0x5e1   : > { %v4865_v37 = vadd.f32 %v4806_v25, %v1825_v4  ;;  %v4868_v60 = vadd.f32 %v4808_v28, %v1826_v17  ;;  %2353 = vmatpush.msrb.mxu0 %v1926_v62  ;;  %2382 = vmatpush.msrb.mxu1 %v2054_v63  ;;  %v1999_v55 = vld [vmem:[#allocation16 + $0x4e8] sm:$0xff]  ;;  %v1862_v15 = vld [vmem:[#allocation16 + $0xa0] sm:$0xff]  ;;  %v1968_v63 = vld [vmem:[#allocation16 + $0x3f0] sm:$0xff] }
 0x5e2   : > { %v1803_v61 = vmul.f32 %v3766_v21, %v1802_v40  ;;  %2411 = vmatpush.msrb.mxu2 %v1927_v1  ;;  %2440 = vmatpush.msrb.mxu3 %v2055_v46  ;;  %v1990_v16 = vld [vmem:[#allocation16 + $0x4a0] sm:$0xff]  ;;  %v1863_v13 = vld [vmem:[#allocation16 + $0xa8] sm:$0xff]  ;;  %v2096_v1 = vld [vmem:[#allocation16 + $0x7f0] sm:$0xff] }
 0x5e3   : > { %2138 = vmatmul.f32.gmra.mxu0 %v4865_v37  ;;  %2167 = vmatmul.f32.gmra.mxu1 %v4868_v60  ;;  %v1991_v14 = vld [vmem:[#allocation16 + $0x4a8] sm:$0xff]  ;;  %v1854_v56 = vld [vmem:[#allocation16 + $0x60] sm:$0xff]  ;;  %v1969_v46 = vld [vmem:[#allocation16 + $0x3f8] sm:$0xff] }
 0x5e4   : > { %v1807_v2 = vsel %vm1806_vm13, %v3766_v21, %v1803_v61  ;;  %2196 = vmatmul.f32.gmra.mxu2 %v4865_v37  ;;  %2225 = vmatmul.f32.gmra.mxu3 %v4868_v60  ;;  %v2023_v21 = vld [vmem:[#allocation16 + $0x5a8] sm:$0xff]  ;;  %v1982_v4 = vld [vmem:[#allocation16 + $0x460] sm:$0xff] }
 0x5e5   : > { %v1814_v59 = vmul.f32 %v1807_v2, %v4765_v44  ;;  %v1815_v47 = vmul.f32 %v1807_v2, %v4768_v52  ;;  %2354 = vmatpush.msrb.mxu0 %v1918_v5  ;;  %2383 = vmatpush.msrb.mxu1 %v2046_v7  ;;  %v1855_v17 = vld [vmem:[#allocation16 + $0x68] sm:$0xff]  ;;  %v1846_v26 = vld [vmem:[#allocation16 + $0x20] sm:$0xff]  ;;  %v2097_v2 = vld [vmem:[#allocation16 + $0x7f8] sm:$0xff] }
 0x5e6   : > { %2412 = vmatpush.msrb.mxu2 %v1919_v12  ;;  %2441 = vmatpush.msrb.mxu3 %v2047_v31  ;;  %v1983_v22 = vld [vmem:[#allocation16 + $0x468] sm:$0xff]  ;;  %v1974_v40 = vld [vmem:[#allocation16 + $0x420] sm:$0xff]  ;;  %v1960_v5 = vld [vmem:[#allocation16 + $0x3b0] sm:$0xff] }
 0x5e7   : > { %v1827_v35 = vmul.f32 %v4797_v20, %v1814_v59  ;;  %v1828_v8 = vmul.f32 %v4799_v49, %v1815_v47  ;;  %2355 = vmatpush.msrb.mxu0 %v1910_v36  ;;  %2384 = vmatpush.msrb.mxu1 %v2038_v32  ;;  %v2030_v20 = vld [vmem:[#allocation16 + $0x5e0] sm:$0xff]  ;;  %v1903_v49 = vld [vmem:[#allocation16 + $0x1e8] sm:$0xff]  ;;  %v2088_v7 = vld [vmem:[#allocation16 + $0x7b0] sm:$0xff] }
 0x5e8   : > { %2413 = vmatpush.msrb.mxu2 %v1911_v18  ;;  %2442 = vmatpush.msrb.mxu3 %v2039_v19  ;;  %v1847_v61 = vld [vmem:[#allocation16 + $0x28] sm:$0xff]  ;;  %v1961_v59 = vld [vmem:[#allocation16 + $0x3b8] sm:$0xff]  ;;  %v1952_v12 = vld [vmem:[#allocation16 + $0x370] sm:$0xff] }
 0x5e9   : > { %v4880_v44 = vadd.f32 %v4806_v25, %v1827_v35  ;;  %v4883_v52 = vadd.f32 %v4808_v28, %v1828_v8  ;;  %v1894_v25 = vld [vmem:[#allocation16 + $0x1a0] sm:$0xff]  ;;  %2356 = vmatpush.msrb.mxu0 %v1902_v48  ;;  %2385 = vmatpush.msrb.mxu1 %v2030_v20  ;;  %v1895_v28 = vld [vmem:[#allocation16 + $0x1a8] sm:$0xff]  ;;  %v2089_v47 = vld [vmem:[#allocation16 + $0x7b8] sm:$0xff] }
 0x5ea   : > { %2414 = vmatpush.msrb.mxu2 %v1903_v49  ;;  %2443 = vmatpush.msrb.mxu3 %v2031_v50  ;;  %v1975_v62 = vld [vmem:[#allocation16 + $0x428] sm:$0xff]  ;;  %v2080_v31 = vld [vmem:[#allocation16 + $0x770] sm:$0xff]  ;;  %v1953_v36 = vld [vmem:[#allocation16 + $0x378] sm:$0xff] }
 0x5eb   : > { %2141 = vmatmul.f32.gmra.mxu0 %v4880_v44  ;;  %2170 = vmatmul.f32.gmra.mxu1 %v4883_v52  ;;  %v2081_v32 = vld [vmem:[#allocation16 + $0x778] sm:$0xff]  ;;  %v1944_v35 = vld [vmem:[#allocation16 + $0x330] sm:$0xff] }
 0x5ec   : > { %2199 = vmatmul.f32.gmra.mxu2 %v4880_v44  ;;  %2228 = vmatmul.f32.gmra.mxu3 %v4883_v52  ;;  %v2072_v8 = vld [vmem:[#allocation16 + $0x730] sm:$0xff]  ;;  %v1945_v18 = vld [vmem:[#allocation16 + $0x338] sm:$0xff] }
 0x5ed   : > { %2357 = vmatpush.msrb.mxu0 %v1894_v25  ;;  %2386 = vmatpush.msrb.mxu1 %v2022_v11  ;;  %v2073_v19 = vld [vmem:[#allocation16 + $0x738] sm:$0xff]  ;;  %v1936_v48 = vld [vmem:[#allocation16 + $0x2f0] sm:$0xff] }
 0x5ee   : > { %2415 = vmatpush.msrb.mxu2 %v1895_v28  ;;  %2444 = vmatpush.msrb.mxu3 %v2023_v21  ;;  %v2064_v20 = vld [vmem:[#allocation16 + $0x6f0] sm:$0xff]  ;;  %v1937_v49 = vld [vmem:[#allocation16 + $0x2f8] sm:$0xff] }
 0x5ef   : > { %2358 = vmatpush.msrb.mxu0 %v1886_v24  ;;  %2387 = vmatpush.msrb.mxu1 %v2014_v30  ;;  %v2065_v50 = vld [vmem:[#allocation16 + $0x6f8] sm:$0xff]  ;;  %v1928_v25 = vld [vmem:[#allocation16 + $0x2b0] sm:$0xff] }
 0x5f0   : > { %2416 = vmatpush.msrb.mxu2 %v1887_v0  ;;  %2445 = vmatpush.msrb.mxu3 %v2015_v42  ;;  %v2056_v11 = vld [vmem:[#allocation16 + $0x6b0] sm:$0xff]  ;;  %v1929_v28 = vld [vmem:[#allocation16 + $0x2b8] sm:$0xff] }
 0x5f1   : > { %2359 = vmatpush.msrb.mxu0 %v1878_v39  ;;  %2388 = vmatpush.msrb.mxu1 %v2006_v33  ;;  %v2057_v21 = vld [vmem:[#allocation16 + $0x6b8] sm:$0xff]  ;;  %v1920_v24 = vld [vmem:[#allocation16 + $0x270] sm:$0xff] }
 0x5f2   : > { %2417 = vmatpush.msrb.mxu2 %v1879_v53  ;;  %2446 = vmatpush.msrb.mxu3 %v2007_v45  ;;  %v2048_v30 = vld [vmem:[#allocation16 + $0x670] sm:$0xff]  ;;  %v1921_v0 = vld [vmem:[#allocation16 + $0x278] sm:$0xff] }
 0x5f3   : > { %2248 = vmatmul.f32.vlgmr.msra.gmra.mxu0 %v4819_v43  ;;  %2277 = vmatmul.f32.vlgmr.msra.gmra.mxu1 %v4822_v41  ;;  %v2049_v42 = vld [vmem:[#allocation16 + $0x678] sm:$0xff]  ;;  %v1912_v39 = vld [vmem:[#allocation16 + $0x230] sm:$0xff] }
 0x5f4   : > { %2306 = vmatmul.f32.vlgmr.msra.gmra.mxu2 %v4819_v43  ;;  %2335 = vmatmul.f32.vlgmr.msra.gmra.mxu3 %v4822_v41  ;;  %v2040_v33 = vld [vmem:[#allocation16 + $0x630] sm:$0xff]  ;;  %v1913_v53 = vld [vmem:[#allocation16 + $0x238] sm:$0xff] }
 0x5f5   : > { %2360 = vmatpush.msrb.mxu0 %v1870_v9  ;;  %2389 = vmatpush.msrb.mxu1 %v1998_v54  ;;  %v2041_v45 = vld [vmem:[#allocation16 + $0x638] sm:$0xff]  ;;  %v1904_v9 = vld [vmem:[#allocation16 + $0x1f0] sm:$0xff] }
 0x5f6   : > { %2418 = vmatpush.msrb.mxu2 %v1871_v38  ;;  %2447 = vmatpush.msrb.mxu3 %v1999_v55  ;;  %v2032_v54 = vld [vmem:[#allocation16 + $0x5f0] sm:$0xff]  ;;  %v1905_v38 = vld [vmem:[#allocation16 + $0x1f8] sm:$0xff] }
 0x5f7   : > { %2361 = vmatpush.msrb.mxu0 %v1862_v15  ;;  %2390 = vmatpush.msrb.mxu1 %v1990_v16  ;;  %v2033_v55 = vld [vmem:[#allocation16 + $0x5f8] sm:$0xff]  ;;  %v1896_v15 = vld [vmem:[#allocation16 + $0x1b0] sm:$0xff] }
 0x5f8   : > { %2419 = vmatpush.msrb.mxu2 %v1863_v13  ;;  %2448 = vmatpush.msrb.mxu3 %v1991_v14  ;;  %v2024_v16 = vld [vmem:[#allocation16 + $0x5b0] sm:$0xff]  ;;  %v1897_v13 = vld [vmem:[#allocation16 + $0x1b8] sm:$0xff] }
 0x5f9   : > { %2362 = vmatpush.msrb.mxu0 %v1854_v56  ;;  %2391 = vmatpush.msrb.mxu1 %v1982_v4  ;;  %v2025_v14 = vld [vmem:[#allocation16 + $0x5b8] sm:$0xff]  ;;  %v1888_v56 = vld [vmem:[#allocation16 + $0x170] sm:$0xff] }
 0x5fa   : > { %2420 = vmatpush.msrb.mxu2 %v1855_v17  ;;  %2449 = vmatpush.msrb.mxu3 %v1983_v22  ;;  %v2016_v4 = vld [vmem:[#allocation16 + $0x570] sm:$0xff]  ;;  %v1889_v17 = vld [vmem:[#allocation16 + $0x178] sm:$0xff] }
 0x5fb   : > { %2251 = vmatmul.f32.gmra.mxu0 %v4845_v10  ;;  %2280 = vmatmul.f32.gmra.mxu1 %v4848_v23  ;;  %v2017_v22 = vld [vmem:[#allocation16 + $0x578] sm:$0xff] }
 0x5fc   : > { %2309 = vmatmul.f32.gmra.mxu2 %v4845_v10  ;;  %2338 = vmatmul.f32.gmra.mxu3 %v4848_v23 }
 0x5fd   : > { %2363 = vmatpush.msrb.mxu0 %v1846_v26  ;;  %2392 = vmatpush.msrb.mxu1 %v1974_v40  ;;  %v1880_v26 = vld [vmem:[#allocation16 + $0x130] sm:$0xff] }
 0x5fe   : > { %2421 = vmatpush.msrb.mxu2 %v1847_v61  ;;  %2450 = vmatpush.msrb.mxu3 %v1975_v62  ;;  %v2008_v40 = vld [vmem:[#allocation16 + $0x530] sm:$0xff]  ;;  %v1881_v61 = vld [vmem:[#allocation16 + $0x138] sm:$0xff] }
 0x5ff   : > { %2464 = vmatpush.msra.mxu0 %v1968_v63  ;;  %2493 = vmatpush.msra.mxu1 %v2096_v1  ;;  %v2009_v62 = vld [vmem:[#allocation16 + $0x538] sm:$0xff]  ;;  %v1872_v63 = vld [vmem:[#allocation16 + $0xf0] sm:$0xff] }
 0x600   : > { %2522 = vmatpush.msra.mxu2 %v1969_v46  ;;  %2551 = vmatpush.msra.mxu3 %v2097_v2  ;;  %v2000_v1 = vld [vmem:[#allocation16 + $0x4f0] sm:$0xff]  ;;  %v1873_v46 = vld [vmem:[#allocation16 + $0xf8] sm:$0xff] }
 0x601   : > { %2465 = vmatpush.msra.mxu0 %v1960_v5  ;;  %2494 = vmatpush.msra.mxu1 %v2088_v7  ;;  %v2001_v2 = vld [vmem:[#allocation16 + $0x4f8] sm:$0xff]  ;;  %v1864_v5 = vld [vmem:[#allocation16 + $0xb0] sm:$0xff] }
 0x602   : > { %2523 = vmatpush.msra.mxu2 %v1961_v59  ;;  %2552 = vmatpush.msra.mxu3 %v2089_v47  ;;  %v1992_v7 = vld [vmem:[#allocation16 + $0x4b0] sm:$0xff]  ;;  %v1865_v59 = vld [vmem:[#allocation16 + $0xb8] sm:$0xff] }
 0x603   : > { %2254 = vmatmul.f32.gmra.mxu0 %v4865_v37  ;;  %2283 = vmatmul.f32.gmra.mxu1 %v4868_v60  ;;  %v1993_v47 = vld [vmem:[#allocation16 + $0x4b8] sm:$0xff] }
 0x604   : > { %2312 = vmatmul.f32.gmra.mxu2 %v4865_v37  ;;  %2341 = vmatmul.f32.gmra.mxu3 %v4868_v60 }
 0x605   : > { %2466 = vmatpush.msra.mxu0 %v1952_v12  ;;  %2495 = vmatpush.msra.mxu1 %v2080_v31  ;;  %v1856_v12 = vld [vmem:[#allocation16 + $0x70] sm:$0xff] }
 0x606   : > { %2524 = vmatpush.msra.mxu2 %v1953_v36  ;;  %2553 = vmatpush.msra.mxu3 %v2081_v32  ;;  %v1984_v31 = vld [vmem:[#allocation16 + $0x470] sm:$0xff]  ;;  %v1857_v36 = vld [vmem:[#allocation16 + $0x78] sm:$0xff] }
 0x607   : > { %2467 = vmatpush.msra.mxu0 %v1944_v35  ;;  %2496 = vmatpush.msra.mxu1 %v2072_v8  ;;  %v1985_v32 = vld [vmem:[#allocation16 + $0x478] sm:$0xff]  ;;  %v1848_v35 = vld [vmem:[#allocation16 + $0x30] sm:$0xff] }
 0x608   : > { %2525 = vmatpush.msra.mxu2 %v1945_v18  ;;  %2554 = vmatpush.msra.mxu3 %v2073_v19  ;;  %v1976_v8 = vld [vmem:[#allocation16 + $0x430] sm:$0xff]  ;;  %v1849_v18 = vld [vmem:[#allocation16 + $0x38] sm:$0xff] }
 0x609   : > { %2468 = vmatpush.msra.mxu0 %v1936_v48  ;;  %2497 = vmatpush.msra.mxu1 %v2064_v20  ;;  %v1977_v19 = vld [vmem:[#allocation16 + $0x438] sm:$0xff]  ;;  %v2642_v48 = vld [vmem:[#allocation17 + $0xf0] sm:$0xff] }
 0x60a   : > { %2526 = vmatpush.msra.mxu2 %v1937_v49  ;;  %2555 = vmatpush.msra.mxu3 %v2065_v50  ;;  %v2674_v20 = vld [vmem:[#allocation17 + $0x1f0] sm:$0xff]  ;;  %v2640_v49 = vld [vmem:[#allocation17 + $0xe0] sm:$0xff] }
 0x60b   : > { %2257 = vmatmul.f32.gmra.mxu0 %v4880_v44  ;;  %2286 = vmatmul.f32.gmra.mxu1 %v4883_v52  ;;  %v2672_v50 = vld [vmem:[#allocation17 + $0x1e0] sm:$0xff] }
 0x60c   : > { %2315 = vmatmul.f32.gmra.mxu2 %v4880_v44  ;;  %2344 = vmatmul.f32.gmra.mxu3 %v4883_v52 }
 0x60d   : > { %2469 = vmatpush.msra.mxu0 %v1928_v25  ;;  %2498 = vmatpush.msra.mxu1 %v2056_v11  ;;  %v2638_v25 = vld [vmem:[#allocation17 + $0xd0] sm:$0xff] }
 0x60e   : > { %2527 = vmatpush.msra.mxu2 %v1929_v28  ;;  %2556 = vmatpush.msra.mxu3 %v2057_v21  ;;  %v2670_v11 = vld [vmem:[#allocation17 + $0x1d0] sm:$0xff]  ;;  %v2636_v28 = vld [vmem:[#allocation17 + $0xc0] sm:$0xff] }
 0x60f   : > { %2470 = vmatpush.msra.mxu0 %v1920_v24  ;;  %2499 = vmatpush.msra.mxu1 %v2048_v30  ;;  %v2668_v21 = vld [vmem:[#allocation17 + $0x1c0] sm:$0xff]  ;;  %v2634_v24 = vld [vmem:[#allocation17 + $0xb0] sm:$0xff] }
 0x610   : > { %2528 = vmatpush.msra.mxu2 %v1921_v0  ;;  %2557 = vmatpush.msra.mxu3 %v2049_v42  ;;  %v2666_v30 = vld [vmem:[#allocation17 + $0x1b0] sm:$0xff]  ;;  %v2632_v0 = vld [vmem:[#allocation17 + $0xa0] sm:$0xff] }
 0x611   : > { %2471 = vmatpush.msra.mxu0 %v1912_v39  ;;  %2500 = vmatpush.msra.mxu1 %v2040_v33  ;;  %v2664_v42 = vld [vmem:[#allocation17 + $0x1a0] sm:$0xff]  ;;  %v2706_v39 = vld [vmem:[#allocation17 + $0x2f0] sm:$0xff] }
 0x612   : > { %2529 = vmatpush.msra.mxu2 %v1913_v53  ;;  %2558 = vmatpush.msra.mxu3 %v2041_v45  ;;  %v2630_v33 = vld [vmem:[#allocation17 + $0x90] sm:$0xff]  ;;  %v2660_v45 = vld [vmem:[#allocation17 + $0x180] sm:$0xff] }
 0x613   : > { %2364 = vmatmul.f32.vlgmr.msrb.gmra.mxu0 %v4819_v43  ;;  %2393 = vmatmul.f32.vlgmr.msrb.gmra.mxu1 %v4822_v41  ;;  %v2662_v53 = vld [vmem:[#allocation17 + $0x190] sm:$0xff] }
 0x614   : > { %2422 = vmatmul.f32.vlgmr.msrb.gmra.mxu2 %v4819_v43  ;;  %2451 = vmatmul.f32.vlgmr.msrb.gmra.mxu3 %v4822_v41 }
 0x615   : > { %2472 = vmatpush.msra.mxu0 %v1904_v9  ;;  %2501 = vmatpush.msra.mxu1 %v2032_v54  ;;  %v2702_v9 = vld [vmem:[#allocation17 + $0x2d0] sm:$0xff] }
 0x616   : > { %2530 = vmatpush.msra.mxu2 %v1905_v38  ;;  %2559 = vmatpush.msra.mxu3 %v2033_v55  ;;  %v2626_v54 = vld [vmem:[#allocation17 + $0x70] sm:$0xff] }
 0x617   : > { %2473 = vmatpush.msra.mxu0 %v1896_v15  ;;  %2502 = vmatpush.msra.mxu1 %v2024_v16  ;;  %v2658_v38 = vld [vmem:[#allocation17 + $0x170] sm:$0xff]  ;;  %v2700_v15 = vld [vmem:[#allocation17 + $0x2c0] sm:$0xff] }
 0x618   : > { %2531 = vmatpush.msra.mxu2 %v1897_v13  ;;  %2560 = vmatpush.msra.mxu3 %v2025_v14  ;;  %v2738_v55 = vld [vmem:[#allocation17 + $0x3f0] sm:$0xff]  ;;  %v2736_v16 = vld [vmem:[#allocation17 + $0x3e0] sm:$0xff] }
 0x619   : > { %2474 = vmatpush.msra.mxu0 %v1888_v56  ;;  %2503 = vmatpush.msra.mxu1 %v2016_v4  ;;  %v2656_v13 = vld [vmem:[#allocation17 + $0x160] sm:$0xff]  ;;  %v2734_v14 = vld [vmem:[#allocation17 + $0x3d0] sm:$0xff] }
 0x61a   : > { %2532 = vmatpush.msra.mxu2 %v1889_v17  ;;  %2561 = vmatpush.msra.mxu3 %v2017_v22  ;;  %v2622_v56 = vld [vmem:[#allocation17 + $0x50] sm:$0xff]  ;;  %v2696_v17 = vld [vmem:[#allocation17 + $0x2a0] sm:$0xff] }
 0x61b   : > { %2367 = vmatmul.f32.gmra.mxu0 %v4845_v10  ;;  %2396 = vmatmul.f32.gmra.mxu1 %v4848_v23  ;;  %v2654_v4 = vld [vmem:[#allocation17 + $0x150] sm:$0xff]  ;;  %v2732_v22 = vld [vmem:[#allocation17 + $0x3c0] sm:$0xff] }
 0x61c   : > { %2425 = vmatmul.f32.gmra.mxu2 %v4845_v10  ;;  %2454 = vmatmul.f32.gmra.mxu3 %v4848_v23 }
 0x61d   : > { %2475 = vmatpush.msra.mxu0 %v1880_v26  ;;  %2504 = vmatpush.msra.mxu1 %v2008_v40  ;;  %v2620_v26 = vld [vmem:[#allocation17 + $0x40] sm:$0xff] }
 0x61e   : > { %2533 = vmatpush.msra.mxu2 %v1881_v61  ;;  %2562 = vmatpush.msra.mxu3 %v2009_v62  ;;  %v2652_v40 = vld [vmem:[#allocation17 + $0x140] sm:$0xff]  ;;  %v2694_v61 = vld [vmem:[#allocation17 + $0x290] sm:$0xff] }
 0x61f   : > { %2476 = vmatpush.msra.mxu0 %v1872_v63  ;;  %2505 = vmatpush.msra.mxu1 %v2000_v1  ;;  %v2730_v62 = vld [vmem:[#allocation17 + $0x3b0] sm:$0xff]  ;;  %v2692_v1 = vld [vmem:[#allocation17 + $0x280] sm:$0xff] }
 0x620   : > { %2534 = vmatpush.msra.mxu2 %v1873_v46  ;;  %2563 = vmatpush.msra.mxu3 %v2001_v2  ;;  %v2650_v63 = vld [vmem:[#allocation17 + $0x130] sm:$0xff]  ;;  %v2728_v46 = vld [vmem:[#allocation17 + $0x3a0] sm:$0xff] }
 0x621   : > { %2477 = vmatpush.msra.mxu0 %v1864_v5  ;;  %2506 = vmatpush.msra.mxu1 %v1992_v7  ;;  %v2616_v2 = vld [vmem:[#allocation17 + $0x20] sm:$0xff] }
 0x622   : > { %2535 = vmatpush.msra.mxu2 %v1865_v59  ;;  %2564 = vmatpush.msra.mxu3 %v1993_v47  ;;  %v2648_v5 = vld [vmem:[#allocation17 + $0x120] sm:$0xff]  ;;  %v2690_v59 = vld [vmem:[#allocation17 + $0x270] sm:$0xff] }
 0x623   : > { %2370 = vmatmul.f32.gmra.mxu0 %v4865_v37  ;;  %2399 = vmatmul.f32.gmra.mxu1 %v4868_v60  ;;  %v2726_v47 = vld [vmem:[#allocation17 + $0x390] sm:$0xff] }
 0x624   : > { %2428 = vmatmul.f32.gmra.mxu2 %v4865_v37  ;;  %2457 = vmatmul.f32.gmra.mxu3 %v4868_v60 }
 0x625   : > { %2478 = vmatpush.msra.mxu0 %v1856_v12  ;;  %2507 = vmatpush.msra.mxu1 %v1984_v31  ;;  %v2614_v12 = vld [vmem:[#allocation17 + $0x10] sm:$0xff] }
 0x626   : > { %2536 = vmatpush.msra.mxu2 %v1857_v36  ;;  %2565 = vmatpush.msra.mxu3 %v1985_v32  ;;  %v2646_v31 = vld [vmem:[#allocation17 + $0x110] sm:$0xff]  ;;  %v2688_v36 = vld [vmem:[#allocation17 + $0x260] sm:$0xff] }
 0x627   : > { %2479 = vmatpush.msra.mxu0 %v1848_v35  ;;  %2508 = vmatpush.msra.mxu1 %v1976_v8  ;;  %v2724_v32 = vld [vmem:[#allocation17 + $0x380] sm:$0xff] }
 0x628   : > { %2537 = vmatpush.msra.mxu2 %v1849_v18  ;;  %2566 = vmatpush.msra.mxu3 %v1977_v19  ;;  %v2644_v8 = vld [vmem:[#allocation17 + $0x100] sm:$0xff]  ;;  %v2686_v19 = vld [vmem:[#allocation17 + $0x250] sm:$0xff] }
 0x629   : > { %2874 = vmatpush.msrb.mxu0 %v2642_v48  ;;  %2903 = vmatpush.msrb.mxu1 %v2674_v20  ;;  %v2722_v48 = vld [vmem:[#allocation17 + $0x370] sm:$0xff] }
 0x62a   : > { %2932 = vmatpush.msrb.mxu2 %v2706_v39  ;;  %2961 = vmatpush.msrb.mxu3 %v2738_v55 }
 0x62b   : > { %2373 = vmatmul.f32.gmra.mxu0 %v4880_v44  ;;  %2402 = vmatmul.f32.gmra.mxu1 %v4883_v52 }
 0x62c   : > { %2431 = vmatmul.f32.gmra.mxu2 %v4880_v44  ;;  %2460 = vmatmul.f32.gmra.mxu3 %v4883_v52 }
 0x62d   : > { %2875 = vmatpush.msrb.mxu0 %v2640_v49  ;;  %2904 = vmatpush.msrb.mxu1 %v2672_v50  ;;  %v2684_v49 = vld [vmem:[#allocation17 + $0x240] sm:$0xff] }
 0x62e   : > { %2962 = vmatpush.msrb.mxu3 %v2736_v16  ;;  %v2720_v50 = vld [vmem:[#allocation17 + $0x360] sm:$0xff] }
 0x62f   : > { %2876 = vmatpush.msrb.mxu0 %v2638_v25  ;;  %2905 = vmatpush.msrb.mxu1 %v2670_v11 }
 0x630   : > { %2963 = vmatpush.msrb.mxu3 %v2734_v14  ;;  %v2710_v14 = vld [vmem:[#allocation17 + $0x310] sm:$0xff] }
 0x631   : > { %2877 = vmatpush.msrb.mxu0 %v2636_v28  ;;  %2906 = vmatpush.msrb.mxu1 %v2668_v21  ;;  %v2682_v28 = vld [vmem:[#allocation17 + $0x230] sm:$0xff] }
 0x632   : > { %2964 = vmatpush.msrb.mxu3 %v2732_v22  ;;  %v2718_v21 = vld [vmem:[#allocation17 + $0x350] sm:$0xff] }
 0x633   : > { %2480 = vmatmul.f32.vlgmr.msra.gmra.mxu0 %v4819_v43  ;;  %2509 = vmatmul.f32.vlgmr.msra.gmra.mxu1 %v4822_v41 }
 0x634   : > { %2538 = vmatmul.f32.vlgmr.msra.gmra.mxu2 %v4819_v43  ;;  %2567 = vmatmul.f32.vlgmr.msra.gmra.mxu3 %v4822_v41  ;;  %v2704_v43 = vld [vmem:[#allocation17 + $0x2e0] sm:$0xff] }
 0x635   : > { %2878 = vmatpush.msrb.mxu0 %v2634_v24  ;;  %2907 = vmatpush.msrb.mxu1 %v2666_v30  ;;  %v2628_v41 = vld [vmem:[#allocation17 + $0x80] sm:$0xff] }
 0x636   : > { %2933 = vmatpush.msrb.mxu2 %v2704_v43  ;;  %2965 = vmatpush.msrb.mxu3 %v2730_v62  ;;  %v2770_v43 = vld [vmem:[#allocation17 + $0x4f0] sm:$0xff]  ;;  %v2708_v62 = vld [vmem:[#allocation17 + $0x300] sm:$0xff] }
 0x637   : > { %2879 = vmatpush.msrb.mxu0 %v2632_v0  ;;  %2908 = vmatpush.msrb.mxu1 %v2664_v42  ;;  %v2680_v0 = vld [vmem:[#allocation17 + $0x220] sm:$0xff] }
 0x638   : > { %2934 = vmatpush.msrb.mxu2 %v2702_v9  ;;  %2966 = vmatpush.msrb.mxu3 %v2728_v46  ;;  %v2716_v42 = vld [vmem:[#allocation17 + $0x340] sm:$0xff]  ;;  %v2714_v9 = vld [vmem:[#allocation17 + $0x330] sm:$0xff] }
 0x639   : > { %2880 = vmatpush.msrb.mxu0 %v2630_v33  ;;  %2909 = vmatpush.msrb.mxu1 %v2662_v53 }
 0x63a   : > { %2935 = vmatpush.msrb.mxu2 %v2700_v15  ;;  %2967 = vmatpush.msrb.mxu3 %v2726_v47  ;;  %v2676_v15 = vld [vmem:[#allocation17 + $0x200] sm:$0xff] }
 0x63b   : > { %2483 = vmatmul.f32.gmra.mxu0 %v4845_v10  ;;  %2512 = vmatmul.f32.gmra.mxu1 %v4848_v23 }
 0x63c   : > { %2541 = vmatmul.f32.gmra.mxu2 %v4845_v10  ;;  %2570 = vmatmul.f32.gmra.mxu3 %v4848_v23  ;;  %v2624_v10 = vld [vmem:[#allocation17 + $0x60] sm:$0xff]  ;;  %v2698_v23 = vld [vmem:[#allocation17 + $0x2b0] sm:$0xff] }
 0x63d   : > { %2881 = vmatpush.msrb.mxu0 %v2628_v41  ;;  %2910 = vmatpush.msrb.mxu1 %v2660_v45  ;;  %v2678_v45 = vld [vmem:[#allocation17 + $0x210] sm:$0xff] }
 0x63e   : > { %2936 = vmatpush.msrb.mxu2 %v2698_v23  ;;  %2968 = vmatpush.msrb.mxu3 %v2724_v32  ;;  %v2756_v32 = vld [vmem:[#allocation17 + $0x480] sm:$0xff] }
 0x63f   : > { %2882 = vmatpush.msrb.mxu0 %v2626_v54  ;;  %2911 = vmatpush.msrb.mxu1 %v2658_v38  ;;  %v2768_v38 = vld [vmem:[#allocation17 + $0x4e0] sm:$0xff] }
 0x640   : > { %2937 = vmatpush.msrb.mxu2 %v2696_v17  ;;  %2969 = vmatpush.msrb.mxu3 %v2722_v48  ;;  %v2754_v48 = vld [vmem:[#allocation17 + $0x470] sm:$0xff] }
 0x641   : > { %2883 = vmatpush.msrb.mxu0 %v2624_v10  ;;  %2912 = vmatpush.msrb.mxu1 %v2656_v13  ;;  %v2712_v10 = vld [vmem:[#allocation17 + $0x320] sm:$0xff]  ;;  %v2766_v13 = vld [vmem:[#allocation17 + $0x4d0] sm:$0xff] }
 0x642   : > { %2938 = vmatpush.msrb.mxu2 %v2694_v61  ;;  %2970 = vmatpush.msrb.mxu3 %v2720_v50 }
 0x643   : > { %2486 = vmatmul.f32.gmra.mxu0 %v4865_v37  ;;  %2515 = vmatmul.f32.gmra.mxu1 %v4868_v60 }
 0x644   : > { %2544 = vmatmul.f32.gmra.mxu2 %v4865_v37  ;;  %2573 = vmatmul.f32.gmra.mxu3 %v4868_v60  ;;  %v4936_v37 = vld [vmem:[%s5292_s9] sm:$0xff] }
 0x645   : > { %2884 = vmatpush.msrb.mxu0 %v2622_v56  ;;  %2913 = vmatpush.msrb.mxu1 %v2654_v4  ;;  %v2618_v60 = vld [vmem:[#allocation17 + $0x30] sm:$0xff]  ;;  %v4943_v7 = vperm.slane %v4936_v37, 0  ;;  %v4949_v25 = vperm.slane %v4936_v37, 1  ;;  %v2764_v56 = vld [vmem:[#allocation17 + $0x4c0] sm:$0xff] }
 0x646   : > { %2939 = vmatpush.msrb.mxu2 %v2692_v1  ;;  %2971 = vmatpush.msrb.mxu3 %v2718_v21  ;;  %v2802_v4 = vld [vmem:[#allocation17 + $0x5f0] sm:$0xff]  ;;  %v2752_v21 = vld [vmem:[#allocation17 + $0x460] sm:$0xff] }
 0x647   : > { %2885 = vmatpush.msrb.mxu0 %v2620_v26  ;;  %2914 = vmatpush.msrb.mxu1 %v2652_v40 }
 0x648   : > { %2940 = vmatpush.msrb.mxu2 %v2690_v59  ;;  %2972 = vmatpush.msrb.mxu3 %v2716_v42  ;;  %v2750_v42 = vld [vmem:[#allocation17 + $0x450] sm:$0xff] }
 0x649   : > { %2886 = vmatpush.msrb.mxu0 %v2618_v60  ;;  %2915 = vmatpush.msrb.mxu1 %v2650_v63  ;;  %v2762_v60 = vld [vmem:[#allocation17 + $0x4b0] sm:$0xff]  ;;  %v2800_v63 = vld [vmem:[#allocation17 + $0x5e0] sm:$0xff] }
 0x64a   : > { %2941 = vmatpush.msrb.mxu2 %v2688_v36  ;;  %2973 = vmatpush.msrb.mxu3 %v2714_v9 }
 0x64b   : > { %2489 = vmatmul.f32.gmra.mxu0 %v4880_v44  ;;  %2518 = vmatmul.f32.gmra.mxu1 %v4883_v52 }
 0x64c   : > { %2547 = vmatmul.f32.gmra.mxu2 %v4880_v44  ;;  %2576 = vmatmul.f32.gmra.mxu3 %v4883_v52  ;;  %v2612_v52 = vld [vmem:[#allocation17] sm:$0xff] }
 0x64d   : > { %2887 = vmatpush.msrb.mxu0 %v2616_v2  ;;  %2916 = vmatpush.msrb.mxu1 %v2648_v5  ;;  %v2760_v2 = vld [vmem:[#allocation17 + $0x4a0] sm:$0xff]  ;;  %v2798_v5 = vld [vmem:[#allocation17 + $0x5d0] sm:$0xff] }
 0x64e   : > { %2942 = vmatpush.msrb.mxu2 %v2686_v19  ;;  %2974 = vmatpush.msrb.mxu3 %v2712_v10  ;;  %v2746_v10 = vld [vmem:[#allocation17 + $0x430] sm:$0xff] }
 0x64f   : > { %2888 = vmatpush.msrb.mxu0 %v2614_v12  ;;  %2917 = vmatpush.msrb.mxu1 %v2646_v31  ;;  %v2758_v12 = vld [vmem:[#allocation17 + $0x490] sm:$0xff]  ;;  %v2796_v31 = vld [vmem:[#allocation17 + $0x5c0] sm:$0xff] }
 0x650   : > { %v2133_v44 = vpop.f32.mrf.mxu0  ;;  %v2162_v35 = vpop.f32.mrf.mxu1  ;;  %2943 = vmatpush.msrb.mxu2 %v2684_v49  ;;  %2975 = vmatpush.msrb.mxu3 %v2710_v14  ;;  %v2792_v49 = vld [vmem:[#allocation17 + $0x5a0] sm:$0xff] }
 0x651   : > { %v2134_v18 = vadd.f32 %v2133_v44, %v4943_v7  ;;  %2889 = vmatpush.msrb.mxu0 %v2612_v52  ;;  %2918 = vmatpush.msrb.mxu1 %v2644_v8  ;;  %v2794_v44 = vld [vmem:[#allocation17 + $0x5b0] sm:$0xff] }
 0x652   : > { %2944 = vmatpush.msrb.mxu2 %v2682_v28  ;;  %2976 = vmatpush.msrb.mxu3 %v2708_v62 }
 0x653   : > { %v4946_v20 = vadd.f32 %v2162_v35, %v2134_v18  ;;  %2990 = vmatpush.msra.mxu0 %v2770_v43  ;;  %3019 = vmatpush.msra.mxu1 %v2802_v4  ;;  %v2786_v43 = vld [vmem:[#allocation17 + $0x570] sm:$0xff]  ;;  %v2744_v4 = vld [vmem:[#allocation17 + $0x420] sm:$0xff] }
 0x654   : > { %2945 = vmatpush.msrb.mxu2 %v2680_v0 }
 0x655   : > { %v2580_v11 = vmax.f32 %v4946_v20, 0.0  ;;  %2991 = vmatpush.msra.mxu0 %v2768_v38  ;;  %3020 = vmatpush.msra.mxu1 %v2800_v63  ;;  %v2778_v63 = vld [vmem:[#allocation17 + $0x530] sm:$0xff]  ;;  %v2783_v20 = vld [vmem:[#allocation17 + $0x558] sm:$0xff] }
 0x656   : > { %2946 = vmatpush.msrb.mxu2 %v2678_v45 }
 0x657   : > { %v2191_v24 = vpop.f32.mrf.mxu2  ;;  %v2220_v30 = vpop.f32.mrf.mxu3  ;;  %2890 = vmatmul.f32.vlgmr.msrb.gmra.mxu0 %v2580_v11  ;;  %3021 = vmatpush.msra.mxu1 %v2798_v5 }
 0x658   : > { %v2192_v39 = vadd.f32 %v2191_v24, %v4949_v25  ;;  %v2136_v33 = vpop.f32.mrf.mxu0  ;;  %v2165_v53 = vpop.f32.mrf.mxu1  ;;  %2992 = vmatpush.msra.mxu0 %v2766_v13  ;;  %2947 = vmatpush.msrb.mxu2 %v2676_v15  ;;  %v2790_v24 = vld [vmem:[#allocation17 + $0x590] sm:$0xff]  ;;  %v2784_v13 = vld [vmem:[#allocation17 + $0x560] sm:$0xff] }
 0x659   : > { %v2137_v41 = vadd.f32 %v2136_v33, %v4943_v7  ;;  %3022 = vmatpush.msra.mxu1 %v2796_v31 }
 0x65a   : > { %v4956_v54 = vadd.f32 %v2220_v30, %v2192_v39  ;;  %2993 = vmatpush.msra.mxu0 %v2764_v56  ;;  %v2788_v39 = vld [vmem:[#allocation17 + $0x580] sm:$0xff] }
 0x65b   : > { %v4958_v55 = vadd.f32 %v2165_v53, %v2137_v41  ;;  %3023 = vmatpush.msra.mxu1 %v2794_v44  ;;  %v4987_v53 = vperm.slane %v4936_v37, 2  ;;  %v2834_v44 = vld [vmem:[#allocation17 + $0x6f0] sm:$0xff] }
 0x65c   : > { %v2581_v16 = vmax.f32 %v4956_v54, 0.0  ;;  %2994 = vmatpush.msra.mxu0 %v2762_v60  ;;  %v2740_v60 = vld [vmem:[#allocation17 + $0x400] sm:$0xff]  ;;  %3048 = vmatpush.msra.mxu2 %v2834_v44  ;;  %v2779_v54 = vld [vmem:[#allocation17 + $0x538] sm:$0xff] }
 0x65d   : > { %v2588_v23 = vmax.f32 %v4958_v55, 0.0  ;;  %3024 = vmatpush.msra.mxu1 %v2792_v49  ;;  %v2860_v44 = vld [vmem:[#allocation17 + $0x7c0] sm:$0xff]  ;;  %v2777_v55 = vld [vmem:[#allocation17 + $0x528] sm:$0xff] }
 0x65e   : > { %2919 = vmatmul.f32.vlgmr.msrb.gmra.mxu1 %v2581_v16  ;;  %2995 = vmatpush.msra.mxu0 %v2760_v2 }
 0x65f   : > { %v2194_v17 = vpop.f32.mrf.mxu2  ;;  %v2223_v22 = vpop.f32.mrf.mxu3  ;;  %2893 = vmatmul.f32.gmra.mxu0 %v2588_v23  ;;  %3025 = vmatpush.msra.mxu1 %v2790_v24  ;;  %v2830_v24 = vld [vmem:[#allocation17 + $0x6d0] sm:$0xff] }
 0x660   : > { %v2195_v26 = vadd.f32 %v2194_v17, %v4949_v25  ;;  %v2139_v40 = vpop.f32.mrf.mxu0  ;;  %v2168_v61 = vpop.f32.mrf.mxu1  ;;  %2996 = vmatpush.msra.mxu0 %v2758_v12  ;;  %v2782_v17 = vld [vmem:[#allocation17 + $0x550] sm:$0xff] }
 0x661   : > { %v2140_v1 = vadd.f32 %v2139_v40, %v4943_v7  ;;  %3026 = vmatpush.msra.mxu1 %v2788_v39  ;;  %v2742_v40 = vld [vmem:[#allocation17 + $0x410] sm:$0xff] }
 0x662   : > { %v4968_v46 = vadd.f32 %v2223_v22, %v2195_v26  ;;  %2997 = vmatpush.msra.mxu0 %v2756_v32  ;;  %v2776_v32 = vld [vmem:[#allocation17 + $0x520] sm:$0xff] }
 0x663   : > { %v4970_v59 = vadd.f32 %v2168_v61, %v2140_v1  ;;  %3027 = vmatpush.msra.mxu1 %v2786_v43  ;;  %v2780_v61 = vld [vmem:[#allocation17 + $0x540] sm:$0xff]  ;;  %v2866_v43 = vld [vmem:[#allocation17 + $0x7f0] sm:$0xff] }
 0x664   : > { %v2589_v47 = vmax.f32 %v4968_v46, 0.0  ;;  %2998 = vmatpush.msra.mxu0 %v2754_v48  ;;  %v2641_v48 = vld [vmem:[#allocation17 + $0xe8] sm:$0xff]  ;;  %3077 = vmatpush.msra.mxu3 %v2866_v43 }
 0x665   : > { %v2596_v36 = vmax.f32 %v4970_v59, 0.0  ;;  %3028 = vmatpush.msra.mxu1 %v2784_v13  ;;  %v2865_v59 = vld [vmem:[#allocation17 + $0x7e8] sm:$0xff] }
 0x666   : > { %2922 = vmatmul.f32.gmra.mxu1 %v2589_v47  ;;  %2999 = vmatpush.msra.mxu0 %v2752_v21  ;;  %v2772_v21 = vld [vmem:[#allocation17 + $0x500] sm:$0xff] }
 0x667   : > { %v2197_v35 = vpop.f32.mrf.mxu2  ;;  %v2226_v52 = vpop.f32.mrf.mxu3  ;;  %2896 = vmatmul.f32.gmra.mxu0 %v2596_v36  ;;  %3029 = vmatpush.msra.mxu1 %v2782_v17  ;;  %v2635_v17 = vld [vmem:[#allocation17 + $0xb8] sm:$0xff] }
 0x668   : > { %v2198_v8 = vadd.f32 %v2197_v35, %v4949_v25  ;;  %v2142_v18 = vpop.f32.mrf.mxu0  ;;  %v2171_v19 = vpop.f32.mrf.mxu1  ;;  %3000 = vmatpush.msra.mxu0 %v2750_v42  ;;  %v2643_v35 = vld [vmem:[#allocation17 + $0xf8] sm:$0xff] }
 0x669   : > { %v2143_v50 = vadd.f32 %v2142_v18, %v4943_v7  ;;  %v2748_v7 = vld [vmem:[#allocation17 + $0x440] sm:$0xff]  ;;  %3030 = vmatpush.msra.mxu1 %v2780_v61  ;;  %v2774_v18 = vld [vmem:[#allocation17 + $0x510] sm:$0xff]  ;;  %v2639_v42 = vld [vmem:[#allocation17 + $0xd8] sm:$0xff] }
 0x66a   : > { %v4980_v28 = vadd.f32 %v2226_v52, %v2198_v8  ;;  %3001 = vmatpush.msra.mxu0 %v2748_v7  ;;  %v2828_v7 = vld [vmem:[#allocation17 + $0x6c0] sm:$0xff]  ;;  %v2673_v61 = vld [vmem:[#allocation17 + $0x1e8] sm:$0xff] }
 0x66b   : > { %v4982_v30 = vadd.f32 %v2171_v19, %v2143_v50  ;;  %3031 = vmatpush.msra.mxu1 %v2778_v63  ;;  %v2832_v19 = vld [vmem:[#allocation17 + $0x6e0] sm:$0xff] }
 0x66c   : > { %v2597_v0 = vmax.f32 %v4980_v28, 0.0  ;;  %3002 = vmatpush.msra.mxu0 %v2746_v10  ;;  %3049 = vmatpush.msra.mxu2 %v2832_v19  ;;  %v2824_v63 = vld [vmem:[#allocation17 + $0x6a0] sm:$0xff] }
 0x66d   : > { %v2604_v33 = vmax.f32 %v4982_v30, 0.0  ;;  %3032 = vmatpush.msra.mxu1 %v2776_v32  ;;  %v2822_v32 = vld [vmem:[#allocation17 + $0x690] sm:$0xff]  ;;  %v2820_v19 = vld [vmem:[#allocation17 + $0x680] sm:$0xff]  ;;  %v2857_v30 = vld [vmem:[#allocation17 + $0x7a8] sm:$0xff] }
 0x66e   : > { %2925 = vmatmul.f32.gmra.mxu1 %v2597_v0  ;;  %3003 = vmatpush.msra.mxu0 %v2744_v4  ;;  %v2864_v4 = vld [vmem:[#allocation17 + $0x7e0] sm:$0xff] }
 0x66f   : > { %v2200_v41 = vpop.f32.mrf.mxu2  ;;  %v2229_v45 = vpop.f32.mrf.mxu3  ;;  %2899 = vmatmul.f32.gmra.mxu0 %v2604_v33  ;;  %3033 = vmatpush.msra.mxu1 %v2774_v18  ;;  %v2669_v18 = vld [vmem:[#allocation17 + $0x1c8] sm:$0xff] }
 0x670   : > { %v2201_v9 = vadd.f32 %v2200_v41, %v4949_v25  ;;  %v2249_v38 = vpop.f32.mrf.mxu0  ;;  %v2278_v15 = vpop.f32.mrf.mxu1  ;;  %v5001_v25 = vperm.slane %v4936_v37, 3  ;;  %3004 = vmatpush.msra.mxu0 %v2742_v40  ;;  %3050 = vmatpush.msra.mxu2 %v2830_v24  ;;  %v2637_v41 = vld [vmem:[#allocation17 + $0xc8] sm:$0xff] }
 0x671   : > { %v2250_v14 = vadd.f32 %v2249_v38, %v4987_v53  ;;  %3034 = vmatpush.msra.mxu1 %v2772_v21  ;;  %v2675_v38 = vld [vmem:[#allocation17 + $0x1f8] sm:$0xff]  ;;  %3078 = vmatpush.msra.mxu3 %v2864_v4  ;;  %v2816_v4 = vld [vmem:[#allocation17 + $0x660] sm:$0xff] }
 0x672   : > { %v4995_v56 = vadd.f32 %v2229_v45, %v2201_v9  ;;  %3005 = vmatpush.msra.mxu0 %v2740_v60  ;;  %3051 = vmatpush.msra.mxu2 %v2828_v7  ;;  %v2667_v7 = vld [vmem:[#allocation17 + $0x1b8] sm:$0xff] }
 0x673   : > { %v4997_v22 = vadd.f32 %v2278_v15, %v2250_v14  ;;  %v2826_v14 = vld [vmem:[#allocation17 + $0x6b0] sm:$0xff]  ;;  %3135 = vmatpush.msrb.mxu1 %v2675_v38  ;;  %v2856_v38 = vld [vmem:[#allocation17 + $0x7a0] sm:$0xff] }
 0x674   : > { %v2605_v26 = vmax.f32 %v4995_v56, 0.0  ;;  %3106 = vmatpush.msrb.mxu0 %v2643_v35  ;;  %3052 = vmatpush.msra.mxu2 %v2826_v14 }
 0x675   : > { %v2582_v62 = vmax.f32 %v4997_v22, 0.0  ;;  %3136 = vmatpush.msrb.mxu1 %v2673_v61  ;;  %v2625_v61 = vld [vmem:[#allocation17 + $0x68] sm:$0xff] }
 0x676   : > { %2928 = vmatmul.f32.gmra.mxu1 %v2605_v26  ;;  %3107 = vmatpush.msrb.mxu0 %v2641_v48  ;;  %v2858_v48 = vld [vmem:[#allocation17 + $0x7b0] sm:$0xff] }
 0x677   : > { %v2307_v1 = vpop.f32.mrf.mxu2  ;;  %v2336_v2 = vpop.f32.mrf.mxu3  ;;  %2948 = vmatmul.f32.vlgmr.msrb.gmra.mxu2 %v2582_v62 }
 0x678   : > { %v2308_v5 = vadd.f32 %v2307_v1, %v5001_v25  ;;  %v2252_v12 = vpop.f32.mrf.mxu0  ;;  %v2281_v31 = vpop.f32.mrf.mxu1  ;;  %3108 = vmatpush.msrb.mxu0 %v2639_v42  ;;  %v2862_v1 = vld [vmem:[#allocation17 + $0x7d0] sm:$0xff]  ;;  %3053 = vmatpush.msra.mxu2 %v2824_v63  ;;  %v2629_v42 = vld [vmem:[#allocation17 + $0x88] sm:$0xff] }
 0x679   : > { %v2253_v52 = vadd.f32 %v2252_v12, %v4987_v53  ;;  %v2671_v12 = vld [vmem:[#allocation17 + $0x1d8] sm:$0xff]  ;;  %3079 = vmatpush.msra.mxu3 %v2862_v1 }
 0x67a   : > { %v5010_v8 = vadd.f32 %v2336_v2, %v2308_v5  ;;  %3109 = vmatpush.msrb.mxu0 %v2637_v41  ;;  %v2633_v2 = vld [vmem:[#allocation17 + $0xa8] sm:$0xff]  ;;  %3137 = vmatpush.msrb.mxu1 %v2671_v12  ;;  %v2814_v12 = vld [vmem:[#allocation17 + $0x650] sm:$0xff] }
 0x67b   : > { %v5012_v49 = vadd.f32 %v2281_v31, %v2253_v52  ;;  %v2631_v52 = vld [vmem:[#allocation17 + $0x98] sm:$0xff]  ;;  %3054 = vmatpush.msra.mxu2 %v2822_v32  ;;  %3080 = vmatpush.msra.mxu3 %v2860_v44  ;;  %v2852_v32 = vld [vmem:[#allocation17 + $0x780] sm:$0xff] }
 0x67c   : > { %v5311_v50 = vmax.f32 %v5010_v8, 0.0  ;;  %3110 = vmatpush.msrb.mxu0 %v2635_v17  ;;  %3138 = vmatpush.msrb.mxu1 %v2669_v18  ;;  %v2854_v17 = vld [vmem:[#allocation17 + $0x790] sm:$0xff]  ;;  %v2623_v44 = vld [vmem:[#allocation17 + $0x58] sm:$0xff]  ;;  %v5333_v56 = vmax.f32 %v5010_v8, 0.0 }
 0x67d   : > { %v5307_v39 = vmax.f32 %v5012_v49, 0.0  ;;  %3055 = vmatpush.msra.mxu2 %v2820_v19  ;;  %3081 = vmatpush.msra.mxu3 %v2858_v48  ;;  %v2812_v48 = vld [vmem:[#allocation17 + $0x640] sm:$0xff]  ;;  %v2807_v8 = vld [vmem:[#allocation17 + $0x618] sm:$0xff] }
 0x67e   : > { %2977 = vmatmul.f32.vlgmr.msrb.gmra.mxu3 %v5311_v50  ;;  %3111 = vmatpush.msrb.mxu0 %v2633_v2  ;;  %v5041_v2 = vperm.slane %v4936_v37, 4 }
 0x67f   : > { %v2310_v45 = vpop.f32.mrf.mxu2  ;;  %v2339_v9 = vpop.f32.mrf.mxu3  ;;  %2951 = vmatmul.f32.gmra.mxu2 %v5307_v39  ;;  %3139 = vmatpush.msrb.mxu1 %v2667_v7 }
 0x680   : > { %v2311_v15 = vadd.f32 %v2310_v45, %v5001_v25  ;;  %v2255_v10 = vpop.f32.mrf.mxu0  ;;  %v2284_v13 = vpop.f32.mrf.mxu1  ;;  %3112 = vmatpush.msrb.mxu0 %v2631_v52  ;;  %3082 = vmatpush.msra.mxu3 %v2856_v38  ;;  %v2661_v52 = vld [vmem:[#allocation17 + $0x188] sm:$0xff]  ;;  %v2848_v38 = vld [vmem:[#allocation17 + $0x760] sm:$0xff] }
 0x681   : > { %v2256_v40 = vadd.f32 %v2255_v10, %v4987_v53  ;;  %v2627_v10 = vld [vmem:[#allocation17 + $0x78] sm:$0xff] }
 0x682   : > { %v5022_v60 = vadd.f32 %v2339_v9, %v2311_v15  ;;  %v2818_v9 = vld [vmem:[#allocation17 + $0x670] sm:$0xff]  ;;  %3113 = vmatpush.msrb.mxu0 %v2629_v42  ;;  %3083 = vmatpush.msra.mxu3 %v2854_v17 }
 0x683   : > { %v5024_v5 = vadd.f32 %v2284_v13, %v2256_v40  ;;  %v2665_v13 = vld [vmem:[#allocation17 + $0x1a8] sm:$0xff]  ;;  %3056 = vmatpush.msra.mxu2 %v2818_v9  ;;  %v2810_v9 = vld [vmem:[#allocation17 + $0x630] sm:$0xff] }
 0x684   : > { %v5303_v31 = vmax.f32 %v5022_v60, 0.0  ;;  %3114 = vmatpush.msrb.mxu0 %v2627_v10  ;;  %3140 = vmatpush.msrb.mxu1 %v2665_v13  ;;  %v2619_v10 = vld [vmem:[#allocation17 + $0x38] sm:$0xff]  ;;  %v2657_v13 = vld [vmem:[#allocation17 + $0x168] sm:$0xff] }
 0x685   : > { %v5302_v35 = vmax.f32 %v5024_v5, 0.0  ;;  %3057 = vmatpush.msra.mxu2 %v2816_v4  ;;  %3084 = vmatpush.msra.mxu3 %v2852_v32  ;;  %v2617_v32 = vld [vmem:[#allocation17 + $0x28] sm:$0xff] }
 0x686   : > { %2980 = vmatmul.f32.gmra.mxu3 %v5303_v31  ;;  %3115 = vmatpush.msrb.mxu0 %v2625_v61  ;;  %v5055_v61 = vperm.slane %v4936_v37, 5 }
 0x687   : > { %v2313_v21 = vpop.f32.mrf.mxu2  ;;  %v2342_v24 = vpop.f32.mrf.mxu3  ;;  %2954 = vmatmul.f32.gmra.mxu2 %v5302_v35  ;;  %v2803_v35 = vld [vmem:[#allocation17 + $0x5f8] sm:$0xff] }
 0x688   : > { %v2314_v43 = vadd.f32 %v2313_v21, %v5001_v25  ;;  %v2258_v41 = vpop.f32.mrf.mxu0  ;;  %v2287_v45 = vpop.f32.mrf.mxu1  ;;  %v2850_v21 = vld [vmem:[#allocation17 + $0x770] sm:$0xff]  ;;  %3058 = vmatpush.msra.mxu2 %v2814_v12  ;;  %3116 = vmatpush.msrb.mxu0 %v2623_v44  ;;  %v2655_v44 = vld [vmem:[#allocation17 + $0x158] sm:$0xff] }
 0x689   : > { %v2259_v15 = vadd.f32 %v2258_v41, %v4987_v53  ;;  %v2663_v53 = vld [vmem:[#allocation17 + $0x198] sm:$0xff]  ;;  %3085 = vmatpush.msra.mxu3 %v2850_v21 }
 0x68a   : > { %v5034_v14 = vadd.f32 %v2342_v24, %v2314_v43  ;;  %3141 = vmatpush.msrb.mxu1 %v2663_v53  ;;  %v2621_v43 = vld [vmem:[#allocation17 + $0x48] sm:$0xff]  ;;  %v2659_v41 = vld [vmem:[#allocation17 + $0x178] sm:$0xff]  ;;  %3059 = vmatpush.msra.mxu2 %v2812_v48  ;;  %v2846_v53 = vld [vmem:[#allocation17 + $0x750] sm:$0xff] }
 0x68b   : > { %v5036_v40 = vadd.f32 %v2287_v45, %v2259_v15  ;;  %3117 = vmatpush.msrb.mxu0 %v2621_v43  ;;  %3086 = vmatpush.msra.mxu3 %v2848_v38  ;;  %v2615_v21 = vld [vmem:[#allocation17 + $0x18] sm:$0xff]  ;;  %v2613_v38 = vld [vmem:[#allocation17 + $0x8] sm:$0xff] }
 0x68c   : > { %v5301_v63 = vmax.f32 %v5034_v14, 0.0  ;;  %3142 = vmatpush.msrb.mxu1 %v2661_v52  ;;  %3060 = vmatpush.msra.mxu2 %v2810_v9  ;;  %v2806_v52 = vld [vmem:[#allocation17 + $0x610] sm:$0xff] }
 0x68d   : > { %v5300_v1 = vmax.f32 %v5036_v40, 0.0  ;;  %3118 = vmatpush.msrb.mxu0 %v2619_v10  ;;  %3087 = vmatpush.msra.mxu3 %v2846_v53  ;;  %v2651_v10 = vld [vmem:[#allocation17 + $0x138] sm:$0xff] }
 0x68e   : > { %2983 = vmatmul.f32.gmra.mxu3 %v5301_v63  ;;  %3143 = vmatpush.msrb.mxu1 %v2659_v41  ;;  %v2804_v41 = vld [vmem:[#allocation17 + $0x600] sm:$0xff]  ;;  %v2707_v53 = vld [vmem:[#allocation17 + $0x2f8] sm:$0xff] }
 0x68f   : > { %v2316_v18 = vpop.f32.mrf.mxu2  ;;  %v2345_v19 = vpop.f32.mrf.mxu3  ;;  %2957 = vmatmul.f32.gmra.mxu2 %v5300_v1  ;;  %3119 = vmatpush.msrb.mxu0 %v2617_v32  ;;  %v2771_v32 = vld [vmem:[#allocation17 + $0x4f8] sm:$0xff] }
 0x690   : > { %v2317_v24 = vadd.f32 %v2316_v18, %v5001_v25  ;;  %v2365_v42 = vpop.f32.mrf.mxu0  ;;  %v2394_v7 = vpop.f32.mrf.mxu1  ;;  %v2808_v25 = vld [vmem:[#allocation17 + $0x620] sm:$0xff]  ;;  %3144 = vmatpush.msrb.mxu1 %v2657_v13  ;;  %v2739_v1 = vld [vmem:[#allocation17 + $0x3f8] sm:$0xff] }
 0x691   : > { %v2366_v45 = vadd.f32 %v2365_v42, %v5041_v2  ;;  %3061 = vmatpush.msra.mxu2 %v2808_v25  ;;  %v2844_v18 = vld [vmem:[#allocation17 + $0x740] sm:$0xff]  ;;  %3120 = vmatpush.msrb.mxu0 %v2615_v21  ;;  %v2647_v21 = vld [vmem:[#allocation17 + $0x118] sm:$0xff] }
 0x692   : > { %v5049_v15 = vadd.f32 %v2345_v19, %v2317_v24  ;;  %v2653_v24 = vld [vmem:[#allocation17 + $0x148] sm:$0xff]  ;;  %3145 = vmatpush.msrb.mxu1 %v2655_v44  ;;  %3088 = vmatpush.msra.mxu3 %v2844_v18  ;;  %v2840_v25 = vld [vmem:[#allocation17 + $0x720] sm:$0xff]  ;;  %v2838_v18 = vld [vmem:[#allocation17 + $0x710] sm:$0xff] }
 0x693   : > { %v5051_v4 = vadd.f32 %v2394_v7, %v2366_v45  ;;  %v2842_v45 = vld [vmem:[#allocation17 + $0x730] sm:$0xff]  ;;  %3062 = vmatpush.msra.mxu2 %v2806_v52  ;;  %3121 = vmatpush.msrb.mxu0 %v2613_v38 }
 0x694   : > { %v5299_v17 = vmax.f32 %v5049_v15, 0.0  ;;  %3146 = vmatpush.msrb.mxu1 %v2653_v24  ;;  %3089 = vmatpush.msra.mxu3 %v2842_v45  ;;  %v2769_v24 = vld [vmem:[#allocation17 + $0x4e8] sm:$0xff] }
 0x695   : > { %v2584_v12 = vmax.f32 %v5051_v4, 0.0  ;;  %3063 = vmatpush.msra.mxu2 %v2804_v41  ;;  %v2703_v41 = vld [vmem:[#allocation17 + $0x2d8] sm:$0xff] }
 0x696   : > { %2986 = vmatmul.f32.gmra.mxu3 %v5299_v17  ;;  %3147 = vmatpush.msrb.mxu1 %v2651_v10  ;;  %v2645_v10 = vld [vmem:[#allocation17 + $0x108] sm:$0xff]  ;;  %v2811_v4 = vld [vmem:[#allocation17 + $0x638] sm:$0xff] }
 0x697   : > { %v2423_v19 = vpop.f32.mrf.mxu2  ;;  %v2452_v48 = vpop.f32.mrf.mxu3  ;;  %3006 = vmatmul.f32.vlgmr.msra.gmra.mxu0 %v2584_v12  ;;  %3090 = vmatpush.msra.mxu3 %v2840_v25  ;;  %v2767_v25 = vld [vmem:[#allocation17 + $0x4d8] sm:$0xff] }
 0x698   : > { %v2424_v42 = vadd.f32 %v2423_v19, %v5055_v61  ;;  %v2368_v7 = vpop.f32.mrf.mxu0  ;;  %v2397_v43 = vpop.f32.mrf.mxu1  ;;  %v2649_v19 = vld [vmem:[#allocation17 + $0x128] sm:$0xff]  ;;  %3164 = vmatpush.msrb.mxu2 %v2707_v53  ;;  %3222 = vmatpush.msra.mxu0 %v2771_v32 }
 0x699   : > { %v2369_v9 = vadd.f32 %v2368_v7, %v5041_v2  ;;  %3148 = vmatpush.msrb.mxu1 %v2649_v19  ;;  %3091 = vmatpush.msra.mxu3 %v2838_v18  ;;  %v2701_v32 = vld [vmem:[#allocation17 + $0x2c8] sm:$0xff]  ;;  %v2699_v18 = vld [vmem:[#allocation17 + $0x2b8] sm:$0xff] }
 0x69a   : > { %v5064_v13 = vadd.f32 %v2452_v48, %v2424_v42  ;;  %v2705_v48 = vld [vmem:[#allocation17 + $0x2e8] sm:$0xff]  ;;  %3223 = vmatpush.msra.mxu0 %v2769_v24  ;;  %v2763_v24 = vld [vmem:[#allocation17 + $0x4b8] sm:$0xff] }
 0x69b   : > { %v5066_v17 = vadd.f32 %v2397_v43, %v2369_v9  ;;  %v2836_v43 = vld [vmem:[#allocation17 + $0x700] sm:$0xff]  ;;  %3165 = vmatpush.msrb.mxu2 %v2705_v48  ;;  %3149 = vmatpush.msrb.mxu1 %v2647_v21  ;;  %v2765_v19 = vld [vmem:[#allocation17 + $0x4c8] sm:$0xff] }
 0x69c   : > { %v5309_v44 = vmax.f32 %v5064_v13, 0.0  ;;  %3092 = vmatpush.msra.mxu3 %v2836_v43  ;;  %3224 = vmatpush.msra.mxu0 %v2767_v25  ;;  %v2697_v43 = vld [vmem:[#allocation17 + $0x2a8] sm:$0xff]  ;;  %v5334_v22 = vmax.f32 %v5064_v13, 0.0  ;;  %v5337_v13 = vmax.f32 %v5022_v60, 0.0  ;;  %v5341_v60 = vmax.f32 %v5034_v14, 0.0 }
 0x69d   : > { %v5305_v52 = vmax.f32 %v5066_v17, 0.0  ;;  %3166 = vmatpush.msrb.mxu2 %v2703_v41  ;;  %3150 = vmatpush.msrb.mxu1 %v2645_v10  ;;  %v2735_v41 = vld [vmem:[#allocation17 + $0x3d8] sm:$0xff] }
 0x69e   : > { %3035 = vmatmul.f32.vlgmr.msra.gmra.mxu1 %v5309_v44  ;;  %3193 = vmatpush.msrb.mxu3 %v2739_v1  ;;  %v2761_v1 = vld [vmem:[#allocation17 + $0x4a8] sm:$0xff] }
 0x69f   : > { %v2426_v42 = vpop.f32.mrf.mxu2  ;;  %v2455_v7 = vpop.f32.mrf.mxu3  ;;  %3009 = vmatmul.f32.gmra.mxu0 %v5305_v52  ;;  %3167 = vmatpush.msrb.mxu2 %v2701_v32  ;;  %v2733_v32 = vld [vmem:[#allocation17 + $0x3c8] sm:$0xff] }
 0x6a0   : > { %v2427_v45 = vadd.f32 %v2426_v42, %v5055_v61  ;;  %v2371_v9 = vpop.f32.mrf.mxu0  ;;  %v2400_v38 = vpop.f32.mrf.mxu1  ;;  %v2737_v42 = vld [vmem:[#allocation17 + $0x3e8] sm:$0xff]  ;;  %3225 = vmatpush.msra.mxu0 %v2765_v19  ;;  %3251 = vmatpush.msra.mxu1 %v2803_v35 }
 0x6a1   : > { %v2372_v53 = vadd.f32 %v2371_v9, %v5041_v2  ;;  %3168 = vmatpush.msrb.mxu2 %v2699_v18  ;;  %3194 = vmatpush.msrb.mxu3 %v2737_v42  ;;  %v2759_v18 = vld [vmem:[#allocation17 + $0x498] sm:$0xff]  ;;  %v2693_v42 = vld [vmem:[#allocation17 + $0x288] sm:$0xff] }
 0x6a2   : > { %v5076_v63 = vadd.f32 %v2455_v7, %v2427_v45  ;;  %v2801_v7 = vld [vmem:[#allocation17 + $0x5e8] sm:$0xff]  ;;  %3226 = vmatpush.msra.mxu0 %v2763_v24 }
 0x6a3   : > { %v5078_v31 = vadd.f32 %v2400_v38, %v2372_v53  ;;  %v2799_v38 = vld [vmem:[#allocation17 + $0x5d8] sm:$0xff]  ;;  %3252 = vmatpush.msra.mxu1 %v2801_v7  ;;  %3169 = vmatpush.msrb.mxu2 %v2697_v43  ;;  %v2757_v24 = vld [vmem:[#allocation17 + $0x488] sm:$0xff] }
 0x6a4   : > { %v5304_v48 = vmax.f32 %v5076_v63, 0.0  ;;  %v2695_v53 = vld [vmem:[#allocation17 + $0x298] sm:$0xff]  ;;  %3195 = vmatpush.msrb.mxu3 %v2735_v41  ;;  %3227 = vmatpush.msra.mxu0 %v2761_v1  ;;  %v5095_v41 = vperm.slane %v4936_v37, 6 }
 0x6a5   : > { %v5306_v21 = vmax.f32 %v5078_v31, 0.0  ;;  %3253 = vmatpush.msra.mxu1 %v2799_v38  ;;  %3170 = vmatpush.msrb.mxu2 %v2695_v53  ;;  %v2755_v1 = vld [vmem:[#allocation17 + $0x478] sm:$0xff]  ;;  %v2793_v38 = vld [vmem:[#allocation17 + $0x5a8] sm:$0xff] }
 0x6a6   : > { %3038 = vmatmul.f32.gmra.mxu1 %v5304_v48  ;;  %v2797_v48 = vld [vmem:[#allocation17 + $0x5c8] sm:$0xff]  ;;  %3196 = vmatpush.msrb.mxu3 %v2733_v32 }
 0x6a7   : > { %v2429_v45 = vpop.f32.mrf.mxu2  ;;  %v2458_v9 = vpop.f32.mrf.mxu3  ;;  %3012 = vmatmul.f32.gmra.mxu0 %v5306_v21  ;;  %v2731_v21 = vld [vmem:[#allocation17 + $0x3b8] sm:$0xff]  ;;  %3254 = vmatpush.msra.mxu1 %v2797_v48  ;;  %v2689_v48 = vld [vmem:[#allocation17 + $0x268] sm:$0xff] }
 0x6a8   : > { %v2430_v10 = vadd.f32 %v2429_v45, %v5055_v61  ;;  %v2374_v25 = vpop.f32.mrf.mxu0  ;;  %v2403_v35 = vpop.f32.mrf.mxu1  ;;  %3228 = vmatpush.msra.mxu0 %v2759_v18  ;;  %3171 = vmatpush.msrb.mxu2 %v2693_v42  ;;  %v2691_v45 = vld [vmem:[#allocation17 + $0x278] sm:$0xff] }
 0x6a9   : > { %v2375_v19 = vadd.f32 %v2374_v25, %v5041_v2  ;;  %v2795_v2 = vld [vmem:[#allocation17 + $0x5b8] sm:$0xff]  ;;  %3197 = vmatpush.msrb.mxu3 %v2731_v21 }
 0x6aa   : > { %v5088_v52 = vadd.f32 %v2458_v9, %v2430_v10  ;;  %v2729_v9 = vld [vmem:[#allocation17 + $0x3a8] sm:$0xff]  ;;  %3229 = vmatpush.msra.mxu0 %v2757_v24  ;;  %3255 = vmatpush.msra.mxu1 %v2795_v2  ;;  %v2791_v18 = vld [vmem:[#allocation17 + $0x598] sm:$0xff] }
 0x6ab   : > { %v5090_v39 = vadd.f32 %v2403_v35, %v2375_v19  ;;  %v2727_v35 = vld [vmem:[#allocation17 + $0x398] sm:$0xff]  ;;  %3172 = vmatpush.msrb.mxu2 %v2691_v45  ;;  %3198 = vmatpush.msrb.mxu3 %v2729_v9  ;;  %v2753_v19 = vld [vmem:[#allocation17 + $0x468] sm:$0xff]  ;;  %v5109_v9 = vperm.slane %v4936_v37, 7 }
 0x6ac   : > { %v5308_v7 = vmax.f32 %v5088_v52, 0.0  ;;  %3230 = vmatpush.msra.mxu0 %v2755_v1  ;;  %3256 = vmatpush.msra.mxu1 %v2793_v38  ;;  %v2687_v24 = vld [vmem:[#allocation17 + $0x258] sm:$0xff]  ;;  %v2721_v37 = vld [vmem:[#allocation17 + $0x368] sm:$0xff] }
 0x6ad   : > { %v5310_v43 = vmax.f32 %v5090_v39, 0.0  ;;  %3173 = vmatpush.msrb.mxu2 %v2689_v48  ;;  %3199 = vmatpush.msrb.mxu3 %v2727_v35  ;;  %v2751_v2 = vld [vmem:[#allocation17 + $0x458] sm:$0xff] }
 0x6ae   : > { %3041 = vmatmul.f32.gmra.mxu1 %v5308_v7  ;;  %v2725_v7 = vld [vmem:[#allocation17 + $0x388] sm:$0xff]  ;;  %3231 = vmatpush.msra.mxu0 %v2753_v19  ;;  %v2723_v38 = vld [vmem:[#allocation17 + $0x378] sm:$0xff] }
 0x6af   : > { %v2432_v10 = vpop.f32.mrf.mxu2  ;;  %v2461_v25 = vpop.f32.mrf.mxu3  ;;  %3015 = vmatmul.f32.gmra.mxu0 %v5310_v43  ;;  %v2789_v43 = vld [vmem:[#allocation17 + $0x588] sm:$0xff]  ;;  %3257 = vmatpush.msra.mxu1 %v2791_v18  ;;  %v2683_v48 = vld [vmem:[#allocation17 + $0x238] sm:$0xff] }
 0x6b0   : > { %v2433_v53 = vadd.f32 %v2432_v10, %v5055_v61  ;;  %v2481_v32 = vpop.f32.mrf.mxu0  ;;  %v2510_v21 = vpop.f32.mrf.mxu1  ;;  %v2685_v61 = vld [vmem:[#allocation17 + $0x248] sm:$0xff]  ;;  %3174 = vmatpush.msrb.mxu2 %v2687_v24  ;;  %3200 = vmatpush.msrb.mxu3 %v2725_v7  ;;  %v2747_v7 = vld [vmem:[#allocation17 + $0x438] sm:$0xff] }
 0x6b1   : > { %v2482_v42 = vadd.f32 %v2481_v32, %v5095_v41  ;;  %3232 = vmatpush.msra.mxu0 %v2751_v2  ;;  %3258 = vmatpush.msra.mxu1 %v2789_v43  ;;  %v2749_v10 = vld [vmem:[#allocation17 + $0x448] sm:$0xff]  ;;  %v2719_v24 = vld [vmem:[#allocation17 + $0x358] sm:$0xff] }
 0x6b2   : > { %v5103_v44 = vadd.f32 %v2461_v25, %v2433_v53  ;;  %3175 = vmatpush.msrb.mxu2 %v2685_v61  ;;  %v2787_v25 = vld [vmem:[#allocation17 + $0x578] sm:$0xff]  ;;  %3201 = vmatpush.msrb.mxu3 %v2723_v38  ;;  %v2785_v19 = vld [vmem:[#allocation17 + $0x568] sm:$0xff] }
 0x6b3   : > { %v5105_v50 = vadd.f32 %v2510_v21, %v2482_v42  ;;  %3233 = vmatpush.msra.mxu0 %v2749_v10  ;;  %v2681_v18 = vld [vmem:[#allocation17 + $0x228] sm:$0xff]  ;;  %3259 = vmatpush.msra.mxu1 %v2787_v25 }
 0x6b4   : > { %v2609_v45 = vmax.f32 %v5103_v44, 0.0  ;;  %3176 = vmatpush.msrb.mxu2 %v2683_v48  ;;  %v2745_v2 = vld [vmem:[#allocation17 + $0x428] sm:$0xff]  ;;  %3202 = vmatpush.msrb.mxu3 %v2721_v37  ;;  %v2743_v48 = vld [vmem:[#allocation17 + $0x418] sm:$0xff] }
 0x6b5   : > { %v5312_v1 = vmax.f32 %v5105_v50, 0.0  ;;  %3234 = vmatpush.msra.mxu0 %v2747_v7  ;;  %3260 = vmatpush.msra.mxu1 %v2785_v19  ;;  %v2717_v25 = vld [vmem:[#allocation17 + $0x348] sm:$0xff]  ;;  %v5346_v14 = vmax.f32 %v5105_v50, 0.0 }
 0x6b6   : > { %3044 = vmatmul.f32.gmra.mxu1 %v2609_v45  ;;  %3177 = vmatpush.msrb.mxu2 %v2681_v18 }
 0x6b7   : > { %v2539_v35 = vpop.f32.mrf.mxu2  ;;  %v2568_v53 = vpop.f32.mrf.mxu3  ;;  %3064 = vmatmul.f32.vlgmr.msra.gmra.mxu2 %v5312_v1  ;;  %3122 = vmatmul.f32.vlgmr.msrb.gmra.mxu0 %v2580_v11  ;;  %v2679_v11 = vld [vmem:[#allocation17 + $0x218] sm:$0xff] }
 0x6b8   : > { %v2540_v43 = vadd.f32 %v2539_v35, %v5109_v9  ;;  %v2484_v32 = vpop.f32.mrf.mxu0  ;;  %v2513_v21 = vpop.f32.mrf.mxu1  ;;  %3203 = vmatpush.msrb.mxu3 %v2719_v24  ;;  %3235 = vmatpush.msra.mxu0 %v2745_v2  ;;  %v2781_v35 = vld [vmem:[#allocation17 + $0x548] sm:$0xff] }
 0x6b9   : > { %v2485_v42 = vadd.f32 %v2484_v32, %v5095_v41  ;;  %3261 = vmatpush.msra.mxu1 %v2783_v20  ;;  %3178 = vmatpush.msrb.mxu2 %v2679_v11  ;;  %v2741_v32 = vld [vmem:[#allocation17 + $0x408] sm:$0xff] }
 0x6ba   : > { %v5120_v61 = vadd.f32 %v2568_v53, %v2540_v43  ;;  %v2677_v53 = vld [vmem:[#allocation17 + $0x208] sm:$0xff]  ;;  %v2715_v43 = vld [vmem:[#allocation17 + $0x338] sm:$0xff]  ;;  %3204 = vmatpush.msrb.mxu3 %v2717_v25  ;;  %3236 = vmatpush.msra.mxu0 %v2743_v48 }
 0x6bb   : > { %v5122_v1 = vadd.f32 %v2513_v21, %v2485_v42  ;;  %3262 = vmatpush.msra.mxu1 %v2781_v35  ;;  %3179 = vmatpush.msrb.mxu2 %v2677_v53  ;;  %v2713_v24 = vld [vmem:[#allocation17 + $0x328] sm:$0xff]  ;;  %v2711_v48 = vld [vmem:[#allocation17 + $0x318] sm:$0xff] }
 0x6bc   : > { %v2587_v38 = vmax.f32 %v5120_v61, 0.0  ;;  %3205 = vmatpush.msrb.mxu3 %v2715_v43  ;;  %3237 = vmatpush.msra.mxu0 %v2741_v32  ;;  %v2775_v35 = vld [vmem:[#allocation17 + $0x518] sm:$0xff]  ;;  %v2709_v43 = vld [vmem:[#allocation17 + $0x308] sm:$0xff] }
 0x6bd   : > { %v2594_v10 = vmax.f32 %v5122_v1, 0.0  ;;  %3263 = vmatpush.msra.mxu1 %v2779_v54  ;;  %v2831_v53 = vld [vmem:[#allocation17 + $0x6d8] sm:$0xff]  ;;  %v2773_v32 = vld [vmem:[#allocation17 + $0x508] sm:$0xff] }
 0x6be   : > { %3093 = vmatmul.f32.vlgmr.msra.gmra.mxu3 %v2587_v38  ;;  %3151 = vmatmul.f32.vlgmr.msrb.gmra.mxu1 %v2581_v16  ;;  %v2835_v16 = vld [vmem:[#allocation17 + $0x6f8] sm:$0xff] }
 0x6bf   : > { %v2542_v37 = vpop.f32.mrf.mxu2  ;;  %v2571_v7 = vpop.f32.mrf.mxu3  ;;  %3067 = vmatmul.f32.gmra.mxu2 %v2594_v10  ;;  %3125 = vmatmul.f32.gmra.mxu0 %v2588_v23  ;;  %v2833_v23 = vld [vmem:[#allocation17 + $0x6e8] sm:$0xff]  ;;  %v2867_v54 = vld [vmem:[#allocation17 + $0x7f8] sm:$0xff] }
 0x6c0   : > { %v2543_v21 = vadd.f32 %v2542_v37, %v5109_v9  ;;  %v2487_v19 = vpop.f32.mrf.mxu0  ;;  %v2516_v18 = vpop.f32.mrf.mxu1  ;;  %3280 = vmatpush.msra.mxu2 %v2835_v16  ;;  %3206 = vmatpush.msrb.mxu3 %v2713_v24 }
 0x6c1   : > { %v2488_v42 = vadd.f32 %v2487_v19, %v5095_v41  ;;  %3264 = vmatpush.msra.mxu1 %v2777_v55 }
 0x6c2   : > { %v5136_v2 = vadd.f32 %v2571_v7, %v2543_v21  ;;  %3281 = vmatpush.msra.mxu2 %v2833_v23  ;;  %3207 = vmatpush.msrb.mxu3 %v2711_v48  ;;  %v2825_v23 = vld [vmem:[#allocation17 + $0x6a8] sm:$0xff] }
 0x6c3   : > { %v5138_v20 = vadd.f32 %v2516_v18, %v2488_v42  ;;  %3265 = vmatpush.msra.mxu1 %v2775_v35  ;;  %v2829_v18 = vld [vmem:[#allocation17 + $0x6c8] sm:$0xff]  ;;  %v2827_v42 = vld [vmem:[#allocation17 + $0x6b8] sm:$0xff] }
 0x6c4   : > { %v2595_v11 = vmax.f32 %v5136_v2, 0.0  ;;  %3282 = vmatpush.msra.mxu2 %v2831_v53  ;;  %3208 = vmatpush.msrb.mxu3 %v2709_v43  ;;  %v2823_v35 = vld [vmem:[#allocation17 + $0x698] sm:$0xff]  ;;  %v2861_v53 = vld [vmem:[#allocation17 + $0x7c8] sm:$0xff] }
 0x6c5   : > { %v2602_v25 = vmax.f32 %v5138_v20, 0.0  ;;  %3266 = vmatpush.msra.mxu1 %v2773_v32  ;;  %v2821_v43 = vld [vmem:[#allocation17 + $0x688] sm:$0xff]  ;;  %v2859_v32 = vld [vmem:[#allocation17 + $0x7b8] sm:$0xff] }
 0x6c6   : > { %3096 = vmatmul.f32.gmra.mxu3 %v2595_v11  ;;  %3154 = vmatmul.f32.gmra.mxu1 %v2589_v47 }
 0x6c7   : > { %v2545_v37 = vpop.f32.mrf.mxu2  ;;  %v2574_v7 = vpop.f32.mrf.mxu3  ;;  %3070 = vmatmul.f32.gmra.mxu2 %v2602_v25  ;;  %3128 = vmatmul.f32.gmra.mxu0 %v2596_v36 }
 0x6c8   : > { %v2546_v21 = vadd.f32 %v2545_v37, %v5109_v9  ;;  %v2490_v19 = vpop.f32.mrf.mxu0  ;;  %v2519_v16 = vpop.f32.mrf.mxu1  ;;  %3283 = vmatpush.msra.mxu2 %v2829_v18  ;;  %3309 = vmatpush.msra.mxu3 %v2867_v54  ;;  %v2853_v18 = vld [vmem:[#allocation17 + $0x788] sm:$0xff] }
 0x6c9   : > { %v2491_v46 = vadd.f32 %v2490_v19, %v5095_v41  ;;  %v2863_v41 = vld [vmem:[#allocation17 + $0x7d8] sm:$0xff]  ;;  %v2813_v54 = vld [vmem:[#allocation17 + $0x648] sm:$0xff] }
 0x6ca   : > { %v5152_v47 = vadd.f32 %v2574_v7, %v2546_v21  ;;  %3284 = vmatpush.msra.mxu2 %v2827_v42  ;;  %3310 = vmatpush.msra.mxu3 %v2865_v59  ;;  %v2815_v19 = vld [vmem:[#allocation17 + $0x658] sm:$0xff]  ;;  %v2845_v59 = vld [vmem:[#allocation17 + $0x748] sm:$0xff] }
 0x6cb   : > { %v5154_v36 = vadd.f32 %v2519_v16, %v2491_v46  ;;  %v2851_v46 = vld [vmem:[#allocation17 + $0x778] sm:$0xff]  ;;  %v2809_v16 = vld [vmem:[#allocation17 + $0x628] sm:$0xff] }
 0x6cc   : > { %v2603_v24 = vmax.f32 %v5152_v47, 0.0  ;;  %3285 = vmatpush.msra.mxu2 %v2825_v23  ;;  %3311 = vmatpush.msra.mxu3 %v2863_v41  ;;  %v2847_v42 = vld [vmem:[#allocation17 + $0x758] sm:$0xff]  ;;  %v5340_v23 = vmax.f32 %v5078_v31, 0.0  ;;  %v2805_v41 = vld [vmem:[#allocation17 + $0x608] sm:$0xff]  ;;  %v5344_v31 = vmax.f32 %v5090_v39, 0.0 }
 0x6cd   : > { %v2610_v55 = vmax.f32 %v5154_v36, 0.0  ;;  %v5225_v47 = vld [vmem:[%s5347_s20] sm:$0x3] }
 0x6ce   : > { %3099 = vmatmul.f32.gmra.mxu3 %v2603_v24  ;;  %3157 = vmatmul.f32.gmra.mxu1 %v2597_v0  ;;  %v2819_v0 = vld [vmem:[#allocation17 + $0x678] sm:$0xff] }
 0x6cf   : > { %v2548_v48 = vpop.f32.mrf.mxu2  ;;  %3073 = vmatmul.f32.gmra.mxu2 %v2610_v55  ;;  %3131 = vmatmul.f32.gmra.mxu0 %v2604_v33  ;;  %v2577_v7 = vpop.f32.mrf.mxu3  ;;  %v2817_v33 = vld [vmem:[#allocation17 + $0x668] sm:$0xff] }
 0x6d0   : > { %v2549_v37 = vadd.f32 %v2548_v48, %v5109_v9  ;;  %3286 = vmatpush.msra.mxu2 %v2823_v35  ;;  %3312 = vmatpush.msra.mxu3 %v2861_v53  ;;  %v2855_v9 = vld [vmem:[#allocation17 + $0x798] sm:$0xff]  ;;  %v2841_v35 = vld [vmem:[#allocation17 + $0x728] sm:$0xff] }
 0x6d1   : > { %v2843_v48 = vld [vmem:[#allocation17 + $0x738] sm:$0xff] }
 0x6d2   : > { %v5167_v21 = vadd.f32 %v2577_v7, %v2549_v37  ;;  %3287 = vmatpush.msra.mxu2 %v2821_v43  ;;  %3313 = vmatpush.msra.mxu3 %v2859_v32  ;;  %v2839_v53 = vld [vmem:[#allocation17 + $0x718] sm:$0xff]  ;;  %v2837_v37 = vld [vmem:[#allocation17 + $0x708] sm:$0xff]  ;;  %v5345_v7 = vmax.f32 %v5049_v15, 0.0 }
 0x6d4   : > { %v2611_v28 = vmax.f32 %v5167_v21, 0.0  ;;  %3288 = vmatpush.msra.mxu2 %v2819_v0  ;;  %3314 = vmatpush.msra.mxu3 %v2857_v30 }
 0x6d6   : > { %3102 = vmatmul.f32.gmra.mxu3 %v2611_v28  ;;  %3160 = vmatmul.f32.gmra.mxu1 %v2605_v26  ;;  %v5335_v26 = vmax.f32 %v5012_v49, 0.0  ;;  %v5338_v49 = vmax.f32 %v5076_v63, 0.0  ;;  %v5342_v63 = vmax.f32 %v5088_v52, 0.0  ;;  %v2891_v52 = vpop.f32.mrf.mxu0 }
 0x6d7   : > { %3180 = vmatmul.f32.vlgmr.msrb.gmra.mxu2 %v2582_v62  ;;  %3238 = vmatmul.f32.vlgmr.msra.gmra.mxu0 %v2584_v12  ;;  %v5336_v62 = vmax.f32 %v5066_v17, 0.0  ;;  %v2849_v12 = vld [vmem:[#allocation17 + $0x768] sm:$0xff]  ;;  %v5339_v17 = vmax.f32 %v5024_v5, 0.0  ;;  %v5343_v5 = vmax.f32 %v5036_v40, 0.0 }
 0x6d8   : > { %3289 = vmatpush.msra.mxu2 %v2817_v33  ;;  %3315 = vmatpush.msra.mxu3 %v2855_v9 }
 0x6da   : > { %3290 = vmatpush.msra.mxu2 %v2815_v19  ;;  %3316 = vmatpush.msra.mxu3 %v2853_v18 }
 0x6db   : > { %v2920_v39 = vpop.f32.mrf.mxu1 }
 0x6dc   : > { %3291 = vmatpush.msra.mxu2 %v2813_v54  ;;  %3317 = vmatpush.msra.mxu3 %v2851_v46 }
 0x6de   : > { %3209 = vmatmul.f32.vlgmr.msrb.gmra.mxu3 %v5333_v56  ;;  %3267 = vmatmul.f32.vlgmr.msra.gmra.mxu1 %v5334_v22  ;;  %v2894_v40 = vpop.f32.mrf.mxu0 }
 0x6df   : > { %3183 = vmatmul.f32.gmra.mxu2 %v5335_v26  ;;  %3241 = vmatmul.f32.gmra.mxu0 %v5336_v62 }
 0x6e0   : > { %3292 = vmatpush.msra.mxu2 %v2811_v4  ;;  %3318 = vmatpush.msra.mxu3 %v2849_v12 }
 0x6e2   : > { %3293 = vmatpush.msra.mxu2 %v2809_v16  ;;  %3319 = vmatpush.msra.mxu3 %v2847_v42 }
 0x6e3   : > { %v2923_v15 = vpop.f32.mrf.mxu1 }
 0x6e4   : > { %3294 = vmatpush.msra.mxu2 %v2807_v8  ;;  %3320 = vmatpush.msra.mxu3 %v2845_v59 }
 0x6e6   : > { %3212 = vmatmul.f32.gmra.mxu3 %v5337_v13  ;;  %3270 = vmatmul.f32.gmra.mxu1 %v5338_v49  ;;  %v2897_v50 = vpop.f32.mrf.mxu0 }
 0x6e7   : > { %3186 = vmatmul.f32.gmra.mxu2 %v5339_v17  ;;  %3244 = vmatmul.f32.gmra.mxu0 %v5340_v23 }
 0x6e8   : > { %3295 = vmatpush.msra.mxu2 %v2805_v41  ;;  %3321 = vmatpush.msra.mxu3 %v2843_v48 }
 0x6ea   : > { %3322 = vmatpush.msra.mxu3 %v2841_v35 }
 0x6ec   : > { %3323 = vmatpush.msra.mxu3 %v2839_v53 }
 0x6ee   : > { %3215 = vmatmul.f32.gmra.mxu3 %v5341_v60  ;;  %3273 = vmatmul.f32.gmra.mxu1 %v5342_v63  ;;  %v2900_v1 = vpop.f32.mrf.mxu0 }
 0x6ef   : > { %3189 = vmatmul.f32.gmra.mxu2 %v5343_v5  ;;  %3247 = vmatmul.f32.gmra.mxu0 %v5344_v31 }
 0x6f0   : > { %3324 = vmatpush.msra.mxu3 %v2837_v37 }
 0x6f6   : > { %3218 = vmatmul.f32.gmra.mxu3 %v5345_v7  ;;  %3276 = vmatmul.f32.gmra.mxu1 %v2609_v45  ;;  %v2926_v45 = vpop.f32.mrf.mxu1 }
 0x6f7   : > { %3296 = vmatmul.f32.vlgmr.msra.gmra.mxu2 %v5346_v14 }
 0x6fa   : > { %v2949_v44 = vpop.f32.mrf.mxu2 }
 0x6fe   : > { %3325 = vmatmul.f32.vlgmr.msra.gmra.mxu3 %v2587_v38 }
 0x6ff   : > { %3299 = vmatmul.f32.gmra.mxu2 %v2594_v10  ;;  %v2929_v10 = vpop.f32.mrf.mxu1 }
 0x701   : > { %v2978_v61 = vpop.f32.mrf.mxu3 }
 0x702   : > { %v2952_v38 = vpop.f32.mrf.mxu2 }
 0x706   : > { %3328 = vmatmul.f32.gmra.mxu3 %v2595_v11 }
 0x707   : > { %3302 = vmatmul.f32.gmra.mxu2 %v2602_v25 }
 0x709   : > { %v2981_v20 = vpop.f32.mrf.mxu3 }
 0x70a   : > { %v2955_v25 = vpop.f32.mrf.mxu2 }
 0x70e   : > { %3331 = vmatmul.f32.gmra.mxu3 %v2603_v24 }
 0x70f   : > { %3305 = vmatmul.f32.gmra.mxu2 %v2610_v55  ;;  %v2870_v55 = vperm.slane %v5225_v47, 0 }
 0x711   : > { %v2984_v24 = vpop.f32.mrf.mxu3  ;;  %v2892_v21 = vadd.f32 %v2891_v52, %v2870_v55  ;;  %v2895_v54 = vadd.f32 %v2894_v40, %v2870_v55  ;;  %v2898_v59 = vadd.f32 %v2897_v50, %v2870_v55  ;;  %v2901_v37 = vadd.f32 %v2900_v1, %v2870_v55 }
 0x712   : > { %v2958_v32 = vpop.f32.mrf.mxu2 }
 0x713   : > { %v2924_v56 = vadd.f32 %v2923_v15, %v2895_v54  ;;  %v2927_v23 = vadd.f32 %v2926_v45, %v2898_v59  ;;  %v2930_v14 = vadd.f32 %v2929_v10, %v2901_v37 }
 0x714   : > { %v3007_v2 = vpop.f32.mrf.mxu0 }
 0x715   : > { %v2953_v26 = vadd.f32 %v2952_v38, %v2924_v56  ;;  %v2956_v48 = vadd.f32 %v2955_v25, %v2927_v23  ;;  %v2959_v40 = vadd.f32 %v2958_v32, %v2930_v14 }
 0x716   : > { %3334 = vmatmul.f32.gmra.mxu3 %v2611_v28  ;;  %v2921_v28 = vadd.f32 %v2920_v39, %v2892_v21 }
 0x717   : > { %v2982_v16 = vadd.f32 %v2981_v20, %v2953_v26  ;;  %v2985_v60 = vadd.f32 %v2984_v24, %v2956_v48 }
 0x718   : > { %v2950_v30 = vadd.f32 %v2949_v44, %v2921_v28 }
 0x719   : > { %v2987_v33 = vpop.f32.mrf.mxu3 }
 0x71a   : > { %v2979_v9 = vadd.f32 %v2978_v61, %v2950_v30  ;;  %v2988_v44 = vadd.f32 %v2987_v33, %v2959_v40 }
 0x71b   : > { %v3036_v11 = vpop.f32.mrf.mxu1 }
 0x71c   : > { %v3010_v36 = vpop.f32.mrf.mxu0  ;;  %v3008_v46 = vadd.f32 %v3007_v2, %v2979_v9 }
 0x71d   : > { %v3011_v13 = vadd.f32 %v3010_v36, %v2982_v16 }
 0x71e   : > { %v3037_v22 = vadd.f32 %v3036_v11, %v3008_v46 }
 0x723   : > { %v3039_v43 = vpop.f32.mrf.mxu1 }
 0x724   : > { %v3013_v0 = vpop.f32.mrf.mxu0  ;;  %v3040_v41 = vadd.f32 %v3039_v43, %v3011_v13 }
 0x725   : > { %v3014_v7 = vadd.f32 %v3013_v0, %v2985_v60 }
 0x72b   : > { %v3042_v18 = vpop.f32.mrf.mxu1 }
 0x72c   : > { %v3016_v4 = vpop.f32.mrf.mxu0  ;;  %v3043_v52 = vadd.f32 %v3042_v18, %v3014_v7 }
 0x72d   : > { %v3017_v38 = vadd.f32 %v3016_v4, %v2988_v44 }
 0x733   : > { %v3045_v17 = vpop.f32.mrf.mxu1 }
 0x734   : > { %v3123_v31 = vpop.f32.mrf.mxu0  ;;  %v3046_v1 = vadd.f32 %v3045_v17, %v3017_v38 }
 0x73a   : > { %v3065_v19 = vpop.f32.mrf.mxu2 }
 0x73b   : > { %v3066_v62 = vadd.f32 %v3065_v19, %v3037_v22  ;;  %v3152_v39 = vpop.f32.mrf.mxu1 }
 0x73c   : > { %v3126_v20 = vpop.f32.mrf.mxu0 }
 0x741   : > { %v3094_v12 = vpop.f32.mrf.mxu3 }
 0x742   : > { %v3095_v42 = vadd.f32 %v3094_v12, %v3066_v62  ;;  %v3068_v8 = vpop.f32.mrf.mxu2 }
 0x743   : > { %v3069_v35 = vadd.f32 %v3068_v8, %v3040_v41  ;;  %v3155_v25 = vpop.f32.mrf.mxu1 }
 0x744   : > { %v3338_v49 = vadd.f32 %v3095_v42, %v4699_v27  ;;  %v3129_v55 = vpop.f32.mrf.mxu0 }
 0x746   : > { %3346 = vst [vmem:[%s5231_s16] sm:$0xff] %v3338_v49 }
 0x749   : > { %v3097_v53 = vpop.f32.mrf.mxu3 }
 0x74a   : > { %v3098_v63 = vadd.f32 %v3097_v53, %v3069_v35  ;;  %v3071_v5 = vpop.f32.mrf.mxu2 }
 0x74b   : > { %v3072_v15 = vadd.f32 %v3071_v5, %v3043_v52  ;;  %v3158_v21 = vpop.f32.mrf.mxu1 }
 0x74c   : > { %v3340_v27 = vadd.f32 %v3098_v63, %v4707_v34  ;;  %v3132_v28 = vpop.f32.mrf.mxu0 }
 0x74e   : > { %3348 = vst [vmem:[%s5231_s16 + $0x10] sm:$0xff] %v3340_v27 }
 0x751   : > { %v3100_v50 = vpop.f32.mrf.mxu3 }
 0x752   : > { %v3101_v45 = vadd.f32 %v3100_v50, %v3072_v15  ;;  %v3074_v61 = vpop.f32.mrf.mxu2 }
 0x753   : > { %v3075_v11 = vadd.f32 %v3074_v61, %v3046_v1  ;;  %v3161_v33 = vpop.f32.mrf.mxu1 }
 0x754   : > { %v3342_v2 = vadd.f32 %v3101_v45, %v4715_v57  ;;  %v2871_v57 = vperm.slane %v5225_v47, 1  ;;  %v3239_v46 = vpop.f32.mrf.mxu0 }
 0x756   : > { %3350 = vst [vmem:[%s5231_s16 + $0x20] sm:$0xff] %v3342_v2  ;;  %v3124_v9 = vadd.f32 %v3123_v31, %v2871_v57  ;;  %v3130_v47 = vadd.f32 %v3129_v55, %v2871_v57  ;;  %v3133_v7 = vadd.f32 %v3132_v28, %v2871_v57 }
 0x758   : > { %v3153_v18 = vadd.f32 %v3152_v39, %v3124_v9  ;;  %v3159_v41 = vadd.f32 %v3158_v21, %v3130_v47  ;;  %v3162_v52 = vadd.f32 %v3161_v33, %v3133_v7 }
 0x759   : > { %v3103_v34 = vpop.f32.mrf.mxu3 }
 0x75a   : > { %v3104_v10 = vadd.f32 %v3103_v34, %v3075_v11  ;;  %v3181_v36 = vpop.f32.mrf.mxu2 }
 0x75b   : > { %v3182_v56 = vadd.f32 %v3181_v36, %v3153_v18  ;;  %v3268_v26 = vpop.f32.mrf.mxu1 }
 0x75c   : > { %v3344_v24 = vadd.f32 %v3104_v10, %v4723_v3  ;;  %v3127_v3 = vadd.f32 %v3126_v20, %v2871_v57  ;;  %v3242_v8 = vpop.f32.mrf.mxu0 }
 0x75e   : > { %3352 = vst [vmem:[%s5231_s16 + $0x30] sm:$0xff] %v3344_v24  ;;  %v3156_v4 = vadd.f32 %v3155_v25, %v3127_v3 }
 0x761   : > { %v3210_v43 = vpop.f32.mrf.mxu3 }
 0x762   : > { %v3184_v32 = vpop.f32.mrf.mxu2  ;;  %v3211_v22 = vadd.f32 %v3210_v43, %v3182_v56 }
 0x763   : > { %v3185_v42 = vadd.f32 %v3184_v32, %v3156_v4  ;;  %v3271_v17 = vpop.f32.mrf.mxu1 }
 0x764   : > { %v3240_v12 = vadd.f32 %v3239_v46, %v3211_v22  ;;  %v3245_v37 = vpop.f32.mrf.mxu0 }
 0x766   : > { %v3269_v13 = vadd.f32 %v3268_v26, %v3240_v12 }
 0x769   : > { %v3213_v0 = vpop.f32.mrf.mxu3 }
 0x76a   : > { %v3187_v30 = vpop.f32.mrf.mxu2  ;;  %v3214_v59 = vadd.f32 %v3213_v0, %v3185_v42 }
 0x76b   : > { %v3188_v60 = vadd.f32 %v3187_v30, %v3159_v41  ;;  %v3274_v15 = vpop.f32.mrf.mxu1 }
 0x76c   : > { %v3243_v48 = vadd.f32 %v3242_v8, %v3214_v59  ;;  %v3248_v2 = vpop.f32.mrf.mxu0 }
 0x76e   : > { %v3272_v31 = vadd.f32 %v3271_v17, %v3243_v48 }
 0x771   : > { %v3216_v19 = vpop.f32.mrf.mxu3 }
 0x772   : > { %v3190_v54 = vpop.f32.mrf.mxu2  ;;  %v3217_v5 = vadd.f32 %v3216_v19, %v3188_v60 }
 0x773   : > { %v3191_v44 = vadd.f32 %v3190_v54, %v3162_v52  ;;  %v3277_v34 = vpop.f32.mrf.mxu1 }
 0x774   : > { %v3246_v39 = vadd.f32 %v3245_v37, %v3217_v5 }
 0x776   : > { %v3275_v61 = vadd.f32 %v3274_v15, %v3246_v39 }
 0x779   : > { %v3219_v62 = vpop.f32.mrf.mxu3 }
 0x77a   : > { %v3297_v16 = vpop.f32.mrf.mxu2 }
 0x77b   : > { %v3298_v49 = vadd.f32 %v3297_v16, %v3269_v13 }
 0x781   : > { %v3326_v23 = vpop.f32.mrf.mxu3 }
 0x782   : > { %v3327_v35 = vadd.f32 %v3326_v23, %v3298_v49  ;;  %v3300_v53 = vpop.f32.mrf.mxu2 }
 0x783   : > { %v3301_v27 = vadd.f32 %v3300_v53, %v3272_v31 }
 0x784   : > { %v3339_v63 = vadd.f32 %v3327_v35, %v4702_v29  ;;  %v3220_v29 = vadd.f32 %v3219_v62, %v3191_v44 }
 0x786   : > { %3347 = vst [vmem:[%s5231_s16 + $0x8] sm:$0xff] %v3339_v63  ;;  %v3249_v1 = vadd.f32 %v3248_v2, %v3220_v29 }
 0x789   : > { %v3329_v14 = vpop.f32.mrf.mxu3 }
 0x78a   : > { %v3330_v40 = vadd.f32 %v3329_v14, %v3301_v27  ;;  %v3303_v50 = vpop.f32.mrf.mxu2 }
 0x78b   : > { %v3304_v38 = vadd.f32 %v3303_v50, %v3275_v61 }
 0x78c   : > { %v3341_v45 = vadd.f32 %v3330_v40, %v4710_v51  ;;  %v3278_v51 = vadd.f32 %v3277_v34, %v3249_v1 }
 0x78e   : > { %3349 = vst [vmem:[%s5231_s16 + $0x18] sm:$0xff] %v3341_v45 }
 0x791   : > { %v3332_v20 = vpop.f32.mrf.mxu3 }
 0x792   : > { %v3333_v11 = vadd.f32 %v3332_v20, %v3304_v38  ;;  %v3306_v10 = vpop.f32.mrf.mxu2 }
 0x793   : > { %v3307_v36 = vadd.f32 %v3306_v10, %v3278_v51 }
 0x794   : > { %v3343_v25 = vadd.f32 %v3333_v11, %v4718_v58 }
 0x796   : > { %3351 = vst [vmem:[%s5231_s16 + $0x28] sm:$0xff] %v3343_v25 }
 0x799   : > { %v3335_v24 = vpop.f32.mrf.mxu3 }
 0x79a   : > { %v3336_v55 = vadd.f32 %v3335_v24, %v3307_v36 }
 0x79c   : > { %v3345_v43 = vadd.f32 %v3336_v55, %v4726_v6 }
 0x79e   : > { %3353 = vst [vmem:[%s5231_s16 + $0x38] sm:$0xff] %v3345_v43 }
 0x79f   : > { %4102 = shalt.err (!%p4099_p9)
}
 0x7a0   : > { %s4179_s15 = smov 256   ;;  %s4180_s16 = smov 16  }
 0x7a1   : > { %3609 = dma.vmem_to_hbm [thread:$0]  (%p4358_p13), %s3368_s2, 1024, %s3370_s4, %s3355_s28, %s4179_s15, %s4179_s15, %s4180_s16  }
 0x7a2 PF: > { %s3384_s27 = sand.u32 1, %s4149_s21   ;;  %p5349_p10 = scmp.ge.s32.totalorder %s4161_s24, 2 }
 0x7a3   : > { %s3385_s13 = scalar_lea.sflag [#allocation4], %s3384_s27 }
 0x7a4   : > { %p3644_p11 = pnand %p5349_p10, %p4363_p5 }
 0x7a6   : > { %p3645_p0 = pneg %p3644_p11 }
 0x7a8   : > { %4144 = dma.done.wait (%p3645_p0), %s3385_s13, 1024  }
 0x7a9   : > { %4146 = vsyncadd (%p3645_p0), %s3385_s13, 4294966272  ;;  %p30_p2 = scmp.ge.s32.totalorder %s4338_s19, 4   ;;  %s5350_s21 = smov %s4153_s22 }
 0x7aa   : > { %s5351_s22 = smov %s4157_s23  ;;  %s5352_s23 = smov %s4350_s26 }
 0x7ab   : > { %s5353_s24 = smov %s4338_s19  ;;  %32 = sbr.rel (!%p30_p2) target bundleno = 17 (0x11), region = 149 }
 0x7b0   :  { %3391 = vsyncpa [#allocation3], 1 }
 0x7b1   :  { %3393 = vsyncpa [#allocation3 + $0x1], 1 }
 0x7b2   :  { %3394 = vsyncpa [#allocation6], 1 }
 0x7b3   :  { %3395 = vsyncpa [#allocation9], 1 }
 0x7b4   :  { %3396 = vsyncpa [#allocation12], 1 }
 0x7b5   :  { %3397 = vsyncpa [#allocation15], 1 }
 0x7b6   :  { %3398 = vsyncpa [#allocation18], 1 }
 0x7b7   :  { %3399 = vsyncpa [#allocation4], 1 }
 0x7b8   :  { %3401 = vsyncpa [#allocation4 + $0x1], 1 }

</bundles_post_ra>
